<compile_context>
chip_gen: v6e
topology: v6e:2x2x1
jax: 0.10.0
libtpu: 0.0.40
codegen_flags: <defaults>
</compile_context>

<pallas_src>
import jax
import jax.numpy as jnp
import numpy as np
from jax.experimental import pallas as pl
from jax.experimental.pallas import tpu as pltpu


# ----------------------------------------------------------------------------
# Pallas kernel
# ----------------------------------------------------------------------------

def _instance_mlp_kernel(ids_ref, vis_ref, ltab_ref,
                         vw1_ref, vb1_ref, vw2_ref, vb2_ref,
                         iw1v_ref, ib1_ref, iw2_ref, ib2_ref,
                         feat256_ref, pred_ref):
    f32 = jnp.float32
    bf16 = jnp.bfloat16

    # --- language branch, folded: exact one-hot gather of the precomputed
    #     per-class contribution to instance_fc1 (vocab is tiny & VMEM-resident).
    ids = ids_ref[...]                                       # (TM, 1) int32
    tm = ids.shape[0]
    vocab = ltab_ref.shape[0]
    one_hot = (ids == jax.lax.broadcasted_iota(jnp.int32, (tm, vocab), 1)).astype(f32)
    lang = jnp.dot(one_hot, ltab_ref[...], preferred_element_type=f32)   # (TM, 256) f32

    # --- visual branch: 1024 -> 512 -> 256, ReLU after each linear
    #     (f32 DMA, bf16 cast on-chip; f32 accumulation on the MXU)
    vis = vis_ref[...].astype(bf16)
    v = jnp.dot(vis, vw1_ref[...], preferred_element_type=f32) + vb1_ref[...]
    v = jnp.maximum(v, 0.0)
    v = jnp.dot(v.astype(bf16), vw2_ref[...], preferred_element_type=f32) + vb2_ref[...]
    v = jnp.maximum(v, 0.0)

    # --- instance_fc1 on concat([language, visual], dim=1):
    #     == lang_contrib + visual @ W[256:] + b   (lang_contrib pre-folded)
    h = lang + jnp.dot(v.astype(bf16), iw1v_ref[...], preferred_element_type=f32) + ib1_ref[...]
    h = jnp.maximum(h, 0.0)
    feat256_ref[...] = h                                      # (TM, 256) f32

    # --- instance_fc2 (256 -> 1) + sigmoid: VPU multiply + lane reduce.
    #     No full-tile transpose, no M=1 MXU push; (TM,1) masked store is free.
    logit = jnp.sum(h * iw2_ref[...], axis=-1, keepdims=True) + ib2_ref[0, 0]
    pred_ref[...] = jax.nn.sigmoid(logit)


# ----------------------------------------------------------------------------
# Wrapper
# ----------------------------------------------------------------------------

def _num_tensorcores():
    try:
        dev = jax.devices()[0]
        nc = getattr(dev, "num_cores", None)
        if nc:
            return int(nc)
        kind = (getattr(dev, "device_kind", "") or "").lower()
        return 2 if "v7" in kind else 1
    except Exception:
        return 1


def _choose_tm(n):
    if n <= 128:
        return 128
    if _num_tensorcores() >= 2:
        # v7x: keep >= 2 tiles so both TensorCores get work; grow the tile
        # only once that still leaves multiple tiles.
        return 256 if n > 512 else 128
    # single TensorCore (v5e / v6e): big tiles amortize per-grid-step overhead
    if n > 1024:
        return 512
    if n > 256:
        return 256
    return 128


def instance_head_mlp(class_ids, vis, params):
    """class_ids: [N] int32 (already pred_classes-1), vis: [N,1024] f32
    -> (feat256 [N,256] f32, pred [N] f32)."""
    (lang_tab, vw1, vb1, vw2, vb2, iw1v, ib1, iw2, ib2) = params
    N = vis.shape[0]
    if N == 0:
        return jnp.zeros((0, 256), jnp.float32), jnp.zeros((0,), jnp.float32)

    TM = _choose_tm(N)
    n_tiles = pl.cdiv(N, TM)
    n_pad = n_tiles * TM
    if n_pad != N:
        vis = jnp.pad(vis, ((0, n_pad - N), (0, 0)))
        class_ids = jnp.pad(class_ids, (0, n_pad - N))   # padded rows gather row 0 (sliced off later)

    ids2d = class_ids.astype(jnp.int32).reshape(n_pad, 1)

    def row_spec(d):
        return pl.BlockSpec((TM, d), lambda i: (i, 0))

    def const_spec(a):
        # fetched once (constant index map); single VMEM buffer, no rotation
        return pl.BlockSpec(a.shape, lambda i: (0, 0), pipeline_mode=pl.Buffered(1))

    feat256, pred = pl.pallas_call(
        _instance_mlp_kernel,
        out_shape=(jax.ShapeDtypeStruct((n_pad, 256), jnp.float32),
                   jax.ShapeDtypeStruct((n_pad, 1), jnp.float32)),
        grid_spec=pltpu.PrefetchScalarGridSpec(
            num_scalar_prefetch=0,
            grid=(n_tiles,),
            in_specs=[pl.BlockSpec((TM, 1), lambda i: (i, 0)),     # class ids
                      row_spec(1024),                               # visual features (f32)
                      const_spec(lang_tab),                         # folded language table
                      const_spec(vw1), const_spec(vb1),
                      const_spec(vw2), const_spec(vb2),
                      const_spec(iw1v), const_spec(ib1),
                      const_spec(iw2),
                      pl.BlockSpec(memory_space=pltpu.MemorySpace.SMEM)],  # ib2 scalar
            out_specs=[row_spec(256),
                       pl.BlockSpec((TM, 1), lambda i: (i, 0))],
        ),
        compiler_params=pltpu.CompilerParams(
            dimension_semantics=("parallel",),
            vmem_limit_bytes=32 * 1024 * 1024),
    )(ids2d, vis, lang_tab, vw1, vb1, vw2, vb2, iw1v, ib1, iw2, ib2)

    # slice padded rows back off before they can reach sigmoid stats / loss
    return feat256[:N], pred.reshape(-1)[:N]


# ----------------------------------------------------------------------------
# Parameter preparation (language-branch folding done here, once)
# ----------------------------------------------------------------------------

def fold_language_branch(semantic, lw1, lb1, lw2, lb2, iw1l):
    """Per-class contribution of the language branch to instance_fc1 pre-act.
    Uses the same bf16-in / f32-acc arithmetic the kernel used previously, so
    folding is numerically identical."""
    bf16, f32 = jnp.bfloat16, jnp.float32
    lang = jnp.dot(semantic.astype(bf16), lw1.astype(bf16), preferred_element_type=f32) + lb1
    lang = jnp.maximum(lang, 0.0)
    lang = jnp.dot(lang.astype(bf16), lw2.astype(bf16), preferred_element_type=f32) + lb2
    lang = jnp.maximum(lang, 0.0)
    tab = jnp.dot(lang.astype(bf16), iw1l.astype(bf16), preferred_element_type=f32)  # (V, 256)
    v = tab.shape[0]
    v_pad = max(8, ((v + 7) // 8) * 8)          # clean sublane layout for the in-kernel gather
    if v_pad != v:
        tab = jnp.pad(tab, ((0, v_pad - v), (0, 0)))
    return tab


def init_params(key, instance_num):
    """Deterministic synthetic parameters (PyTorch nn.Linear-style uniform init).
    Returns the kernel-ready parameter tuple (language branch pre-folded)."""
    ks = jax.random.split(key, 16)

    def linear(kw, kb, d_in, d_out):
        bound = 1.0 / np.sqrt(d_in)
        w = jax.random.uniform(kw, (d_in, d_out), jnp.float32, -bound, bound)
        b = jax.random.uniform(kb, (1, d_out), jnp.float32, -bound, bound)
        return w, b

    semantic = jax.random.normal(ks[0], (instance_num - 1, 300), jnp.float32) * 0.02
    lw1, lb1 = linear(ks[1], ks[2], 300, 512)
    lw2, lb2 = linear(ks[3], ks[4], 512, 256)
    vw1, vb1 = linear(ks[5], ks[6], 1024, 512)
    vw2, vb2 = linear(ks[7], ks[8], 512, 256)
    iw1, ib1 = linear(ks[9], ks[10], 512, 256)
    iw2, ib2 = linear(ks[11], ks[12], 256, 1)

    # instance_fc1 weight split: rows [:256] multiply the language half, rows
    # [256:] the visual half — matches torch.cat([language, visual], dim=1).
    iw1l, iw1v = iw1[:256, :], iw1[256:, :]
    lang_tab = fold_language_branch(semantic, lw1, lb1, lw2, lb2, iw1l)   # (V_pad, 256) f32

    bf16 = jnp.bfloat16
    params = (lang_tab,
              vw1.astype(bf16), vb1,
              vw2.astype(bf16), vb2,
              iw1v.astype(bf16), ib1,
              iw2.reshape(1, 256),        # fc2 weight as an f32 lane row (VPU mul + reduce)
              ib2.reshape(1, 1))          # fc2 bias as SMEM scalar
    return params


# ----------------------------------------------------------------------------
# Plain-JAX glue reproducing the rest of the module's forward semantics.
# ----------------------------------------------------------------------------

def binary_focal_loss(pred, gt, pos_gamma=1.0, neg_gamma=2.0):
    num_1 = jnp.sum(gt) * 1.0
    num_0 = gt.shape[0] - num_1
    epsilon = 1e-05
    pred = jnp.clip(pred, epsilon, 1.0 - epsilon)
    ce_1 = gt * -jnp.log(pred)
    ce_0 = (1.0 - gt) * -jnp.log(1.0 - pred)
    fl_1 = jnp.power(1.0 - pred, pos_gamma) * ce_1
    fl_0 = jnp.power(pred, neg_gamma) * ce_0
    fl_1_avg = jnp.where(num_1 == 0, jnp.sum(fl_1), jnp.sum(fl_1) / jnp.maximum(num_1, 1.0))
    fl_0_avg = jnp.where(num_0 == 0, jnp.sum(fl_0), jnp.sum(fl_0) / jnp.maximum(num_0, 1.0))
    return fl_1_avg, fl_0_avg


def compute_instance_result(pred_instance_nums, pred_interests,
                            instance_interest_pred_mix, instance_features_256_mix,
                            training=True):
    # TODO(synk): per-image Python loop with int(jnp.sum(gt)) forces a host sync
    # (matches the reference's .item()-based top-k); not jit-compatible glue.
    losses, metrics = {}, {}
    offsets = np.cumsum([0] + list(pred_instance_nums))
    instance_interest_preds = [instance_interest_pred_mix[offsets[i]:offsets[i + 1]]
                               for i in range(len(pred_instance_nums))]
    instance_features_256s = [instance_features_256_mix[offsets[i]:offsets[i + 1]]
                              for i in range(len(pred_instance_nums))]
    if training:
        gt_mix = jnp.concatenate([g.astype(jnp.float32) for g in pred_interests])
        losses['instance_pos_loss'], losses['instance_neg_loss'] = binary_focal_loss(
            instance_interest_pred_mix, gt_mix)
        tps, ps, gs = 0.0, 0.0, 0.0
        for i in range(len(pred_instance_nums)):
            gt = pred_interests[i].astype(jnp.float32)
            pred = instance_interest_preds[i]
            k = int(jnp.sum(gt))
            if k > 0:
                scores, _ = jax.lax.top_k(pred, k)
                thr = scores[-1]
                pred_bin = jnp.where(pred >= thr, jnp.ones_like(pred), jnp.zeros_like(pred))
                tp = jnp.sum(pred_bin * gt)
                p = jnp.sum(pred_bin)
            else:
                tp, p = 0.0, 0.0
            tps += tp
            ps += p
            gs += jnp.sum(gt)
        metrics['instance_tp'] = tps
        metrics['instance_p'] = ps
        metrics['instance_g'] = gs
    return instance_interest_preds, instance_features_256s, losses, metrics


def instance_head16_forward(instance_features, pred_classes_list, pred_interests,
                            params, training=True):
    pred_instance_nums = [f.shape[0] for f in instance_features]
    instance_features_mix = jnp.concatenate(instance_features, axis=0)            # [N, 1024]
    instance_class_mix = jnp.concatenate(
        [c - 1 for c in pred_classes_list]).astype(jnp.int32)                     # [N]

    # gather + visual MLP + instance head + sigmoid fused in one Pallas kernel
    feat256, interest_pred = instance_head_mlp(
        instance_class_mix, instance_features_mix, params)

    return compute_instance_result(pred_instance_nums, pred_interests,
                                   interest_pred, feat256, training=training)


if __name__ == "__main__":
    key = jax.random.PRNGKey(0)
    instance_num = 11  # synthetic class vocabulary (cfg.MODEL.RELATION_HEADS.INSTANCE_NUM)

    k_param, k_feat, k_cls, k_int = jax.random.split(key, 4)
    params = init_params(k_param, instance_num)

    # two "images", 8 predicted instances each; visual ROI features are 1024-d
    nums = [8, 8]
    kf = jax.random.split(k_feat, len(nums))
    kc = jax.random.split(k_cls, len(nums))
    ki = jax.random.split(k_int, len(nums))
    instance_features = [jax.random.normal(kf[i], (nums[i], 1024), jnp.float32)
                         for i in range(len(nums))]
    pred_classes_list = [jax.random.randint(kc[i], (nums[i],), 1, instance_num)
                         for i in range(len(nums))]
    pred_interests = [jax.random.bernoulli(ki[i], 0.5, (nums[i],)).astype(jnp.float32)
                      for i in range(len(nums))]

    preds, feats256, losses, metrics = instance_head16_forward(
        instance_features, pred_classes_list, pred_interests,
        params, training=True)

    jax.block_until_ready(preds)
    jax.block_until_ready(feats256)
    for v in losses.values():
        jax.block_until_ready(v)

    # basic sanity on shapes/ranges
    assert preds[0].shape == (8,) and preds[1].shape == (8,)
    assert feats256[0].shape == (8, 256) and feats256[1].shape == (8, 256)
    assert bool(jnp.all(preds[0] >= 0.0)) and bool(jnp.all(preds[0] <= 1.0))
    assert bool(jnp.all(jnp.isfinite(feats256[0])))
    assert bool(jnp.isfinite(losses['instance_pos_loss']))
    assert bool(jnp.isfinite(losses['instance_neg_loss']))

    print("KERNEL_OK")
</pallas_src>

<mosaic_0001>
module attributes {stable_mosaic.version = 11 : i64} {
  func.func @_instance_mlp_kernel(%arg0: i32, %arg1: memref<128x1xi32, #tpu.memory_space<vmem>>, %arg2: memref<128x1024xf32, #tpu.memory_space<vmem>>, %arg3: memref<16x256xf32, #tpu.memory_space<vmem>>, %arg4: memref<1024x512xbf16, #tpu.memory_space<vmem>>, %arg5: memref<1x512xf32, #tpu.memory_space<vmem>>, %arg6: memref<512x256xbf16, #tpu.memory_space<vmem>>, %arg7: memref<1x256xf32, #tpu.memory_space<vmem>>, %arg8: memref<256x256xbf16, #tpu.memory_space<vmem>>, %arg9: memref<1x256xf32, #tpu.memory_space<vmem>>, %arg10: memref<1x256xf32, #tpu.memory_space<vmem>>, %arg11: memref<1x1xf32, #tpu.memory_space<smem>>, %arg12: memref<128x256xf32, #tpu.memory_space<vmem>>, %arg13: memref<128x1xf32, #tpu.memory_space<vmem>>) attributes {dimension_semantics = [#tpu.dimension_semantics<parallel>], iteration_bounds = array<i64: 1>, scalar_prefetch = 0 : i64, scratch_operands = 0 : i64, tpu.core_type = #tpu.core_type<tc>, window_params = [{transform_indices = @transform_0, window_bounds = array<i64: 128, 1>}, {transform_indices = @transform_1, window_bounds = array<i64: 128, 1024>}, {pipeline_mode = #tpu.pipeline_mode<synchronous>, transform_indices = @transform_2, window_bounds = array<i64: 16, 256>}, {pipeline_mode = #tpu.pipeline_mode<synchronous>, transform_indices = @transform_3, window_bounds = array<i64: 1024, 512>}, {pipeline_mode = #tpu.pipeline_mode<synchronous>, transform_indices = @transform_4, window_bounds = array<i64: 1, 512>}, {pipeline_mode = #tpu.pipeline_mode<synchronous>, transform_indices = @transform_5, window_bounds = array<i64: 512, 256>}, {pipeline_mode = #tpu.pipeline_mode<synchronous>, transform_indices = @transform_6, window_bounds = array<i64: 1, 256>}, {pipeline_mode = #tpu.pipeline_mode<synchronous>, transform_indices = @transform_7, window_bounds = array<i64: 256, 256>}, {pipeline_mode = #tpu.pipeline_mode<synchronous>, transform_indices = @transform_8, window_bounds = array<i64: 1, 256>}, {pipeline_mode = #tpu.pipeline_mode<synchronous>, transform_indices = @transform_9, window_bounds = array<i64: 1, 256>}, {transform_indices = @transform_10, window_bounds = array<i64: 1, 1>}, {transform_indices = @transform_11, window_bounds = array<i64: 128, 256>}, {transform_indices = @transform_12, window_bounds = array<i64: 128, 1>}]} {
    %c0 = arith.constant 0 : index
    %c0_0 = arith.constant 0 : index
    %0 = vector.load %arg1[%c0, %c0_0] : memref<128x1xi32, #tpu.memory_space<vmem>>, vector<128x1xi32>
    %1 = tpu.iota {dimensions = array<i32: 1>} : vector<128x16xi32>
    %2 = vector.broadcast %0 : vector<128x1xi32> to vector<128x16xi32>
    %3 = arith.cmpi eq, %2, %1 : vector<128x16xi32>
    %4 = arith.extui %3 : vector<128x16xi1> to vector<128x16xi32>
    %5 = arith.sitofp %4 : vector<128x16xi32> to vector<128x16xf32>
    %c0_1 = arith.constant 0 : index
    %c0_2 = arith.constant 0 : index
    %6 = vector.load %arg3[%c0_1, %c0_2] : memref<16x256xf32, #tpu.memory_space<vmem>>, vector<16x256xf32>
    %cst = arith.constant dense<0.000000e+00> : vector<128x256xf32>
    %7 = tpu.matmul %5, %6, %cst {dimension_numbers = #tpu.dot_dimension_numbers<[1], [0], [0], [1], [0, 0, 1, 1], [], []>} : vector<128x16xf32>, vector<16x256xf32>, vector<128x256xf32> -> vector<128x256xf32>
    %c0_3 = arith.constant 0 : index
    %c0_4 = arith.constant 0 : index
    %8 = vector.load %arg2[%c0_3, %c0_4] : memref<128x1024xf32, #tpu.memory_space<vmem>>, vector<128x1024xf32>
    %9 = arith.truncf %8 : vector<128x1024xf32> to vector<128x1024xbf16>
    %c0_5 = arith.constant 0 : index
    %c0_6 = arith.constant 0 : index
    %10 = vector.load %arg4[%c0_5, %c0_6] : memref<1024x512xbf16, #tpu.memory_space<vmem>>, vector<1024x512xbf16>
    %cst_7 = arith.constant dense<0.000000e+00> : vector<128x512xf32>
    %11 = tpu.matmul %9, %10, %cst_7 {dimension_numbers = #tpu.dot_dimension_numbers<[1], [0], [0], [1], [0, 0, 1, 1], [], []>} : vector<128x1024xbf16>, vector<1024x512xbf16>, vector<128x512xf32> -> vector<128x512xf32>
    %c0_8 = arith.constant 0 : index
    %c0_9 = arith.constant 0 : index
    %12 = vector.load %arg5[%c0_8, %c0_9] : memref<1x512xf32, #tpu.memory_space<vmem>>, vector<1x512xf32>
    %13 = vector.broadcast %12 : vector<1x512xf32> to vector<128x512xf32>
    %14 = arith.addf %11, %13 : vector<128x512xf32>
    %cst_10 = arith.constant 0.000000e+00 : f32
    %15 = vector.broadcast %cst_10 : f32 to vector<128x512xf32>
    %16 = arith.maximumf %14, %15 : vector<128x512xf32>
    %17 = arith.truncf %16 : vector<128x512xf32> to vector<128x512xbf16>
    %c0_11 = arith.constant 0 : index
    %c0_12 = arith.constant 0 : index
    %18 = vector.load %arg6[%c0_11, %c0_12] : memref<512x256xbf16, #tpu.memory_space<vmem>>, vector<512x256xbf16>
    %cst_13 = arith.constant dense<0.000000e+00> : vector<128x256xf32>
    %19 = tpu.matmul %17, %18, %cst_13 {dimension_numbers = #tpu.dot_dimension_numbers<[1], [0], [0], [1], [0, 0, 1, 1], [], []>} : vector<128x512xbf16>, vector<512x256xbf16>, vector<128x256xf32> -> vector<128x256xf32>
    %c0_14 = arith.constant 0 : index
    %c0_15 = arith.constant 0 : index
    %20 = vector.load %arg7[%c0_14, %c0_15] : memref<1x256xf32, #tpu.memory_space<vmem>>, vector<1x256xf32>
    %21 = vector.broadcast %20 : vector<1x256xf32> to vector<128x256xf32>
    %22 = arith.addf %19, %21 : vector<128x256xf32>
    %cst_16 = arith.constant 0.000000e+00 : f32
    %23 = vector.broadcast %cst_16 : f32 to vector<128x256xf32>
    %24 = arith.maximumf %22, %23 : vector<128x256xf32>
    %25 = arith.truncf %24 : vector<128x256xf32> to vector<128x256xbf16>
    %c0_17 = arith.constant 0 : index
    %c0_18 = arith.constant 0 : index
    %26 = vector.load %arg8[%c0_17, %c0_18] : memref<256x256xbf16, #tpu.memory_space<vmem>>, vector<256x256xbf16>
    %cst_19 = arith.constant dense<0.000000e+00> : vector<128x256xf32>
    %27 = tpu.matmul %25, %26, %cst_19 {dimension_numbers = #tpu.dot_dimension_numbers<[1], [0], [0], [1], [0, 0, 1, 1], [], []>} : vector<128x256xbf16>, vector<256x256xbf16>, vector<128x256xf32> -> vector<128x256xf32>
    %28 = arith.addf %7, %27 : vector<128x256xf32>
    %c0_20 = arith.constant 0 : index
    %c0_21 = arith.constant 0 : index
    %29 = vector.load %arg9[%c0_20, %c0_21] : memref<1x256xf32, #tpu.memory_space<vmem>>, vector<1x256xf32>
    %30 = vector.broadcast %29 : vector<1x256xf32> to vector<128x256xf32>
    %31 = arith.addf %28, %30 : vector<128x256xf32>
    %cst_22 = arith.constant 0.000000e+00 : f32
    %32 = vector.broadcast %cst_22 : f32 to vector<128x256xf32>
    %33 = arith.maximumf %31, %32 : vector<128x256xf32>
    %c0_23 = arith.constant 0 : index
    %c0_24 = arith.constant 0 : index
    %34 = vector.load %arg12[%c0_23, %c0_24] : memref<128x256xf32, #tpu.memory_space<vmem>>, vector<128x256xf32>
    tpu.vector_store %arg12[%c0_23, %c0_24], %33 {strides = array<i32>} : memref<128x256xf32, #tpu.memory_space<vmem>>, vector<128x256xf32>,
    %c0_25 = arith.constant 0 : index
    %c0_26 = arith.constant 0 : index
    %35 = vector.load %arg10[%c0_25, %c0_26] : memref<1x256xf32, #tpu.memory_space<vmem>>, vector<1x256xf32>
    %36 = vector.broadcast %35 : vector<1x256xf32> to vector<128x256xf32>
    %37 = arith.mulf %33, %36 : vector<128x256xf32>
    %cst_27 = arith.constant dense<0.000000e+00> : vector<128xf32>
    %38 = vector.multi_reduction <add>, %37, %cst_27 [1] : vector<128x256xf32> to vector<128xf32>
    %39 = vector.shape_cast %38 : vector<128xf32> to vector<128x1xf32>
    %c0_28 = arith.constant 0 : index
    %c0_29 = arith.constant 0 : index
    %40 = memref.load %arg11[%c0_28, %c0_29] : memref<1x1xf32, #tpu.memory_space<smem>>
    %41 = vector.broadcast %40 : f32 to vector<128x1xf32>
    %42 = arith.addf %39, %41 : vector<128x1xf32>
    %43 = arith.negf %42 : vector<128x1xf32>
    %44 = math.exp %43 : vector<128x1xf32>
    %cst_30 = arith.constant 1.000000e+00 : f32
    %45 = vector.broadcast %cst_30 : f32 to vector<128x1xf32>
    %46 = arith.addf %45, %44 : vector<128x1xf32>
    %47 = arith.divf %45, %46 : vector<128x1xf32>
    %c0_31 = arith.constant 0 : index
    %c0_32 = arith.constant 0 : index
    %48 = vector.load %arg13[%c0_31, %c0_32] : memref<128x1xf32, #tpu.memory_space<vmem>>, vector<128x1xf32>
    tpu.vector_store %arg13[%c0_31, %c0_32], %47 {strides = array<i32>} : memref<128x1xf32, #tpu.memory_space<vmem>>, vector<128x1xf32>,
    return
  }
  func.func @transform_0(%arg0: i32) -> (i32, i32) {
    %c0_i32 = arith.constant 0 : i32
    %c0_i32_0 = arith.constant 0 : i32
    return %arg0, %c0_i32 : i32, i32
  }
  func.func @transform_1(%arg0: i32) -> (i32, i32) {
    %c0_i32 = arith.constant 0 : i32
    %c0_i32_0 = arith.constant 0 : i32
    return %arg0, %c0_i32 : i32, i32
  }
  func.func @transform_2(%arg0: i32) -> (i32, i32) {
    %c0_i32 = arith.constant 0 : i32
    %c0_i32_0 = arith.constant 0 : i32
    %c0_i32_1 = arith.constant 0 : i32
    return %c0_i32, %c0_i32_0 : i32, i32
  }
  func.func @transform_3(%arg0: i32) -> (i32, i32) {
    %c0_i32 = arith.constant 0 : i32
    %c0_i32_0 = arith.constant 0 : i32
    %c0_i32_1 = arith.constant 0 : i32
    return %c0_i32, %c0_i32_0 : i32, i32
  }
  func.func @transform_4(%arg0: i32) -> (i32, i32) {
    %c0_i32 = arith.constant 0 : i32
    %c0_i32_0 = arith.constant 0 : i32
    %c0_i32_1 = arith.constant 0 : i32
    return %c0_i32, %c0_i32_0 : i32, i32
  }
  func.func @transform_5(%arg0: i32) -> (i32, i32) {
    %c0_i32 = arith.constant 0 : i32
    %c0_i32_0 = arith.constant 0 : i32
    %c0_i32_1 = arith.constant 0 : i32
    return %c0_i32, %c0_i32_0 : i32, i32
  }
  func.func @transform_6(%arg0: i32) -> (i32, i32) {
    %c0_i32 = arith.constant 0 : i32
    %c0_i32_0 = arith.constant 0 : i32
    %c0_i32_1 = arith.constant 0 : i32
    return %c0_i32, %c0_i32_0 : i32, i32
  }
  func.func @transform_7(%arg0: i32) -> (i32, i32) {
    %c0_i32 = arith.constant 0 : i32
    %c0_i32_0 = arith.constant 0 : i32
    %c0_i32_1 = arith.constant 0 : i32
    return %c0_i32, %c0_i32_0 : i32, i32
  }
  func.func @transform_8(%arg0: i32) -> (i32, i32) {
    %c0_i32 = arith.constant 0 : i32
    %c0_i32_0 = arith.constant 0 : i32
    %c0_i32_1 = arith.constant 0 : i32
    return %c0_i32, %c0_i32_0 : i32, i32
  }
  func.func @transform_9(%arg0: i32) -> (i32, i32) {
    %c0_i32 = arith.constant 0 : i32
    %c0_i32_0 = arith.constant 0 : i32
    %c0_i32_1 = arith.constant 0 : i32
    return %c0_i32, %c0_i32_0 : i32, i32
  }
  func.func @transform_10(%arg0: i32) -> (i32, i32) {
    %c0_i32 = arith.constant 0 : i32
    %c0_i32_0 = arith.constant 0 : i32
    %c0_i32_1 = arith.constant 0 : i32
    return %c0_i32, %c0_i32_0 : i32, i32
  }
  func.func @transform_11(%arg0: i32) -> (i32, i32) {
    %c0_i32 = arith.constant 0 : i32
    %c0_i32_0 = arith.constant 0 : i32
    return %arg0, %c0_i32 : i32, i32
  }
  func.func @transform_12(%arg0: i32) -> (i32, i32) {
    %c0_i32 = arith.constant 0 : i32
    %c0_i32_0 = arith.constant 0 : i32
    return %arg0, %c0_i32 : i32, i32
  }
}

</mosaic_0001>

<bundles_post_ra>
// kernel: tpu_custom_call.1
= control target key start
LH: loop header
LB: loop body
LE: loop exit
PB: predicated region body
PF: predicated region fallthrough
CT: control target
= control target key end

     0   :  { %19 = vsyncpa [#allocation4], 0  ;;  %s6781_s0 = inlined_call_operand.vmem [shape: s32[128,1], index: 0, kind: input, shape index: {}]   ;;  %s6782_s1 = inlined_call_operand.hbm [shape: f32[128,1024], index: 1, kind: input, shape index: {}]   ;;  %s6783_s2 = inlined_call_operand.vmem [shape: f32[16,256], index: 2, kind: input, shape index: {}]   ;;  %s6784_s3 = inlined_call_operand.hbm [shape: bf16[1024,512], index: 3, kind: input, shape index: {}]   ;;  %s6785_s4 = inlined_call_operand.vmem [shape: f32[1,512], index: 4, kind: input, shape index: {}]   ;;  %s6786_s5 = inlined_call_operand.hbm [shape: bf16[512,256], index: 5, kind: input, shape index: {}]   ;;  %s6787_s6 = inlined_call_operand.vmem [shape: f32[1,256], index: 6, kind: input, shape index: {}]   ;;  %s6788_s7 = inlined_call_operand.hbm [shape: bf16[256,256], index: 7, kind: input, shape index: {}]   ;;  %s6789_s8 = inlined_call_operand.vmem [shape: f32[1,256], index: 8, kind: input, shape index: {}]   ;;  %s6790_s9 = inlined_call_operand.vmem [shape: f32[1,256], index: 9, kind: input, shape index: {}]   ;;  %s6791_s10 = inlined_call_operand.<no memory space> [shape: f32[1,1], index: 10, kind: input, shape index: {}]   ;;  %s6792_s11 = inlined_call_operand.hbm [shape: f32[128,256], index: 11, kind: output, shape index: {0}]   ;;  %s6793_s12 = inlined_call_operand.vmem [shape: f32[128,1], index: 12, kind: output, shape index: {1}]  }
   0x1   :  { %20 = vsyncpa [#allocation7], 0 }
   0x2   :  { %21 = vsyncpa [#allocation10], 0 }
   0x3   :  { %22 = vsyncpa [#allocation5], 0  ;;  %s5620_s21 = smov [#allocation6]  }
   0x4   :  { %s44_s22 = sshll.u32 %s5620_s21, 4  ;;  %s45_s22 = int_to_ptr.vmem [resolvable:$true] %s44_s22 }
   0x5   :  { %s5520_s23 = scalar_lea.vmem %s45_s22, 32768  ;;  %p5525_p1 = scmp.lt.s32.totalorder %s45_s22, %s45_s22 }
   0x6   :  { %p5521_p0 = scmp.ne.s32.totalorder %s45_s22, %s5520_s23  ;;  %p5526_p2 = scmp.lt.s32.totalorder %s5520_s23, %s5520_s23 }
   0x8   :  { %p5527_p3 = por %p5526_p2, %p5525_p1 }
   0xa   :  { %p5528_p4 = pnand %p5527_p3, %p5521_p0 }
   0xc   :  { %5531 = shalt.err (!%p5528_p4)
}
   0xd   :  { %s5621_s24 = smov 256   ;;  %s5622_s25 = smov 16  }
   0xe   :  { %50 = dma.hbm_to_vmem [thread:$0]  %s6784_s3, 32768, %s45_s22, [#allocation7], %s5621_s24, %s5621_s24, %s5622_s25  }
   0xf   :  { %s5623_s28 = smov [#allocation3]  }
  0x10   :  { %s30_s29 = sshll.u32 %s5623_s28, 4  ;;  %s31_s29 = int_to_ptr.vmem [resolvable:$true] %s30_s29 }
  0x11   :  { %s5540_s30 = scalar_lea.vmem %s31_s29, 16384  ;;  %p5545_p6 = scmp.lt.s32.totalorder %s31_s29, %s31_s29 }
  0x12   :  { %p5541_p5 = scmp.ne.s32.totalorder %s31_s29, %s5540_s30  ;;  %p5546_p7 = scmp.lt.s32.totalorder %s5540_s30, %s5540_s30 }
  0x14   :  { %p5547_p8 = por %p5546_p7, %p5545_p6 }
  0x16   :  { %p5548_p9 = pnand %p5547_p8, %p5541_p5 }
  0x18   :  { %5551 = shalt.err (!%p5548_p9)
}
  0x19   :  { %s5624_s13 = smov 1024   ;;  %s5625_s14 = smov 64  }
  0x1a   :  { %36 = dma.hbm_to_vmem [thread:$0]  %s6782_s1, 16384, %s31_s29, [#allocation4], %s5624_s13, %s5624_s13, %s5625_s14  }
  0x1b   :  { %s5626_s17 = smov [#allocation8]  }
  0x1c   :  { %s58_s18 = sshll.u32 %s5626_s17, 4  ;;  %s59_s18 = int_to_ptr.vmem [resolvable:$true] %s58_s18 }
  0x1d   :  { %s5560_s3 = scalar_lea.vmem %s59_s18, 8192  ;;  %p5565_p11 = scmp.lt.s32.totalorder %s59_s18, %s59_s18 }
  0x1e   :  { %p5561_p10 = scmp.ne.s32.totalorder %s59_s18, %s5560_s3  ;;  %p5566_p12 = scmp.lt.s32.totalorder %s5560_s3, %s5560_s3 }
  0x20   :  { %p5567_p13 = por %p5566_p12, %p5565_p11 }
  0x22   :  { %p5568_p0 = pnand %p5567_p13, %p5561_p10 }
  0x24   :  { %5571 = shalt.err (!%p5568_p0)
}
  0x25   :  { %s5627_s19 = smov 128   ;;  %s5628_s20 = smov 8  }
  0x26   :  { %64 = dma.hbm_to_vmem [thread:$0]  %s6786_s5, 8192, %s59_s18, [#allocation7], %s5627_s19, %s5627_s19, %s5628_s20  }
  0x27   :  { %s5629_s23 = smov [#allocation9]  }
  0x28   :  { %s72_s26 = sshll.u32 %s5629_s23, 4  ;;  %s73_s26 = int_to_ptr.vmem [resolvable:$true] %s72_s26 }
  0x29   :  { %s5580_s1 = scalar_lea.vmem %s73_s26, 4096  ;;  %p5585_p2 = scmp.lt.s32.totalorder %s73_s26, %s73_s26 }
  0x2a   :  { %p5581_p1 = scmp.ne.s32.totalorder %s73_s26, %s5580_s1  ;;  %p5586_p3 = scmp.lt.s32.totalorder %s5580_s1, %s5580_s1 }
  0x2c   :  { %p5587_p4 = por %p5586_p3, %p5585_p2 }
  0x2e   :  { %p5588_p5 = pnand %p5587_p4, %p5581_p1 }
  0x30   :  { %5591 = shalt.err (!%p5588_p5)
}
  0x31   :  { %78 = dma.hbm_to_vmem [thread:$0]  %s6788_s7, 4096, %s73_s26, [#allocation10], %s5627_s19, %s5627_s19, %s5628_s20  }
  0x32   :  { %5612 = dma.done.wait [#allocation4], 16384  }
  0x33   :  { %5613 = vsyncadd [#allocation4], 4294950912 }
  0x34   :  { %5614 = dma.done.wait [#allocation7], 40960  }
  0x35   :  { %5615 = vsyncadd [#allocation7], 4294926336 }
  0x36   :  { %5616 = dma.done.wait [#allocation10], 4096  }
  0x37   :  { %5617 = vsyncadd [#allocation10], 4294963200  ;;  %v4919_v0 = vld [vmem:[#allocation6 + $0xe4] ss:$16 sps:$4 sm:$0xff]   ;;  %v4923_v2 = vld [vmem:[#allocation6 + $0xe0] ss:$16 sps:$4 sm:$0xff]  }
  0x38   :  { %v4921_v1 = vld [vmem:[#allocation6 + $0x2e4] ss:$16 sps:$4 sm:$0xff]   ;;  %1965 = vmatprep.subr.bf16.mxu0 %v4919_v0  ;;  %v4924_v3 = vld [vmem:[#allocation6 + $0x2e0] ss:$16 sps:$4 sm:$0xff]   ;;  %v216_v46 = vld [vmem:[#allocation3 + $0x8] sm:$0xff]  ;;  %vm3940_vm1 = vcmask 130048  }
  0x39   :  { %2078 = vmatprep.subr.bf16.mxu1 %v4921_v1  ;;  %v4925_v4 = vld [vmem:[#allocation6 + $0xc4] ss:$16 sps:$4 sm:$0xff]   ;;  %1966 = vmatpush1.bf16.msra.mxu0 %v4923_v2  ;;  %v4929_v6 = vld [vmem:[#allocation6 + $0xc0] ss:$16 sps:$4 sm:$0xff]   ;;  %v224_v47 = vld [vmem:[#allocation3 + $0x48] sm:$0xff] }
  0x3a   :  { %2079 = vmatpush1.bf16.msra.mxu1 %v4924_v3  ;;  %v4927_v5 = vld [vmem:[#allocation6 + $0x2c4] ss:$16 sps:$4 sm:$0xff]   ;;  %1967 = vmatprep.subr.bf16.mxu0 %v4925_v4  ;;  %v4930_v7 = vld [vmem:[#allocation6 + $0x2c0] ss:$16 sps:$4 sm:$0xff]   ;;  %v218_v48 = vld [vmem:[#allocation3 + $0x18] sm:$0xff]  ;;  %v5713_v53 = vpack.c.bf16 %v224_v47, %v216_v46 }
  0x3b   :  { %2080 = vmatprep.subr.bf16.mxu1 %v4927_v5  ;;  %v4931_v8 = vld [vmem:[#allocation6 + $0xa4] ss:$16 sps:$4 sm:$0xff]   ;;  %v4935_v10 = vld [vmem:[#allocation6 + $0xa0] ss:$16 sps:$4 sm:$0xff]   ;;  %v226_v49 = vld [vmem:[#allocation3 + $0x58] sm:$0xff] }
  0x3c   :  { %v4933_v9 = vld [vmem:[#allocation6 + $0x2a4] ss:$16 sps:$4 sm:$0xff]   ;;  %v4936_v11 = vld [vmem:[#allocation6 + $0x2a0] ss:$16 sps:$4 sm:$0xff]   ;;  %v5715_v54 = vpack.c.bf16 %v226_v49, %v218_v48  ;;  %1997 = vmatprep.mubr.bf16.mxu0 %v5713_v53 }
  0x3d   :  { %1968 = vmatpush1.bf16.msra.mxu0 %v4929_v6  ;;  %v4937_v12 = vld [vmem:[#allocation6 + $0x84] ss:$16 sps:$4 sm:$0xff]   ;;  %v4941_v14 = vld [vmem:[#allocation6 + $0x80] ss:$16 sps:$4 sm:$0xff]  }
  0x3e   :  { %2081 = vmatpush1.bf16.msra.mxu1 %v4930_v7  ;;  %1969 = vmatprep.subr.bf16.mxu0 %v4931_v8  ;;  %v4939_v13 = vld [vmem:[#allocation6 + $0x284] ss:$16 sps:$4 sm:$0xff]   ;;  %v4942_v15 = vld [vmem:[#allocation6 + $0x280] ss:$16 sps:$4 sm:$0xff]  }
  0x3f   :  { %2082 = vmatprep.subr.bf16.mxu1 %v4933_v9  ;;  %v4943_v16 = vld [vmem:[#allocation6 + $0x64] ss:$16 sps:$4 sm:$0xff]   ;;  %v4947_v18 = vld [vmem:[#allocation6 + $0x60] ss:$16 sps:$4 sm:$0xff]   ;;  %2110 = vmatprep.mubr.bf16.mxu1 %v5715_v54 }
  0x40   :  { %v4945_v17 = vld [vmem:[#allocation6 + $0x264] ss:$16 sps:$4 sm:$0xff]   ;;  %v4948_v19 = vld [vmem:[#allocation6 + $0x260] ss:$16 sps:$4 sm:$0xff]  }
  0x41   :  { %1970 = vmatpush1.bf16.msra.mxu0 %v4935_v10  ;;  %v4949_v20 = vld [vmem:[#allocation6 + $0x44] ss:$16 sps:$4 sm:$0xff]   ;;  %v4953_v22 = vld [vmem:[#allocation6 + $0x40] ss:$16 sps:$4 sm:$0xff]  }
  0x42   :  { %2083 = vmatpush1.bf16.msra.mxu1 %v4936_v11  ;;  %1971 = vmatprep.subr.bf16.mxu0 %v4937_v12  ;;  %v4951_v21 = vld [vmem:[#allocation6 + $0x244] ss:$16 sps:$4 sm:$0xff]   ;;  %v4954_v23 = vld [vmem:[#allocation6 + $0x240] ss:$16 sps:$4 sm:$0xff]  }
  0x43   :  { %2084 = vmatprep.subr.bf16.mxu1 %v4939_v13  ;;  %v4955_v24 = vld [vmem:[#allocation6 + $0x24] ss:$16 sps:$4 sm:$0xff]   ;;  %v4959_v26 = vld [vmem:[#allocation6 + $0x20] ss:$16 sps:$4 sm:$0xff]  }
  0x44   :  { %v4957_v25 = vld [vmem:[#allocation6 + $0x224] ss:$16 sps:$4 sm:$0xff]   ;;  %v4960_v27 = vld [vmem:[#allocation6 + $0x220] ss:$16 sps:$4 sm:$0xff]  }
  0x45   :  { %1972 = vmatpush1.bf16.msra.mxu0 %v4941_v14  ;;  %v4961_v28 = vld [vmem:[#allocation6 + $0x4] ss:$16 sps:$4 sm:$0xff]   ;;  %v4965_v30 = vld [vmem:[#allocation6] ss:$16 sps:$4 sm:$0xff]   ;;  %v232_v14 = vld [vmem:[#allocation3 + $0x88] sm:$0xff] }
  0x46   :  { %2085 = vmatpush1.bf16.msra.mxu1 %v4942_v15  ;;  %1973 = vmatprep.subr.bf16.mxu0 %v4943_v16  ;;  %v4963_v29 = vld [vmem:[#allocation6 + $0x204] ss:$16 sps:$4 sm:$0xff]   ;;  %v4966_v31 = vld [vmem:[#allocation6 + $0x200] ss:$16 sps:$4 sm:$0xff]   ;;  %v240_v15 = vld [vmem:[#allocation3 + $0xc8] sm:$0xff] }
  0x47   :  { %2086 = vmatprep.subr.bf16.mxu1 %v4945_v17  ;;  %v4967_v32 = vld [vmem:[#allocation6 + $0x1e4] ss:$16 sps:$4 sm:$0xff]   ;;  %v4971_v34 = vld [vmem:[#allocation6 + $0x1e0] ss:$16 sps:$4 sm:$0xff]  }
  0x48   :  { %v4969_v33 = vld [vmem:[#allocation6 + $0x3e4] ss:$16 sps:$4 sm:$0xff]   ;;  %v4972_v35 = vld [vmem:[#allocation6 + $0x3e0] ss:$16 sps:$4 sm:$0xff]  }
  0x49   :  { %1974 = vmatpush1.bf16.msra.mxu0 %v4947_v18  ;;  %v4973_v36 = vld [vmem:[#allocation6 + $0x1c4] ss:$16 sps:$4 sm:$0xff]   ;;  %v4977_v38 = vld [vmem:[#allocation6 + $0x1c0] ss:$16 sps:$4 sm:$0xff]   ;;  %v234_v18 = vld [vmem:[#allocation3 + $0x98] sm:$0xff] }
  0x4a   :  { %2087 = vmatpush1.bf16.msra.mxu1 %v4948_v19  ;;  %1975 = vmatprep.subr.bf16.mxu0 %v4949_v20  ;;  %v4975_v37 = vld [vmem:[#allocation6 + $0x3c4] ss:$16 sps:$4 sm:$0xff]   ;;  %v4978_v39 = vld [vmem:[#allocation6 + $0x3c0] ss:$16 sps:$4 sm:$0xff]   ;;  %v242_v19 = vld [vmem:[#allocation3 + $0xd8] sm:$0xff] }
  0x4b   :  { %2088 = vmatprep.subr.bf16.mxu1 %v4951_v21  ;;  %v4979_v40 = vld [vmem:[#allocation6 + $0x1a4] ss:$16 sps:$4 sm:$0xff]   ;;  %v4983_v42 = vld [vmem:[#allocation6 + $0x1a0] ss:$16 sps:$4 sm:$0xff]  }
  0x4c   :  { %v4981_v41 = vld [vmem:[#allocation6 + $0x3a4] ss:$16 sps:$4 sm:$0xff]   ;;  %v4984_v43 = vld [vmem:[#allocation6 + $0x3a0] ss:$16 sps:$4 sm:$0xff]  }
  0x4d   :  { %1976 = vmatpush1.bf16.msra.mxu0 %v4953_v22  ;;  %v4985_v44 = vld [vmem:[#allocation6 + $0x184] ss:$16 sps:$4 sm:$0xff]   ;;  %v4989_v50 = vld [vmem:[#allocation6 + $0x180] ss:$16 sps:$4 sm:$0xff]  }
  0x4e   :  { %2089 = vmatpush1.bf16.msra.mxu1 %v4954_v23  ;;  %1977 = vmatprep.subr.bf16.mxu0 %v4955_v24  ;;  %v4987_v45 = vld [vmem:[#allocation6 + $0x384] ss:$16 sps:$4 sm:$0xff]   ;;  %v4990_v51 = vld [vmem:[#allocation6 + $0x380] ss:$16 sps:$4 sm:$0xff]   ;;  %v5723_v23 = vpack.c.bf16 %v240_v15, %v232_v14  ;;  %v5725_v24 = vpack.c.bf16 %v242_v19, %v234_v18  ;;  %v282_v18 = vld [vmem:[#allocation3 + $0x218] sm:$0xff] }
  0x4f   :  { %2090 = vmatprep.subr.bf16.mxu1 %v4957_v25  ;;  %v4991_v52 = vld [vmem:[#allocation6 + $0x164] ss:$16 sps:$4 sm:$0xff]   ;;  %v4995_v56 = vld [vmem:[#allocation6 + $0x160] ss:$16 sps:$4 sm:$0xff]   ;;  %v290_v19 = vld [vmem:[#allocation3 + $0x258] sm:$0xff] }
  0x50   :  { %v4993_v55 = vld [vmem:[#allocation6 + $0x364] ss:$16 sps:$4 sm:$0xff]   ;;  %v4996_v57 = vld [vmem:[#allocation6 + $0x360] ss:$16 sps:$4 sm:$0xff]  }
  0x51   :  { %1978 = vmatpush1.bf16.msra.mxu0 %v4959_v26  ;;  %v4997_v58 = vld [vmem:[#allocation6 + $0x144] ss:$16 sps:$4 sm:$0xff]   ;;  %v5001_v60 = vld [vmem:[#allocation6 + $0x140] ss:$16 sps:$4 sm:$0xff]  }
  0x52   :  { %2091 = vmatpush1.bf16.msra.mxu1 %v4960_v27  ;;  %1979 = vmatprep.subr.bf16.mxu0 %v4961_v28  ;;  %v4999_v59 = vld [vmem:[#allocation6 + $0x344] ss:$16 sps:$4 sm:$0xff]   ;;  %v5002_v61 = vld [vmem:[#allocation6 + $0x340] ss:$16 sps:$4 sm:$0xff]  }
  0x53   :  { %2092 = vmatprep.subr.bf16.mxu1 %v4963_v29  ;;  %v5003_v62 = vld [vmem:[#allocation6 + $0x124] ss:$16 sps:$4 sm:$0xff]   ;;  %v5007_v0 = vld [vmem:[#allocation6 + $0x120] ss:$16 sps:$4 sm:$0xff]  }
  0x54   :  { %v5005_v63 = vld [vmem:[#allocation6 + $0x324] ss:$16 sps:$4 sm:$0xff]   ;;  %v5008_v1 = vld [vmem:[#allocation6 + $0x320] ss:$16 sps:$4 sm:$0xff]  }
  0x55   :  { %1980 = vmatpush1.bf16.msra.mxu0 %v4965_v30  ;;  %v5009_v2 = vld [vmem:[#allocation6 + $0x104] ss:$16 sps:$4 sm:$0xff]   ;;  %v5013_v4 = vld [vmem:[#allocation6 + $0x100] ss:$16 sps:$4 sm:$0xff]  }
  0x56   :  { %2093 = vmatpush1.bf16.msra.mxu1 %v4966_v31  ;;  %1981 = vmatprep.subr.bf16.mxu0 %v4967_v32  ;;  %v5011_v3 = vld [vmem:[#allocation6 + $0x304] ss:$16 sps:$4 sm:$0xff]   ;;  %v5014_v5 = vld [vmem:[#allocation6 + $0x300] ss:$16 sps:$4 sm:$0xff]  }
  0x57   :  { %2094 = vmatprep.subr.bf16.mxu1 %v4969_v33  ;;  %v215_v6 = vld [vmem:[#allocation3] sm:$0xff]  ;;  %v217_v8 = vld [vmem:[#allocation3 + $0x10] sm:$0xff] }
  0x58   :  { %v223_v7 = vld [vmem:[#allocation3 + $0x40] sm:$0xff]  ;;  %v225_v9 = vld [vmem:[#allocation3 + $0x50] sm:$0xff] }
  0x59   :  { %1982 = vmatpush2.bf16.msra.mxu0 %v4971_v34  ;;  %v5017_v10 = vld [vmem:[#allocation6 + $0x4e4] ss:$16 sps:$4 sm:$0xff]   ;;  %v5015_v12 = vld [vmem:[#allocation6 + $0x4e0] ss:$16 sps:$4 sm:$0xff]   ;;  %v5719_v16 = vpack.c.bf16 %v223_v7, %v215_v6  ;;  %v5721_v17 = vpack.c.bf16 %v225_v9, %v217_v8  ;;  %v248_v34 = vld [vmem:[#allocation3 + $0x108] sm:$0xff] }
  0x5a   :  { %2095 = vmatpush2.bf16.msra.mxu1 %v4972_v35  ;;  %1983 = vmatprep.subr.bf16.mxu0 %v4973_v36  ;;  %v5020_v11 = vld [vmem:[#allocation6 + $0x6e4] ss:$16 sps:$4 sm:$0xff]   ;;  %v5018_v13 = vld [vmem:[#allocation6 + $0x6e0] ss:$16 sps:$4 sm:$0xff]   ;;  %v256_v35 = vld [vmem:[#allocation3 + $0x148] sm:$0xff] }
  0x5b   :  { %2096 = vmatprep.subr.bf16.mxu1 %v4975_v37  ;;  %v5023_v20 = vld [vmem:[#allocation6 + $0x4c4] ss:$16 sps:$4 sm:$0xff]   ;;  %v5021_v22 = vld [vmem:[#allocation6 + $0x4c0] ss:$16 sps:$4 sm:$0xff]  }
  0x5c   :  { %v5026_v21 = vld [vmem:[#allocation6 + $0x6c4] ss:$16 sps:$4 sm:$0xff]   ;;  %v5024_v25 = vld [vmem:[#allocation6 + $0x6c0] ss:$16 sps:$4 sm:$0xff]  }
  0x5d   :  { %1984 = vmatpush2.bf16.msra.mxu0 %v4977_v38  ;;  %v231_v26 = vld [vmem:[#allocation3 + $0x80] sm:$0xff]  ;;  %v233_v28 = vld [vmem:[#allocation3 + $0x90] sm:$0xff]  ;;  %v250_v38 = vld [vmem:[#allocation3 + $0x118] sm:$0xff] }
  0x5e   :  { %2097 = vmatpush2.bf16.msra.mxu1 %v4978_v39  ;;  %1985 = vmatprep.subr.bf16.mxu0 %v4979_v40  ;;  %v239_v27 = vld [vmem:[#allocation3 + $0xc0] sm:$0xff]  ;;  %v241_v29 = vld [vmem:[#allocation3 + $0xd0] sm:$0xff]  ;;  %v258_v39 = vld [vmem:[#allocation3 + $0x158] sm:$0xff] }
  0x5f   :  { %2098 = vmatprep.subr.bf16.mxu1 %v4981_v41  ;;  %v5029_v30 = vld [vmem:[#allocation6 + $0x4a4] ss:$16 sps:$4 sm:$0xff]   ;;  %v5027_v32 = vld [vmem:[#allocation6 + $0x4a0] ss:$16 sps:$4 sm:$0xff]   ;;  %v5731_v36 = vpack.c.bf16 %v239_v27, %v231_v26  ;;  %v5733_v37 = vpack.c.bf16 %v241_v29, %v233_v28  ;;  %v5761_v26 = vpack.c.bf16 %v290_v19, %v282_v18 }
  0x60   :  { %v5032_v31 = vld [vmem:[#allocation6 + $0x6a4] ss:$16 sps:$4 sm:$0xff]   ;;  %v5030_v33 = vld [vmem:[#allocation6 + $0x6a0] ss:$16 sps:$4 sm:$0xff]  }
  0x61   :  { %1986 = vmatpush2.bf16.msra.mxu0 %v4983_v42  ;;  %v5035_v40 = vld [vmem:[#allocation6 + $0x484] ss:$16 sps:$4 sm:$0xff]   ;;  %v5033_v42 = vld [vmem:[#allocation6 + $0x480] ss:$16 sps:$4 sm:$0xff]  }
  0x62   :  { %2099 = vmatpush2.bf16.msra.mxu1 %v4984_v43  ;;  %1987 = vmatprep.subr.bf16.mxu0 %v4985_v44  ;;  %v5038_v41 = vld [vmem:[#allocation6 + $0x684] ss:$16 sps:$4 sm:$0xff]   ;;  %v5735_v43 = vpack.c.bf16 %v256_v35, %v248_v34  ;;  %v5737_v44 = vpack.c.bf16 %v258_v39, %v250_v38  ;;  %v5060_v27 = vld [vmem:[#allocation6 + $0x600] ss:$16 sps:$4 sm:$0xff]   ;;  %v296_v38 = vld [vmem:[#allocation3 + $0x288] sm:$0xff] }
  0x63   :  { %2100 = vmatprep.subr.bf16.mxu1 %v4987_v45  ;;  %v5036_v45 = vld [vmem:[#allocation6 + $0x680] ss:$16 sps:$4 sm:$0xff]   ;;  %v5053_v8 = vld [vmem:[#allocation6 + $0x424] ss:$16 sps:$4 sm:$0xff]   ;;  %v304_v39 = vld [vmem:[#allocation3 + $0x2c8] sm:$0xff] }
  0x64   :  { %v247_v46 = vld [vmem:[#allocation3 + $0x100] sm:$0xff]  ;;  %v249_v48 = vld [vmem:[#allocation3 + $0x110] sm:$0xff] }
  0x65   :  { %1988 = vmatpush2.bf16.msra.mxu0 %v4989_v50  ;;  %v255_v47 = vld [vmem:[#allocation3 + $0x140] sm:$0xff]  ;;  %v257_v49 = vld [vmem:[#allocation3 + $0x150] sm:$0xff] }
  0x66   :  { %2101 = vmatpush2.bf16.msra.mxu1 %v4990_v51  ;;  %1989 = vmatprep.subr.bf16.mxu0 %v4991_v52  ;;  %v5041_v50 = vld [vmem:[#allocation6 + $0x464] ss:$16 sps:$4 sm:$0xff]   ;;  %v5039_v52 = vld [vmem:[#allocation6 + $0x460] ss:$16 sps:$4 sm:$0xff]  }
  0x67   :  { %2102 = vmatprep.subr.bf16.mxu1 %v4993_v55  ;;  %v5044_v51 = vld [vmem:[#allocation6 + $0x664] ss:$16 sps:$4 sm:$0xff]   ;;  %v5042_v55 = vld [vmem:[#allocation6 + $0x660] ss:$16 sps:$4 sm:$0xff]  }
  0x68   :  { %v265_v6 = vld [vmem:[#allocation3 + $0x190] sm:$0xff]  ;;  %v279_v28 = vld [vmem:[#allocation3 + $0x200] sm:$0xff] }
  0x69   :  { %1990 = vmatpush2.bf16.msra.mxu0 %v4995_v56  ;;  %v264_v56 = vld [vmem:[#allocation3 + $0x188] sm:$0xff]  ;;  %v273_v7 = vld [vmem:[#allocation3 + $0x1d0] sm:$0xff]  ;;  %v287_v29 = vld [vmem:[#allocation3 + $0x240] sm:$0xff] }
  0x6a   :  { %2103 = vmatpush2.bf16.msra.mxu1 %v4996_v57  ;;  %1991 = vmatprep.subr.bf16.mxu0 %v4997_v58  ;;  %v272_v57 = vld [vmem:[#allocation3 + $0x1c8] sm:$0xff]  ;;  %v5743_v58 = vpack.c.bf16 %v255_v47, %v247_v46  ;;  %v5056_v9 = vld [vmem:[#allocation6 + $0x624] ss:$16 sps:$4 sm:$0xff]   ;;  %v5757_v15 = vpack.c.bf16 %v273_v7, %v265_v6  ;;  %v5063_v34 = vld [vmem:[#allocation6 + $0x5e0] ss:$16 sps:$4 sm:$0xff]  }
  0x6b   :  { %2104 = vmatprep.subr.bf16.mxu1 %v4999_v59  ;;  %v5745_v59 = vpack.c.bf16 %v257_v49, %v249_v48  ;;  %v5066_v35 = vld [vmem:[#allocation6 + $0x7e0] ss:$16 sps:$4 sm:$0xff]   ;;  %v5071_v46 = vld [vmem:[#allocation6 + $0x5c4] ss:$16 sps:$4 sm:$0xff]   ;;  %v5771_v49 = vpack.c.bf16 %v304_v39, %v296_v38  ;;  %v314_v6 = vld [vmem:[#allocation3 + $0x318] sm:$0xff] }
  0x6c   :  { %v5074_v47 = vld [vmem:[#allocation6 + $0x7c4] ss:$16 sps:$4 sm:$0xff]   ;;  %v5069_v48 = vld [vmem:[#allocation6 + $0x5c0] ss:$16 sps:$4 sm:$0xff]   ;;  %v322_v7 = vld [vmem:[#allocation3 + $0x358] sm:$0xff] }
  0x6d   :  { %1992 = vmatpush2.bf16.msra.mxu0 %v5001_v60  ;;  %v266_v60 = vld [vmem:[#allocation3 + $0x198] sm:$0xff]  ;;  %v311_v18 = vld [vmem:[#allocation3 + $0x300] sm:$0xff] }
  0x6e   :  { %2105 = vmatpush2.bf16.msra.mxu1 %v5002_v61  ;;  %1993 = vmatprep.subr.bf16.mxu0 %v5003_v62  ;;  %v274_v61 = vld [vmem:[#allocation3 + $0x1d8] sm:$0xff]  ;;  %v5047_v62 = vld [vmem:[#allocation6 + $0x444] ss:$16 sps:$4 sm:$0xff]  }
  0x6f   :  { %2106 = vmatprep.subr.bf16.mxu1 %v5005_v63  ;;  %v5050_v63 = vld [vmem:[#allocation6 + $0x644] ss:$16 sps:$4 sm:$0xff]  }
  0x70   :  { %v319_v19 = vld [vmem:[#allocation3 + $0x340] sm:$0xff] }
  0x71   :  { %1994 = vmatpush2.bf16.msra.mxu0 %v5007_v0  ;;  %v5045_v0 = vld [vmem:[#allocation6 + $0x440] ss:$16 sps:$4 sm:$0xff]   ;;  %v5095_v38 = vld [vmem:[#allocation6 + $0x544] ss:$16 sps:$4 sm:$0xff]  }
  0x72   :  { %2107 = vmatpush2.bf16.msra.mxu1 %v5008_v1  ;;  %1995 = vmatprep.subr.bf16.mxu0 %v5009_v2  ;;  %v5747_v1 = vpack.c.bf16 %v272_v57, %v264_v56  ;;  %v5749_v2 = vpack.c.bf16 %v274_v61, %v266_v60  ;;  %v297_v56 = vld [vmem:[#allocation3 + $0x290] sm:$0xff] }
  0x73   :  { %2108 = vmatprep.subr.bf16.mxu1 %v5011_v3  ;;  %v5048_v3 = vld [vmem:[#allocation6 + $0x640] ss:$16 sps:$4 sm:$0xff]   ;;  %v5077_v60 = vld [vmem:[#allocation6 + $0x5a4] ss:$16 sps:$4 sm:$0xff]  }
  0x74   :  { %v305_v57 = vld [vmem:[#allocation3 + $0x2d0] sm:$0xff] }
  0x75   :  { %1996 = vmatpush2.bf16.msra.mxu0 %v5013_v4  ;;  %v263_v4 = vld [vmem:[#allocation3 + $0x180] sm:$0xff] }
  0x76   :  { %2109 = vmatpush2.bf16.msra.mxu1 %v5014_v5  ;;  %2191 = vmatprep.subr.bf16.mxu0 %v5017_v10  ;;  %v271_v5 = vld [vmem:[#allocation3 + $0x1c0] sm:$0xff] }
  0x77   :  { %2304 = vmatprep.subr.bf16.mxu1 %v5020_v11  ;;  %v5051_v10 = vld [vmem:[#allocation6 + $0x420] ss:$16 sps:$4 sm:$0xff]   ;;  %v5755_v14 = vpack.c.bf16 %v271_v5, %v263_v4  ;;  %v5080_v61 = vld [vmem:[#allocation6 + $0x7a4] ss:$16 sps:$4 sm:$0xff]   ;;  %v5781_v5 = vpack.c.bf16 %v305_v57, %v297_v56 }
  0x78   :  { %1998 = vmatmul.mubr.bf16.vlgmr.msra.gmra.mxu0 %v5719_v16  ;;  %v5054_v11 = vld [vmem:[#allocation6 + $0x620] ss:$16 sps:$4 sm:$0xff]   ;;  %v5098_v39 = vld [vmem:[#allocation6 + $0x744] ss:$16 sps:$4 sm:$0xff]  }
  0x79   :  { %2111 = vmatmul.mubr.bf16.vlgmr.msra.gmra.mxu1 %v5721_v17  ;;  %2192 = vmatpush1.bf16.msra.mxu0 %v5015_v12  ;;  %v280_v12 = vld [vmem:[#allocation3 + $0x208] sm:$0xff]  ;;  %v5101_v56 = vld [vmem:[#allocation6 + $0x524] ss:$16 sps:$4 sm:$0xff]  }
  0x7a   :  { %2305 = vmatpush1.bf16.msra.mxu1 %v5018_v13  ;;  %2193 = vmatprep.subr.bf16.mxu0 %v5023_v20  ;;  %v288_v13 = vld [vmem:[#allocation3 + $0x248] sm:$0xff]  ;;  %v5059_v20 = vld [vmem:[#allocation6 + $0x404] ss:$16 sps:$4 sm:$0xff]  }
  0x7b   :  { %2306 = vmatprep.subr.bf16.mxu1 %v5026_v21  ;;  %2007 = vmatprep.mubr.bf16.mxu0 %v5723_v23  ;;  %v5062_v21 = vld [vmem:[#allocation6 + $0x604] ss:$16 sps:$4 sm:$0xff]  }
  0x7c   :  { %2120 = vmatprep.mubr.bf16.mxu1 %v5725_v24  ;;  %v5104_v57 = vld [vmem:[#allocation6 + $0x724] ss:$16 sps:$4 sm:$0xff]  }
  0x7d   :  { %2194 = vmatpush1.bf16.msra.mxu0 %v5021_v22  ;;  %v5057_v22 = vld [vmem:[#allocation6 + $0x400] ss:$16 sps:$4 sm:$0xff]  }
  0x7e   :  { %2307 = vmatpush1.bf16.msra.mxu1 %v5024_v25  ;;  %2195 = vmatprep.subr.bf16.mxu0 %v5029_v30  ;;  %v5759_v25 = vpack.c.bf16 %v288_v13, %v280_v12  ;;  %v281_v30 = vld [vmem:[#allocation3 + $0x210] sm:$0xff]  ;;  %v5785_v12 = vpack.c.bf16 %v322_v7, %v314_v6  ;;  %v222_v6 = vld [vmem:[#allocation3 + $0x38] sm:$0xff] }
  0x7f   :  { %2308 = vmatprep.subr.bf16.mxu1 %v5032_v31  ;;  %v289_v31 = vld [vmem:[#allocation3 + $0x250] sm:$0xff]  ;;  %v230_v7 = vld [vmem:[#allocation3 + $0x78] sm:$0xff] }
  0x80   :  { %2008 = vmatmul.mubr.bf16.gmra.mxu0 %v5731_v36  ;;  %v5084_v13 = vld [vmem:[#allocation6 + $0x780] ss:$16 sps:$4 sm:$0xff]  }
  0x81   :  { %2121 = vmatmul.mubr.bf16.gmra.mxu1 %v5733_v37  ;;  %2196 = vmatpush1.bf16.msra.mxu0 %v5027_v32  ;;  %v5065_v32 = vld [vmem:[#allocation6 + $0x5e4] ss:$16 sps:$4 sm:$0xff]  }
  0x82   :  { %2309 = vmatpush1.bf16.msra.mxu1 %v5030_v33  ;;  %2197 = vmatprep.subr.bf16.mxu0 %v5035_v40  ;;  %v5068_v33 = vld [vmem:[#allocation6 + $0x7e4] ss:$16 sps:$4 sm:$0xff]   ;;  %v5767_v40 = vpack.c.bf16 %v287_v29, %v279_v28  ;;  %v5087_v28 = vld [vmem:[#allocation6 + $0x560] ss:$16 sps:$4 sm:$0xff]  }
  0x83   :  { %2310 = vmatprep.subr.bf16.mxu1 %v5038_v41  ;;  %2017 = vmatprep.mubr.bf16.mxu0 %v5735_v43  ;;  %v5769_v41 = vpack.c.bf16 %v289_v31, %v281_v30  ;;  %v5090_v29 = vld [vmem:[#allocation6 + $0x760] ss:$16 sps:$4 sm:$0xff]   ;;  %v328_v30 = vld [vmem:[#allocation3 + $0x388] sm:$0xff] }
  0x84   :  { %2130 = vmatprep.mubr.bf16.mxu1 %v5737_v44  ;;  %v336_v31 = vld [vmem:[#allocation3 + $0x3c8] sm:$0xff] }
  0x85   :  { %2198 = vmatpush1.bf16.msra.mxu0 %v5033_v42  ;;  %v298_v42 = vld [vmem:[#allocation3 + $0x298] sm:$0xff] }
  0x86   :  { %2311 = vmatpush1.bf16.msra.mxu1 %v5036_v45  ;;  %2199 = vmatprep.subr.bf16.mxu0 %v5041_v50  ;;  %v306_v45 = vld [vmem:[#allocation3 + $0x2d8] sm:$0xff] }
  0x87   :  { %2312 = vmatprep.subr.bf16.mxu1 %v5044_v51  ;;  %v5773_v50 = vpack.c.bf16 %v306_v45, %v298_v42  ;;  %v5072_v51 = vld [vmem:[#allocation6 + $0x7c0] ss:$16 sps:$4 sm:$0xff]   ;;  %v5795_v45 = vpack.c.bf16 %v336_v31, %v328_v30  ;;  %v5111_v30 = vld [vmem:[#allocation6 + $0xe8] ss:$16 sps:$4 sm:$0xff]  }
  0x88   :  { %2018 = vmatmul.mubr.bf16.gmra.mxu0 %v5743_v58  ;;  %v5093_v42 = vld [vmem:[#allocation6 + $0x540] ss:$16 sps:$4 sm:$0xff]   ;;  %v5114_v31 = vld [vmem:[#allocation6 + $0x2e8] ss:$16 sps:$4 sm:$0xff]  }
  0x89   :  { %2131 = vmatmul.mubr.bf16.gmra.mxu1 %v5745_v59  ;;  %2200 = vmatpush1.bf16.msra.mxu0 %v5039_v52  ;;  %v295_v52 = vld [vmem:[#allocation3 + $0x280] sm:$0xff] }
  0x8a   :  { %2313 = vmatpush1.bf16.msra.mxu1 %v5042_v55  ;;  %2201 = vmatprep.subr.bf16.mxu0 %v5047_v62  ;;  %v303_v55 = vld [vmem:[#allocation3 + $0x2c0] sm:$0xff] }
  0x8b   :  { %2314 = vmatprep.subr.bf16.mxu1 %v5050_v63  ;;  %2027 = vmatprep.mubr.bf16.mxu0 %v5747_v1  ;;  %v5075_v62 = vld [vmem:[#allocation6 + $0x5a0] ss:$16 sps:$4 sm:$0xff]   ;;  %v5779_v4 = vpack.c.bf16 %v303_v55, %v295_v52 }
  0x8c   :  { %2140 = vmatprep.mubr.bf16.mxu1 %v5749_v2  ;;  %v5078_v63 = vld [vmem:[#allocation6 + $0x7a0] ss:$16 sps:$4 sm:$0xff]  }
  0x8d   :  { %2202 = vmatpush1.bf16.msra.mxu0 %v5045_v0  ;;  %v312_v0 = vld [vmem:[#allocation3 + $0x308] sm:$0xff]  ;;  %v329_v52 = vld [vmem:[#allocation3 + $0x390] sm:$0xff] }
  0x8e   :  { %2315 = vmatpush1.bf16.msra.mxu1 %v5048_v3  ;;  %2203 = vmatprep.subr.bf16.mxu0 %v5053_v8  ;;  %v320_v3 = vld [vmem:[#allocation3 + $0x348] sm:$0xff]  ;;  %v5083_v8 = vld [vmem:[#allocation6 + $0x584] ss:$16 sps:$4 sm:$0xff]  }
  0x8f   :  { %2316 = vmatprep.subr.bf16.mxu1 %v5056_v9  ;;  %v5086_v9 = vld [vmem:[#allocation6 + $0x784] ss:$16 sps:$4 sm:$0xff]  }
  0x90   :  { %2028 = vmatmul.mubr.bf16.gmra.mxu0 %v5755_v14  ;;  %v337_v55 = vld [vmem:[#allocation3 + $0x3d0] sm:$0xff] }
  0x91   :  { %2141 = vmatmul.mubr.bf16.gmra.mxu1 %v5757_v15  ;;  %2204 = vmatpush1.bf16.msra.mxu0 %v5051_v10  ;;  %v5081_v10 = vld [vmem:[#allocation6 + $0x580] ss:$16 sps:$4 sm:$0xff]  }
  0x92   :  { %2317 = vmatpush1.bf16.msra.mxu1 %v5054_v11  ;;  %2205 = vmatprep.subr.bf16.mxu0 %v5059_v20  ;;  %v5783_v11 = vpack.c.bf16 %v320_v3, %v312_v0  ;;  %v313_v20 = vld [vmem:[#allocation3 + $0x310] sm:$0xff]  ;;  %v5805_v3 = vpack.c.bf16 %v337_v55, %v329_v52  ;;  %v5117_v52 = vld [vmem:[#allocation6 + $0xc8] ss:$16 sps:$4 sm:$0xff]  }
  0x93   :  { %2318 = vmatprep.subr.bf16.mxu1 %v5062_v21  ;;  %2037 = vmatprep.mubr.bf16.mxu0 %v5759_v25  ;;  %v321_v21 = vld [vmem:[#allocation3 + $0x350] sm:$0xff] }
  0x94   :  { %2150 = vmatprep.mubr.bf16.mxu1 %v5761_v26 }
  0x95   :  { %2206 = vmatpush1.bf16.msra.mxu0 %v5057_v22  ;;  %v5089_v22 = vld [vmem:[#allocation6 + $0x564] ss:$16 sps:$4 sm:$0xff]  }
  0x96   :  { %2319 = vmatpush1.bf16.msra.mxu1 %v5060_v27  ;;  %2207 = vmatprep.subr.bf16.mxu0 %v5065_v32  ;;  %v5092_v27 = vld [vmem:[#allocation6 + $0x764] ss:$16 sps:$4 sm:$0xff]   ;;  %v5791_v32 = vpack.c.bf16 %v319_v19, %v311_v18  ;;  %v5809_v18 = vpack.c.bf16 %v230_v7, %v222_v6  ;;  %v5108_v19 = vld [vmem:[#allocation6 + $0x700] ss:$16 sps:$4 sm:$0xff]   ;;  %v5125_v6 = vld [vmem:[#allocation6 + $0xac] ss:$16 sps:$4 sm:$0xff]  }
  0x97   :  { %2320 = vmatprep.subr.bf16.mxu1 %v5068_v33  ;;  %v5793_v33 = vpack.c.bf16 %v321_v21, %v313_v20  ;;  %v219_v20 = vld [vmem:[#allocation3 + $0x20] sm:$0xff]  ;;  %v5128_v7 = vld [vmem:[#allocation6 + $0x2ac] ss:$16 sps:$4 sm:$0xff]  }
  0x98   :  { %2038 = vmatmul.mubr.bf16.gmra.mxu0 %v5767_v40  ;;  %v227_v21 = vld [vmem:[#allocation3 + $0x60] sm:$0xff] }
  0x99   :  { %2151 = vmatmul.mubr.bf16.gmra.mxu1 %v5769_v41  ;;  %2208 = vmatpush2.bf16.msra.mxu0 %v5063_v34  ;;  %v330_v34 = vld [vmem:[#allocation3 + $0x398] sm:$0xff] }
  0x9a   :  { %2321 = vmatpush2.bf16.msra.mxu1 %v5066_v35  ;;  %2209 = vmatprep.subr.bf16.mxu0 %v5071_v46  ;;  %v338_v35 = vld [vmem:[#allocation3 + $0x3d8] sm:$0xff] }
  0x9b   :  { %2322 = vmatprep.subr.bf16.mxu1 %v5074_v47  ;;  %2047 = vmatprep.mubr.bf16.mxu0 %v5771_v49  ;;  %v5797_v46 = vpack.c.bf16 %v338_v35, %v330_v34  ;;  %v5096_v47 = vld [vmem:[#allocation6 + $0x740] ss:$16 sps:$4 sm:$0xff]   ;;  %v236_v34 = vld [vmem:[#allocation3 + $0xa8] sm:$0xff] }
  0x9c   :  { %2160 = vmatprep.mubr.bf16.mxu1 %v5773_v50  ;;  %v244_v35 = vld [vmem:[#allocation3 + $0xe8] sm:$0xff] }
  0x9d   :  { %2210 = vmatpush2.bf16.msra.mxu0 %v5069_v48  ;;  %v327_v48 = vld [vmem:[#allocation3 + $0x380] sm:$0xff]  ;;  %v5819_v55 = vpack.c.bf16 %v244_v35, %v236_v34  ;;  %v5132_v35 = vld [vmem:[#allocation6 + $0x288] ss:$16 sps:$4 sm:$0xff]  }
  0x9e   :  { %2323 = vmatpush2.bf16.msra.mxu1 %v5072_v51  ;;  %2211 = vmatprep.subr.bf16.mxu0 %v5077_v60  ;;  %v335_v51 = vld [vmem:[#allocation3 + $0x3c0] sm:$0xff] }
  0x9f   :  { %2324 = vmatprep.subr.bf16.mxu1 %v5080_v61  ;;  %v5099_v60 = vld [vmem:[#allocation6 + $0x520] ss:$16 sps:$4 sm:$0xff]   ;;  %v5803_v0 = vpack.c.bf16 %v335_v51, %v327_v48  ;;  %v5119_v48 = vld [vmem:[#allocation6 + $0xcc] ss:$16 sps:$4 sm:$0xff]  }
  0xa0   :  { %2048 = vmatmul.mubr.bf16.gmra.mxu0 %v5779_v4  ;;  %v5102_v61 = vld [vmem:[#allocation6 + $0x720] ss:$16 sps:$4 sm:$0xff]   ;;  %v5122_v51 = vld [vmem:[#allocation6 + $0x2cc] ss:$16 sps:$4 sm:$0xff]  }
  0xa1   :  { %2161 = vmatmul.mubr.bf16.gmra.mxu1 %v5781_v5  ;;  %2212 = vmatpush2.bf16.msra.mxu0 %v5075_v62  ;;  %v220_v62 = vld [vmem:[#allocation3 + $0x28] sm:$0xff] }
  0xa2   :  { %2325 = vmatpush2.bf16.msra.mxu1 %v5078_v63  ;;  %2213 = vmatprep.subr.bf16.mxu0 %v5083_v8  ;;  %v228_v63 = vld [vmem:[#allocation3 + $0x68] sm:$0xff]  ;;  %v5107_v8 = vld [vmem:[#allocation6 + $0x504] ss:$16 sps:$4 sm:$0xff]  }
  0xa3   :  { %2326 = vmatprep.subr.bf16.mxu1 %v5086_v9  ;;  %2057 = vmatprep.mubr.bf16.mxu0 %v5783_v11  ;;  %v5110_v9 = vld [vmem:[#allocation6 + $0x704] ss:$16 sps:$4 sm:$0xff]  }
  0xa4   :  { %2170 = vmatprep.mubr.bf16.mxu1 %v5785_v12 }
  0xa5   :  { %2214 = vmatpush2.bf16.msra.mxu0 %v5081_v10  ;;  %v5105_v10 = vld [vmem:[#allocation6 + $0x500] ss:$16 sps:$4 sm:$0xff]  }
  0xa6   :  { %2327 = vmatpush2.bf16.msra.mxu1 %v5084_v13  ;;  %2215 = vmatprep.subr.bf16.mxu0 %v5089_v22  ;;  %v5807_v13 = vpack.c.bf16 %v228_v63, %v220_v62  ;;  %v221_v22 = vld [vmem:[#allocation3 + $0x30] sm:$0xff] }
  0xa7   :  { %2328 = vmatprep.subr.bf16.mxu1 %v5092_v27  ;;  %v229_v27 = vld [vmem:[#allocation3 + $0x70] sm:$0xff] }
  0xa8   :  { %2058 = vmatmul.mubr.bf16.gmra.mxu0 %v5791_v32  ;;  %v237_v62 = vld [vmem:[#allocation3 + $0xb0] sm:$0xff] }
  0xa9   :  { %2171 = vmatmul.mubr.bf16.gmra.mxu1 %v5793_v33  ;;  %2216 = vmatpush2.bf16.msra.mxu0 %v5087_v28  ;;  %v5113_v28 = vld [vmem:[#allocation6 + $0xec] ss:$16 sps:$4 sm:$0xff]   ;;  %v245_v63 = vld [vmem:[#allocation3 + $0xf0] sm:$0xff] }
  0xaa   :  { %2329 = vmatpush2.bf16.msra.mxu1 %v5090_v29  ;;  %2217 = vmatprep.subr.bf16.mxu0 %v5095_v38  ;;  %v5116_v29 = vld [vmem:[#allocation6 + $0x2ec] ss:$16 sps:$4 sm:$0xff]   ;;  %v5815_v38 = vpack.c.bf16 %v227_v21, %v219_v20  ;;  %v5829_v21 = vpack.c.bf16 %v245_v63, %v237_v62 }
  0xab   :  { %2330 = vmatprep.subr.bf16.mxu1 %v5098_v39  ;;  %2067 = vmatprep.mubr.bf16.mxu0 %v5795_v45  ;;  %v5817_v39 = vpack.c.bf16 %v229_v27, %v221_v22  ;;  %v254_v22 = vld [vmem:[#allocation3 + $0x138] sm:$0xff]  ;;  %v268_v62 = vld [vmem:[#allocation3 + $0x1a8] sm:$0xff] }
  0xac   :  { %2180 = vmatprep.mubr.bf16.mxu1 %v5797_v46  ;;  %v262_v27 = vld [vmem:[#allocation3 + $0x178] sm:$0xff]  ;;  %v276_v63 = vld [vmem:[#allocation3 + $0x1e8] sm:$0xff] }
  0xad   :  { %2218 = vmatpush2.bf16.msra.mxu0 %v5093_v42  ;;  %v238_v42 = vld [vmem:[#allocation3 + $0xb8] sm:$0xff]  ;;  %v5833_v34 = vpack.c.bf16 %v262_v27, %v254_v22  ;;  %v5843_v27 = vpack.c.bf16 %v276_v63, %v268_v62  ;;  %v284_v62 = vld [vmem:[#allocation3 + $0x228] sm:$0xff] }
  0xae   :  { %2331 = vmatpush2.bf16.msra.mxu1 %v5096_v47  ;;  %2219 = vmatprep.subr.bf16.mxu0 %v5101_v56  ;;  %v246_v47 = vld [vmem:[#allocation3 + $0xf8] sm:$0xff]  ;;  %v292_v63 = vld [vmem:[#allocation3 + $0x268] sm:$0xff] }
  0xaf   :  { %2332 = vmatprep.subr.bf16.mxu1 %v5104_v57  ;;  %v5821_v56 = vpack.c.bf16 %v246_v47, %v238_v42  ;;  %v5120_v57 = vld [vmem:[#allocation6 + $0x2c8] ss:$16 sps:$4 sm:$0xff]   ;;  %6821 = vst [vmem:[#allocation17_spill] sm:$0xff] %v5833_v34  ;;  %v251_v42 = vld [vmem:[#allocation3 + $0x120] sm:$0xff]  ;;  %6824 = vst [vmem:[#allocation20_spill] sm:$0xff] %v5843_v27 }
  0xb0   :  { %2068 = vmatmul.mubr.bf16.gmra.mxu0 %v5803_v0  ;;  %v259_v47 = vld [vmem:[#allocation3 + $0x160] sm:$0xff]  ;;  %v5141_v22 = vld [vmem:[#allocation6 + $0x48] ss:$16 sps:$4 sm:$0xff]  }
  0xb1   :  { %2181 = vmatmul.mubr.bf16.gmra.mxu1 %v5805_v3  ;;  %2220 = vmatpush2.bf16.msra.mxu0 %v5099_v60  ;;  %v235_v60 = vld [vmem:[#allocation3 + $0xa0] sm:$0xff] }
  0xb2   :  { %2333 = vmatpush2.bf16.msra.mxu1 %v5102_v61  ;;  %2221 = vmatprep.subr.bf16.mxu0 %v5107_v8  ;;  %v243_v61 = vld [vmem:[#allocation3 + $0xe0] sm:$0xff]  ;;  %v5123_v8 = vld [vmem:[#allocation6 + $0xa8] ss:$16 sps:$4 sm:$0xff]  }
  0xb3   :  { %2334 = vmatprep.subr.bf16.mxu1 %v5110_v9  ;;  %2223 = vmatprep.mubr.bf16.mxu0 %v5807_v13  ;;  %v5126_v9 = vld [vmem:[#allocation6 + $0x2a8] ss:$16 sps:$4 sm:$0xff]   ;;  %v5827_v20 = vpack.c.bf16 %v243_v61, %v235_v60 }
  0xb4   :  { %2336 = vmatprep.mubr.bf16.mxu1 %v5809_v18  ;;  %v5135_v60 = vld [vmem:[#allocation6 + $0x68] ss:$16 sps:$4 sm:$0xff]  }
  0xb5   :  { %2222 = vmatpush2.bf16.msra.mxu0 %v5105_v10  ;;  %v252_v10 = vld [vmem:[#allocation3 + $0x128] sm:$0xff] }
  0xb6   :  { %2335 = vmatpush2.bf16.msra.mxu1 %v5108_v19  ;;  %2417 = vmatprep.subr.bf16.mxu0 %v5113_v28  ;;  %v260_v19 = vld [vmem:[#allocation3 + $0x168] sm:$0xff] }
  0xb7   :  { %2530 = vmatprep.subr.bf16.mxu1 %v5116_v29  ;;  %v5131_v28 = vld [vmem:[#allocation6 + $0x8c] ss:$16 sps:$4 sm:$0xff]   ;;  %v5138_v61 = vld [vmem:[#allocation6 + $0x268] ss:$16 sps:$4 sm:$0xff]  }
  0xb8   :  { %2224 = vmatmul.mubr.bf16.vlgmr.msra.gmra.mxu0 %v5815_v38  ;;  %v5134_v29 = vld [vmem:[#allocation6 + $0x28c] ss:$16 sps:$4 sm:$0xff]  }
  0xb9   :  { %2337 = vmatmul.mubr.bf16.vlgmr.msra.gmra.mxu1 %v5817_v39  ;;  %2418 = vmatpush1.bf16.msra.mxu0 %v5111_v30  ;;  %v5129_v30 = vld [vmem:[#allocation6 + $0x88] ss:$16 sps:$4 sm:$0xff]  }
  0xba   :  { %2531 = vmatpush1.bf16.msra.mxu1 %v5114_v31  ;;  %2419 = vmatprep.subr.bf16.mxu0 %v5119_v48  ;;  %v5831_v31 = vpack.c.bf16 %v260_v19, %v252_v10  ;;  %v253_v48 = vld [vmem:[#allocation3 + $0x130] sm:$0xff]  ;;  %v5143_v10 = vld [vmem:[#allocation6 + $0x4c] ss:$16 sps:$4 sm:$0xff]  }
  0xbb   :  { %2532 = vmatprep.subr.bf16.mxu1 %v5122_v51  ;;  %2233 = vmatprep.mubr.bf16.mxu0 %v5819_v55  ;;  %v261_v51 = vld [vmem:[#allocation3 + $0x170] sm:$0xff]  ;;  %v5146_v19 = vld [vmem:[#allocation6 + $0x24c] ss:$16 sps:$4 sm:$0xff]  }
  0xbc   :  { %2346 = vmatprep.mubr.bf16.mxu1 %v5821_v56  ;;  %6820 = vst [vmem:[#allocation16_spill] sm:$0xff] %v5831_v31 }
  0xbd   :  { %2420 = vmatpush1.bf16.msra.mxu0 %v5117_v52  ;;  %v5137_v52 = vld [vmem:[#allocation6 + $0x6c] ss:$16 sps:$4 sm:$0xff]  }
  0xbe   :  { %2533 = vmatpush1.bf16.msra.mxu1 %v5120_v57  ;;  %2421 = vmatprep.subr.bf16.mxu0 %v5125_v6  ;;  %v5140_v57 = vld [vmem:[#allocation6 + $0x26c] ss:$16 sps:$4 sm:$0xff]   ;;  %v5839_v6 = vpack.c.bf16 %v259_v47, %v251_v42  ;;  %v267_v42 = vld [vmem:[#allocation3 + $0x1a0] sm:$0xff] }
  0xbf   :  { %2534 = vmatprep.subr.bf16.mxu1 %v5128_v7  ;;  %v5841_v7 = vpack.c.bf16 %v261_v51, %v253_v48  ;;  %v275_v47 = vld [vmem:[#allocation3 + $0x1e0] sm:$0xff]  ;;  %v5149_v48 = vld [vmem:[#allocation6 + $0x2c] ss:$16 sps:$4 sm:$0xff]  }
  0xc0   :  { %2234 = vmatmul.mubr.bf16.gmra.mxu0 %v5827_v20  ;;  %6822 = vst [vmem:[#allocation18_spill] sm:$0xff] %v5839_v6  ;;  %v5152_v51 = vld [vmem:[#allocation6 + $0x22c] ss:$16 sps:$4 sm:$0xff]  }
  0xc1   :  { %2347 = vmatmul.mubr.bf16.gmra.mxu1 %v5829_v21  ;;  %2422 = vmatpush1.bf16.msra.mxu0 %v5123_v8  ;;  %6823 = vst [vmem:[#allocation19_spill] sm:$0xff] %v5841_v7  ;;  %v270_v8 = vld [vmem:[#allocation3 + $0x1b8] sm:$0xff] }
  0xc2   :  { %2535 = vmatpush1.bf16.msra.mxu1 %v5126_v9  ;;  %2423 = vmatprep.subr.bf16.mxu0 %v5131_v28  ;;  %v278_v9 = vld [vmem:[#allocation3 + $0x1f8] sm:$0xff] }
  0xc3   :  { %2536 = vmatprep.subr.bf16.mxu1 %v5134_v29  ;;  %2243 = vmatprep.mubr.bf16.mxu0 %v5831_v31  ;;  %v5845_v28 = vpack.c.bf16 %v278_v9, %v270_v8  ;;  %v5144_v29 = vld [vmem:[#allocation6 + $0x248] ss:$16 sps:$4 sm:$0xff]   ;;  %v5851_v8 = vpack.c.bf16 %v275_v47, %v267_v42  ;;  %v283_v47 = vld [vmem:[#allocation3 + $0x220] sm:$0xff] }
  0xc4   :  { %2356 = vmatprep.mubr.bf16.mxu1 %v5833_v34  ;;  %v5156_v42 = vld [vmem:[#allocation6 + $0x208] ss:$16 sps:$4 sm:$0xff]   ;;  %v315_v34 = vld [vmem:[#allocation3 + $0x320] sm:$0xff] }
  0xc5   :  { %2424 = vmatpush1.bf16.msra.mxu0 %v5129_v30  ;;  %6825 = vst [vmem:[#allocation21_spill] sm:$0xff] %v5845_v28  ;;  %v269_v30 = vld [vmem:[#allocation3 + $0x1b0] sm:$0xff]  ;;  %6826 = vst [vmem:[#allocation22_spill] sm:$0xff] %v5851_v8  ;;  %v323_v31 = vld [vmem:[#allocation3 + $0x360] sm:$0xff] }
  0xc6   :  { %2537 = vmatpush1.bf16.msra.mxu1 %v5132_v35  ;;  %2425 = vmatprep.subr.bf16.mxu0 %v5137_v52  ;;  %v277_v35 = vld [vmem:[#allocation3 + $0x1f0] sm:$0xff]  ;;  %v5147_v52 = vld [vmem:[#allocation6 + $0x28] ss:$16 sps:$4 sm:$0xff]  }
  0xc7   :  { %2538 = vmatprep.subr.bf16.mxu1 %v5140_v57  ;;  %v5150_v57 = vld [vmem:[#allocation6 + $0x228] ss:$16 sps:$4 sm:$0xff]   ;;  %v5853_v9 = vpack.c.bf16 %v277_v35, %v269_v30  ;;  %v291_v30 = vld [vmem:[#allocation3 + $0x260] sm:$0xff]  ;;  %v5161_v35 = vld [vmem:[#allocation6 + $0x1ec] ss:$16 sps:$4 sm:$0xff]  }
  0xc8   :  { %2244 = vmatmul.mubr.bf16.gmra.mxu0 %v5839_v6 }
  0xc9   :  { %2357 = vmatmul.mubr.bf16.gmra.mxu1 %v5841_v7  ;;  %2426 = vmatpush1.bf16.msra.mxu0 %v5135_v60  ;;  %6827 = vst [vmem:[#allocation23_spill] sm:$0xff] %v5853_v9  ;;  %v286_v60 = vld [vmem:[#allocation3 + $0x238] sm:$0xff] }
  0xca   :  { %2539 = vmatpush1.bf16.msra.mxu1 %v5138_v61  ;;  %2427 = vmatprep.subr.bf16.mxu0 %v5143_v10  ;;  %v294_v61 = vld [vmem:[#allocation3 + $0x278] sm:$0xff] }
  0xcb   :  { %2540 = vmatprep.subr.bf16.mxu1 %v5146_v19  ;;  %2253 = vmatprep.mubr.bf16.mxu0 %v5843_v27  ;;  %v5155_v7 = vld [vmem:[#allocation6 + $0xc] ss:$16 sps:$4 sm:$0xff]   ;;  %v5153_v19 = vld [vmem:[#allocation6 + $0x8] ss:$16 sps:$4 sm:$0xff]   ;;  %v5855_v27 = vpack.c.bf16 %v292_v63, %v284_v62 }
  0xcc   :  { %2366 = vmatprep.mubr.bf16.mxu1 %v5845_v28  ;;  %v5158_v10 = vld [vmem:[#allocation6 + $0x20c] ss:$16 sps:$4 sm:$0xff]   ;;  %v5857_v28 = vpack.c.bf16 %v294_v61, %v286_v60  ;;  %v5162_v62 = vld [vmem:[#allocation6 + $0x3e8] ss:$16 sps:$4 sm:$0xff]   ;;  %v5863_v61 = vpack.c.bf16 %v291_v30, %v283_v47  ;;  %v299_v30 = vld [vmem:[#allocation3 + $0x2a0] sm:$0xff] }
  0xcd   :  { %2428 = vmatpush1.bf16.msra.mxu0 %v5141_v22  ;;  %6828 = vst [vmem:[#allocation24_spill] sm:$0xff] %v5855_v27  ;;  %v285_v22 = vld [vmem:[#allocation3 + $0x230] sm:$0xff]  ;;  %v300_v63 = vld [vmem:[#allocation3 + $0x2a8] sm:$0xff] }
  0xce   :  { %2541 = vmatpush1.bf16.msra.mxu1 %v5144_v29  ;;  %2429 = vmatprep.subr.bf16.mxu0 %v5149_v48  ;;  %6829 = vst [vmem:[#allocation25_spill] sm:$0xff] %v5857_v28  ;;  %v293_v29 = vld [vmem:[#allocation3 + $0x270] sm:$0xff]  ;;  %v5164_v48 = vld [vmem:[#allocation6 + $0x3ec] ss:$16 sps:$4 sm:$0xff]   ;;  %6830 = vst [vmem:[#allocation26_spill] sm:$0xff] %v5863_v61 }
  0xcf   :  { %2542 = vmatprep.subr.bf16.mxu1 %v5152_v51  ;;  %v5159_v51 = vld [vmem:[#allocation6 + $0x1e8] ss:$16 sps:$4 sm:$0xff]  }
  0xd0   :  { %2254 = vmatmul.mubr.bf16.gmra.mxu0 %v5851_v8  ;;  %v308_v60 = vld [vmem:[#allocation3 + $0x2e8] sm:$0xff] }
  0xd1   :  { %2367 = vmatmul.mubr.bf16.gmra.mxu1 %v5853_v9  ;;  %2430 = vmatpush1.bf16.msra.mxu0 %v5147_v52  ;;  %v5865_v9 = vpack.c.bf16 %v293_v29, %v285_v22  ;;  %v302_v52 = vld [vmem:[#allocation3 + $0x2b8] sm:$0xff]  ;;  %v307_v22 = vld [vmem:[#allocation3 + $0x2e0] sm:$0xff] }
  0xd2   :  { %2543 = vmatpush1.bf16.msra.mxu1 %v5150_v57  ;;  %2431 = vmatprep.subr.bf16.mxu0 %v5155_v7  ;;  %v310_v57 = vld [vmem:[#allocation3 + $0x2f8] sm:$0xff] }
  0xd3   :  { %2544 = vmatprep.subr.bf16.mxu1 %v5158_v10  ;;  %2263 = vmatprep.mubr.bf16.mxu0 %v5855_v27  ;;  %6831 = vst [vmem:[#allocation27_spill] sm:$0xff] %v5865_v9  ;;  %v5167_v8 = vld [vmem:[#allocation6 + $0x1cc] ss:$16 sps:$4 sm:$0xff]   ;;  %v5165_v10 = vld [vmem:[#allocation6 + $0x1c8] ss:$16 sps:$4 sm:$0xff]   ;;  %v5867_v27 = vpack.c.bf16 %v308_v60, %v300_v63 }
  0xd4   :  { %2376 = vmatprep.mubr.bf16.mxu1 %v5857_v28  ;;  %v5170_v7 = vld [vmem:[#allocation6 + $0x3cc] ss:$16 sps:$4 sm:$0xff]   ;;  %v5869_v28 = vpack.c.bf16 %v310_v57, %v302_v52  ;;  %v5168_v47 = vld [vmem:[#allocation6 + $0x3c8] ss:$16 sps:$4 sm:$0xff]   ;;  %v5875_v57 = vpack.c.bf16 %v307_v22, %v299_v30  ;;  %v317_v30 = vld [vmem:[#allocation3 + $0x330] sm:$0xff] }
  0xd5   :  { %2432 = vmatpush1.bf16.msra.mxu0 %v5153_v19  ;;  %6832 = vst [vmem:[#allocation28_spill] sm:$0xff] %v5867_v27  ;;  %v301_v19 = vld [vmem:[#allocation3 + $0x2b0] sm:$0xff]  ;;  %v5173_v29 = vld [vmem:[#allocation6 + $0x1ac] ss:$16 sps:$4 sm:$0xff]   ;;  %v5174_v63 = vld [vmem:[#allocation6 + $0x3a8] ss:$16 sps:$4 sm:$0xff]  }
  0xd6   :  { %2545 = vmatpush1.bf16.msra.mxu1 %v5156_v42  ;;  %2433 = vmatprep.subr.bf16.mxu0 %v5161_v35  ;;  %6833 = vst [vmem:[#allocation29_spill] sm:$0xff] %v5869_v28  ;;  %v309_v42 = vld [vmem:[#allocation3 + $0x2f0] sm:$0xff]  ;;  %v5176_v35 = vld [vmem:[#allocation6 + $0x3ac] ss:$16 sps:$4 sm:$0xff]   ;;  %6834 = vst [vmem:[#allocation30_spill] sm:$0xff] %v5875_v57 }
  0xd7   :  { %2546 = vmatprep.subr.bf16.mxu1 %v5164_v48  ;;  %v5171_v48 = vld [vmem:[#allocation6 + $0x1a8] ss:$16 sps:$4 sm:$0xff]   ;;  %v325_v22 = vld [vmem:[#allocation3 + $0x370] sm:$0xff] }
  0xd8   :  { %2264 = vmatmul.mubr.bf16.gmra.mxu0 %v5863_v61  ;;  %v316_v60 = vld [vmem:[#allocation3 + $0x328] sm:$0xff] }
  0xd9   :  { %2377 = vmatmul.mubr.bf16.gmra.mxu1 %v5865_v9  ;;  %2434 = vmatpush2.bf16.msra.mxu0 %v5159_v51  ;;  %v324_v52 = vld [vmem:[#allocation3 + $0x368] sm:$0xff]  ;;  %v5877_v9 = vpack.c.bf16 %v309_v42, %v301_v19  ;;  %v318_v51 = vld [vmem:[#allocation3 + $0x338] sm:$0xff] }
  0xda   :  { %2547 = vmatpush2.bf16.msra.mxu1 %v5162_v62  ;;  %2435 = vmatprep.subr.bf16.mxu0 %v5167_v8  ;;  %v326_v62 = vld [vmem:[#allocation3 + $0x378] sm:$0xff]  ;;  %v5879_v6 = vpack.c.bf16 %v324_v52, %v316_v60  ;;  %v5887_v60 = vpack.c.bf16 %v323_v31, %v315_v34  ;;  %v5889_v52 = vpack.c.bf16 %v325_v22, %v317_v30  ;;  %v333_v31 = vld [vmem:[#allocation3 + $0x3b0] sm:$0xff] }
  0xdb   :  { %2548 = vmatprep.subr.bf16.mxu1 %v5170_v7  ;;  %2273 = vmatprep.mubr.bf16.mxu0 %v5867_v27  ;;  %6835 = vst [vmem:[#allocation31_spill] sm:$0xff] %v5877_v9  ;;  %v5179_v61 = vld [vmem:[#allocation6 + $0x18c] ss:$16 sps:$4 sm:$0xff]   ;;  %v5177_v7 = vld [vmem:[#allocation6 + $0x188] ss:$16 sps:$4 sm:$0xff]   ;;  %v341_v34 = vld [vmem:[#allocation3 + $0x3f0] sm:$0xff] }
  0xdc   :  { %2386 = vmatprep.mubr.bf16.mxu1 %v5869_v28  ;;  %v5182_v8 = vld [vmem:[#allocation6 + $0x38c] ss:$16 sps:$4 sm:$0xff]   ;;  %v5180_v27 = vld [vmem:[#allocation6 + $0x388] ss:$16 sps:$4 sm:$0xff]   ;;  %6836 = vst [vmem:[#allocation32_spill] sm:$0xff] %v5879_v6  ;;  %v5881_v28 = vpack.c.bf16 %v326_v62, %v318_v51  ;;  %v5901_v22 = vpack.c.bf16 %v341_v34, %v333_v31 }
  0xdd   :  { %2436 = vmatpush2.bf16.msra.mxu0 %v5165_v10  ;;  %v5185_v10 = vld [vmem:[#allocation6 + $0x16c] ss:$16 sps:$4 sm:$0xff]   ;;  %v5183_v19 = vld [vmem:[#allocation6 + $0x168] ss:$16 sps:$4 sm:$0xff]  }
  0xde   :  { %2549 = vmatpush2.bf16.msra.mxu1 %v5168_v47  ;;  %2437 = vmatprep.subr.bf16.mxu0 %v5173_v29  ;;  %6837 = vst [vmem:[#allocation33_spill] sm:$0xff] %v5881_v28  ;;  %v5188_v47 = vld [vmem:[#allocation6 + $0x36c] ss:$16 sps:$4 sm:$0xff]   ;;  %v5186_v42 = vld [vmem:[#allocation6 + $0x368] ss:$16 sps:$4 sm:$0xff]  }
  0xdf   :  { %2550 = vmatprep.subr.bf16.mxu1 %v5176_v35  ;;  %v332_v29 = vld [vmem:[#allocation3 + $0x3a8] sm:$0xff]  ;;  %v334_v51 = vld [vmem:[#allocation3 + $0x3b8] sm:$0xff] }
  0xe0   :  { %2274 = vmatmul.mubr.bf16.gmra.mxu0 %v5875_v57  ;;  %v340_v35 = vld [vmem:[#allocation3 + $0x3e8] sm:$0xff]  ;;  %v342_v62 = vld [vmem:[#allocation3 + $0x3f8] sm:$0xff]  ;;  %v339_v57 = vld [vmem:[#allocation3 + $0x3e0] sm:$0xff] }
  0xe1   :  { %2387 = vmatmul.mubr.bf16.gmra.mxu1 %v5877_v9  ;;  %2438 = vmatpush2.bf16.msra.mxu0 %v5171_v48  ;;  %v5191_v48 = vld [vmem:[#allocation6 + $0x14c] ss:$16 sps:$4 sm:$0xff]   ;;  %v331_v9 = vld [vmem:[#allocation3 + $0x3a0] sm:$0xff]  ;;  %v5222_v34 = vld [vmem:[#allocation6 + $0x6a8] ss:$16 sps:$4 sm:$0xff]  }
  0xe2   :  { %2551 = vmatpush2.bf16.msra.mxu1 %v5174_v63  ;;  %2439 = vmatprep.subr.bf16.mxu0 %v5179_v61  ;;  %v5194_v61 = vld [vmem:[#allocation6 + $0x34c] ss:$16 sps:$4 sm:$0xff]   ;;  %v5189_v63 = vld [vmem:[#allocation6 + $0x148] ss:$16 sps:$4 sm:$0xff]   ;;  %v5899_v30 = vpack.c.bf16 %v339_v57, %v331_v9 }
  0xe3   :  { %2552 = vmatprep.subr.bf16.mxu1 %v5182_v8  ;;  %2283 = vmatprep.mubr.bf16.mxu0 %v5879_v6  ;;  %v5192_v8 = vld [vmem:[#allocation6 + $0x348] ss:$16 sps:$4 sm:$0xff]   ;;  %v5891_v6 = vpack.c.bf16 %v340_v35, %v332_v29  ;;  %v5203_v29 = vld [vmem:[#allocation6 + $0x10c] ss:$16 sps:$4 sm:$0xff]  }
  0xe4   :  { %2396 = vmatprep.mubr.bf16.mxu1 %v5881_v28  ;;  %v5893_v28 = vpack.c.bf16 %v342_v62, %v334_v51  ;;  %v5204_v35 = vld [vmem:[#allocation6 + $0x308] ss:$16 sps:$4 sm:$0xff]   ;;  %v5209_v9 = vld [vmem:[#allocation6 + $0x4ec] ss:$16 sps:$4 sm:$0xff]  }
  0xe5   :  { %2440 = vmatpush2.bf16.msra.mxu0 %v5177_v7  ;;  %v5200_v7 = vld [vmem:[#allocation6 + $0x32c] ss:$16 sps:$4 sm:$0xff]   ;;  %v5207_v51 = vld [vmem:[#allocation6 + $0x4e8] ss:$16 sps:$4 sm:$0xff]  }
  0xe6   :  { %2553 = vmatpush2.bf16.msra.mxu1 %v5180_v27  ;;  %2441 = vmatprep.subr.bf16.mxu0 %v5185_v10  ;;  %v5197_v27 = vld [vmem:[#allocation6 + $0x12c] ss:$16 sps:$4 sm:$0xff]   ;;  %v5195_v10 = vld [vmem:[#allocation6 + $0x128] ss:$16 sps:$4 sm:$0xff]  }
  0xe7   :  { %2554 = vmatprep.subr.bf16.mxu1 %v5188_v47  ;;  %v5198_v47 = vld [vmem:[#allocation6 + $0x328] ss:$16 sps:$4 sm:$0xff]   ;;  %v5212_v57 = vld [vmem:[#allocation6 + $0x6ec] ss:$16 sps:$4 sm:$0xff]  }
  0xe8   :  { %2284 = vmatmul.mubr.bf16.gmra.mxu0 %v5887_v60  ;;  %v5210_v62 = vld [vmem:[#allocation6 + $0x6e8] ss:$16 sps:$4 sm:$0xff]   ;;  %v5221_v31 = vld [vmem:[#allocation6 + $0x4ac] ss:$16 sps:$4 sm:$0xff]  }
  0xe9   :  { %2397 = vmatmul.mubr.bf16.gmra.mxu1 %v5889_v52  ;;  %2442 = vmatpush2.bf16.msra.mxu0 %v5183_v19  ;;  %v5206_v19 = vld [vmem:[#allocation6 + $0x30c] ss:$16 sps:$4 sm:$0xff]  }
  0xea   :  { %2555 = vmatpush2.bf16.msra.mxu1 %v5186_v42  ;;  %2443 = vmatprep.subr.bf16.mxu0 %v5191_v48  ;;  %v5201_v42 = vld [vmem:[#allocation6 + $0x108] ss:$16 sps:$4 sm:$0xff]   ;;  %v5215_v48 = vld [vmem:[#allocation6 + $0x4cc] ss:$16 sps:$4 sm:$0xff]  }
  0xeb   :  { %2556 = vmatprep.subr.bf16.mxu1 %v5194_v61  ;;  %2293 = vmatprep.mubr.bf16.mxu0 %v5891_v6  ;;  %v5218_v61 = vld [vmem:[#allocation6 + $0x6cc] ss:$16 sps:$4 sm:$0xff]  }
  0xec   :  { %2406 = vmatprep.mubr.bf16.mxu1 %v5893_v28 }
  0xed   :  { %2444 = vmatpush2.bf16.msra.mxu0 %v5189_v63  ;;  %v5213_v63 = vld [vmem:[#allocation6 + $0x4c8] ss:$16 sps:$4 sm:$0xff]  }
  0xee   :  { %2557 = vmatpush2.bf16.msra.mxu1 %v5192_v8  ;;  %2445 = vmatprep.subr.bf16.mxu0 %v5197_v27  ;;  %v5216_v8 = vld [vmem:[#allocation6 + $0x6c8] ss:$16 sps:$4 sm:$0xff]   ;;  %v5227_v27 = vld [vmem:[#allocation6 + $0x48c] ss:$16 sps:$4 sm:$0xff]  }
  0xef   :  { %2558 = vmatprep.subr.bf16.mxu1 %v5200_v7  ;;  %v5228_v7 = vld [vmem:[#allocation6 + $0x688] ss:$16 sps:$4 sm:$0xff]  }
  0xf0   :  { %2294 = vmatmul.mubr.bf16.gmra.mxu0 %v5899_v30 }
  0xf1   :  { %2407 = vmatmul.mubr.bf16.gmra.mxu1 %v5901_v22  ;;  %2446 = vmatpush2.bf16.msra.mxu0 %v5195_v10  ;;  %v5233_v10 = vld [vmem:[#allocation6 + $0x46c] ss:$16 sps:$4 sm:$0xff]  }
  0xf2   :  { %2559 = vmatpush2.bf16.msra.mxu1 %v5198_v47  ;;  %2447 = vmatprep.subr.bf16.mxu0 %v5203_v29  ;;  %v5234_v47 = vld [vmem:[#allocation6 + $0x668] ss:$16 sps:$4 sm:$0xff]   ;;  %v5239_v29 = vld [vmem:[#allocation6 + $0x44c] ss:$16 sps:$4 sm:$0xff]  }
  0xf3   :  { %2560 = vmatprep.subr.bf16.mxu1 %v5206_v19  ;;  %2449 = vmatprep.mubr.bf16.mxu0 %v5713_v53  ;;  %v5224_v53 = vld [vmem:[#allocation6 + $0x6ac] ss:$16 sps:$4 sm:$0xff]   ;;  %v5240_v19 = vld [vmem:[#allocation6 + $0x648] ss:$16 sps:$4 sm:$0xff]  }
  0xf4   :  { %2562 = vmatprep.mubr.bf16.mxu1 %v5715_v54  ;;  %v5219_v54 = vld [vmem:[#allocation6 + $0x4a8] ss:$16 sps:$4 sm:$0xff]  }
  0xf5   :  { %2448 = vmatpush2.bf16.msra.mxu0 %v5201_v42  ;;  %v5243_v42 = vld [vmem:[#allocation6 + $0x428] ss:$16 sps:$4 sm:$0xff]  }
  0xf6   :  { %2561 = vmatpush2.bf16.msra.mxu1 %v5204_v35  ;;  %2643 = vmatprep.subr.bf16.mxu0 %v5209_v9  ;;  %v5246_v35 = vld [vmem:[#allocation6 + $0x628] ss:$16 sps:$4 sm:$0xff]  }
  0xf7   :  { %2756 = vmatprep.subr.bf16.mxu1 %v5212_v57  ;;  %v5249_v9 = vld [vmem:[#allocation6 + $0x408] ss:$16 sps:$4 sm:$0xff]  }
  0xf8   :  { %2450 = vmatmul.mubr.bf16.vlgmr.msra.gmra.mxu0 %v5719_v16  ;;  %v5230_v16 = vld [vmem:[#allocation6 + $0x68c] ss:$16 sps:$4 sm:$0xff]   ;;  %v5252_v57 = vld [vmem:[#allocation6 + $0x608] ss:$16 sps:$4 sm:$0xff]  }
  0xf9   :  { %2563 = vmatmul.mubr.bf16.vlgmr.msra.gmra.mxu1 %v5721_v17  ;;  %2644 = vmatpush1.bf16.msra.mxu0 %v5207_v51  ;;  %v5225_v17 = vld [vmem:[#allocation6 + $0x488] ss:$16 sps:$4 sm:$0xff]  }
  0xfa   :  { %2757 = vmatpush1.bf16.msra.mxu1 %v5210_v62  ;;  %2645 = vmatprep.subr.bf16.mxu0 %v5215_v48  ;;  %v5255_v51 = vld [vmem:[#allocation6 + $0x5e8] ss:$16 sps:$4 sm:$0xff]  }
  0xfb   :  { %2758 = vmatprep.subr.bf16.mxu1 %v5218_v61  ;;  %2459 = vmatprep.mubr.bf16.mxu0 %v5723_v23  ;;  %v5236_v23 = vld [vmem:[#allocation6 + $0x66c] ss:$16 sps:$4 sm:$0xff]   ;;  %v5258_v62 = vld [vmem:[#allocation6 + $0x7e8] ss:$16 sps:$4 sm:$0xff]  }
  0xfc   :  { %2572 = vmatprep.mubr.bf16.mxu1 %v5725_v24  ;;  %v5231_v24 = vld [vmem:[#allocation6 + $0x468] ss:$16 sps:$4 sm:$0xff]  }
  0xfd   :  { %2646 = vmatpush1.bf16.msra.mxu0 %v5213_v63  ;;  %v5261_v48 = vld [vmem:[#allocation6 + $0x5c8] ss:$16 sps:$4 sm:$0xff]  }
  0xfe   :  { %2759 = vmatpush1.bf16.msra.mxu1 %v5216_v8  ;;  %2647 = vmatprep.subr.bf16.mxu0 %v5221_v31  ;;  %v5264_v61 = vld [vmem:[#allocation6 + $0x7c8] ss:$16 sps:$4 sm:$0xff]  }
  0xff   :  { %2760 = vmatprep.subr.bf16.mxu1 %v5224_v53  ;;  %v5267_v63 = vld [vmem:[#allocation6 + $0x5a8] ss:$16 sps:$4 sm:$0xff]  }
 0x100   :  { %2460 = vmatmul.mubr.bf16.gmra.mxu0 %v5731_v36  ;;  %v5242_v36 = vld [vmem:[#allocation6 + $0x64c] ss:$16 sps:$4 sm:$0xff]   ;;  %v5270_v8 = vld [vmem:[#allocation6 + $0x7a8] ss:$16 sps:$4 sm:$0xff]  }
 0x101   :  { %2573 = vmatmul.mubr.bf16.gmra.mxu1 %v5733_v37  ;;  %2648 = vmatpush1.bf16.msra.mxu0 %v5219_v54  ;;  %v5237_v37 = vld [vmem:[#allocation6 + $0x448] ss:$16 sps:$4 sm:$0xff]   ;;  %v5281_v54 = vld [vmem:[#allocation6 + $0x56c] ss:$16 sps:$4 sm:$0xff]  }
 0x102   :  { %2761 = vmatpush1.bf16.msra.mxu1 %v5222_v34  ;;  %2649 = vmatprep.subr.bf16.mxu0 %v5227_v27  ;;  %v5273_v31 = vld [vmem:[#allocation6 + $0x588] ss:$16 sps:$4 sm:$0xff]   ;;  %v5284_v34 = vld [vmem:[#allocation6 + $0x76c] ss:$16 sps:$4 sm:$0xff]  }
 0x103   :  { %2762 = vmatprep.subr.bf16.mxu1 %v5230_v16  ;;  %2469 = vmatprep.mubr.bf16.mxu0 %v5735_v43  ;;  %v5245_v43 = vld [vmem:[#allocation6 + $0x42c] ss:$16 sps:$4 sm:$0xff]   ;;  %v5276_v53 = vld [vmem:[#allocation6 + $0x788] ss:$16 sps:$4 sm:$0xff]  }
 0x104   :  { %2582 = vmatprep.mubr.bf16.mxu1 %v5737_v44  ;;  %v5248_v44 = vld [vmem:[#allocation6 + $0x62c] ss:$16 sps:$4 sm:$0xff]  }
 0x105   :  { %2650 = vmatpush1.bf16.msra.mxu0 %v5225_v17  ;;  %v5287_v27 = vld [vmem:[#allocation6 + $0x54c] ss:$16 sps:$4 sm:$0xff]  }
 0x106   :  { %2763 = vmatpush1.bf16.msra.mxu1 %v5228_v7  ;;  %2651 = vmatprep.subr.bf16.mxu0 %v5233_v10  ;;  %v5290_v16 = vld [vmem:[#allocation6 + $0x74c] ss:$16 sps:$4 sm:$0xff]   ;;  %v5294_v10 = vld [vmem:[#allocation6 + $0x728] ss:$16 sps:$4 sm:$0xff]  }
 0x107   :  { %2764 = vmatprep.subr.bf16.mxu1 %v5236_v23  ;;  %v5293_v17 = vld [vmem:[#allocation6 + $0x52c] ss:$16 sps:$4 sm:$0xff]  }
 0x108   :  { %2470 = vmatmul.mubr.bf16.gmra.mxu0 %v5743_v58  ;;  %v5251_v58 = vld [vmem:[#allocation6 + $0x40c] ss:$16 sps:$4 sm:$0xff]  }
 0x109   :  { %2583 = vmatmul.mubr.bf16.gmra.mxu1 %v5745_v59  ;;  %2652 = vmatpush1.bf16.msra.mxu0 %v5231_v24  ;;  %v5254_v59 = vld [vmem:[#allocation6 + $0x60c] ss:$16 sps:$4 sm:$0xff]  }
 0x10a   :  { %2765 = vmatpush1.bf16.msra.mxu1 %v5234_v47  ;;  %2653 = vmatprep.subr.bf16.mxu0 %v5239_v29  ;;  %v5296_v7 = vld [vmem:[#allocation6 + $0x72c] ss:$16 sps:$4 sm:$0xff]   ;;  %v5300_v47 = vld [vmem:[#allocation6 + $0x708] ss:$16 sps:$4 sm:$0xff]  }
 0x10b   :  { %2766 = vmatprep.subr.bf16.mxu1 %v5242_v36  ;;  %2479 = vmatprep.mubr.bf16.mxu0 %v5747_v1  ;;  %v5257_v1 = vld [vmem:[#allocation6 + $0x5ec] ss:$16 sps:$4 sm:$0xff]   ;;  %v5303_v36 = vld [vmem:[#allocation8 + $0x70] ss:$8 sps:$4 sm:$0xff]  }
 0x10c   :  { %2592 = vmatprep.mubr.bf16.mxu1 %v5749_v2  ;;  %v5260_v2 = vld [vmem:[#allocation6 + $0x7ec] ss:$16 sps:$4 sm:$0xff]  }
 0x10d   :  { %2654 = vmatpush1.bf16.msra.mxu0 %v5237_v37  ;;  %v5299_v23 = vld [vmem:[#allocation6 + $0x50c] ss:$16 sps:$4 sm:$0xff]  }
 0x10e   :  { %2767 = vmatpush1.bf16.msra.mxu1 %v5240_v19  ;;  %2655 = vmatprep.subr.bf16.mxu0 %v5245_v43  ;;  %v5302_v24 = vld [vmem:[#allocation6 + $0x70c] ss:$16 sps:$4 sm:$0xff]  }
 0x10f   :  { %2768 = vmatprep.subr.bf16.mxu1 %v5248_v44  ;;  %v5308_v19 = vld [vmem:[#allocation8 + $0x64] ss:$8 sps:$4 sm:$0xff]  }
 0x110   :  { %2480 = vmatmul.mubr.bf16.gmra.mxu0 %v5755_v14  ;;  %v5263_v14 = vld [vmem:[#allocation6 + $0x5cc] ss:$16 sps:$4 sm:$0xff]  }
 0x111   :  { %2593 = vmatmul.mubr.bf16.gmra.mxu1 %v5757_v15  ;;  %2656 = vmatpush1.bf16.msra.mxu0 %v5243_v42  ;;  %v5266_v15 = vld [vmem:[#allocation6 + $0x7cc] ss:$16 sps:$4 sm:$0xff]  }
 0x112   :  { %2769 = vmatpush1.bf16.msra.mxu1 %v5246_v35  ;;  %2657 = vmatprep.subr.bf16.mxu0 %v5251_v58  ;;  %v5306_v35 = vld [vmem:[#allocation8 + $0x60] ss:$8 sps:$4 sm:$0xff]  }
 0x113   :  { %2770 = vmatprep.subr.bf16.mxu1 %v5254_v59  ;;  %2489 = vmatprep.mubr.bf16.mxu0 %v5759_v25  ;;  %v5269_v25 = vld [vmem:[#allocation6 + $0x5ac] ss:$16 sps:$4 sm:$0xff]  }
 0x114   :  { %2602 = vmatprep.mubr.bf16.mxu1 %v5761_v26  ;;  %v5272_v26 = vld [vmem:[#allocation6 + $0x7ac] ss:$16 sps:$4 sm:$0xff]  }
 0x115   :  { %2658 = vmatpush1.bf16.msra.mxu0 %v5249_v9  ;;  %v5311_v9 = vld [vmem:[#allocation8 + $0x54] ss:$8 sps:$4 sm:$0xff]  }
 0x116   :  { %2771 = vmatpush1.bf16.msra.mxu1 %v5252_v57  ;;  %2659 = vmatprep.subr.bf16.mxu0 %v5257_v1 }
 0x117   :  { %2772 = vmatprep.subr.bf16.mxu1 %v5260_v2  ;;  %v5314_v2 = vld [vmem:[#allocation8 + $0x44] ss:$8 sps:$4 sm:$0xff]  }
 0x118   :  { %2490 = vmatmul.mubr.bf16.gmra.mxu0 %v5767_v40  ;;  %v5275_v40 = vld [vmem:[#allocation6 + $0x58c] ss:$16 sps:$4 sm:$0xff]  }
 0x119   :  { %2603 = vmatmul.mubr.bf16.gmra.mxu1 %v5769_v41  ;;  %2660 = vmatpush2.bf16.msra.mxu0 %v5255_v51  ;;  %v5278_v41 = vld [vmem:[#allocation6 + $0x78c] ss:$16 sps:$4 sm:$0xff]  }
 0x11a   :  { %2773 = vmatpush2.bf16.msra.mxu1 %v5258_v62  ;;  %2661 = vmatprep.subr.bf16.mxu0 %v5263_v14 }
 0x11b   :  { %2774 = vmatprep.subr.bf16.mxu1 %v5266_v15  ;;  %2499 = vmatprep.mubr.bf16.mxu0 %v5771_v49  ;;  %v5279_v49 = vld [vmem:[#allocation6 + $0x568] ss:$16 sps:$4 sm:$0xff]   ;;  %v6842_v15 = vld [vmem:[#allocation16_spill] sm:$0xff] }
 0x11c   :  { %2612 = vmatprep.mubr.bf16.mxu1 %v5773_v50  ;;  %v5282_v50 = vld [vmem:[#allocation6 + $0x768] ss:$16 sps:$4 sm:$0xff]  }
 0x11d   :  { %2662 = vmatpush2.bf16.msra.mxu0 %v5261_v48  ;;  %v6843_v48 = vld [vmem:[#allocation17_spill] sm:$0xff] }
 0x11e   :  { %2775 = vmatpush2.bf16.msra.mxu1 %v5264_v61  ;;  %2663 = vmatprep.subr.bf16.mxu0 %v5269_v25 }
 0x11f   :  { %2776 = vmatprep.subr.bf16.mxu1 %v5272_v26  ;;  %v5312_v26 = vld [vmem:[#allocation8 + $0x40] ss:$8 sps:$4 sm:$0xff]  }
 0x120   :  { %2500 = vmatmul.mubr.bf16.gmra.mxu0 %v5779_v4  ;;  %v5285_v4 = vld [vmem:[#allocation6 + $0x548] ss:$16 sps:$4 sm:$0xff]  }
 0x121   :  { %2613 = vmatmul.mubr.bf16.gmra.mxu1 %v5781_v5  ;;  %2664 = vmatpush2.bf16.msra.mxu0 %v5267_v63  ;;  %v5288_v5 = vld [vmem:[#allocation6 + $0x748] ss:$16 sps:$4 sm:$0xff]  }
 0x122   :  { %2777 = vmatpush2.bf16.msra.mxu1 %v5270_v8  ;;  %2665 = vmatprep.subr.bf16.mxu0 %v5275_v40  ;;  %v5317_v40 = vld [vmem:[#allocation8 + $0x34] ss:$8 sps:$4 sm:$0xff]  }
 0x123   :  { %2778 = vmatprep.subr.bf16.mxu1 %v5278_v41  ;;  %2509 = vmatprep.mubr.bf16.mxu0 %v5783_v11  ;;  %v6812_v11 = vlaneseq }
 0x124   :  { %2622 = vmatprep.mubr.bf16.mxu1 %v5785_v12  ;;  %v5291_v12 = vld [vmem:[#allocation6 + $0x528] ss:$16 sps:$4 sm:$0xff]  }
 0x125   :  { %2666 = vmatpush2.bf16.msra.mxu0 %v5273_v31 }
 0x126   :  { %2779 = vmatpush2.bf16.msra.mxu1 %v5276_v53  ;;  %2667 = vmatprep.subr.bf16.mxu0 %v5281_v54  ;;  %v5315_v54 = vld [vmem:[#allocation8 + $0x30] ss:$8 sps:$4 sm:$0xff]  }
 0x127   :  { %2780 = vmatprep.subr.bf16.mxu1 %v5284_v34  ;;  %v5353_v34 = vld [vmem:[#allocation8 + $0x174] ss:$8 sps:$4 sm:$0xff]  }
 0x128   :  { %2510 = vmatmul.mubr.bf16.gmra.mxu0 %v5791_v32  ;;  %v5936_v32 = vshrl.u32 %v6812_v11, 7 }
 0x129   :  { %2623 = vmatmul.mubr.bf16.gmra.mxu1 %v5793_v33  ;;  %2668 = vmatpush2.bf16.msra.mxu0 %v5279_v49  ;;  %v5297_v33 = vld [vmem:[#allocation6 + $0x508] ss:$16 sps:$4 sm:$0xff]   ;;  %v5320_v49 = vld [vmem:[#allocation8 + $0x24] ss:$8 sps:$4 sm:$0xff]  }
 0x12a   :  { %2781 = vmatpush2.bf16.msra.mxu1 %v5282_v50  ;;  %2669 = vmatprep.subr.bf16.mxu0 %v5287_v27  ;;  %6838 = vst [vmem:[#allocation34_spill] sm:$0xff] %v5936_v32  ;;  %v5946_v29 = vsub.s32 0, %v5936_v32  ;;  %v5351_v50 = vld [vmem:[#allocation8 + $0x170] ss:$8 sps:$4 sm:$0xff]  }
 0x12b   :  { %2782 = vmatprep.subr.bf16.mxu1 %v5290_v16  ;;  %2519 = vmatprep.mubr.bf16.mxu0 %v5795_v45  ;;  %v5943_v45 = vld [vmem:[%s6785_s4] sm:$0xf] }
 0x12c   :  { %2632 = vmatprep.mubr.bf16.mxu1 %v5797_v46  ;;  %6839 = vst [vmem:[#allocation35_spill] sm:$0xff] %v5943_v45  ;;  %v5305_v46 = vld [vmem:[#allocation8 + $0x74] ss:$8 sps:$4 sm:$0xff]   ;;  %6840 = vst [vmem:[#allocation36_spill] sm:$0xff] %v5946_v29 }
 0x12d   :  { %2670 = vmatpush2.bf16.msra.mxu0 %v5285_v4  ;;  %v6844_v4 = vld [vmem:[#allocation18_spill] sm:$0xff] }
 0x12e   :  { %2783 = vmatpush2.bf16.msra.mxu1 %v5288_v5  ;;  %2671 = vmatprep.subr.bf16.mxu0 %v5293_v17  ;;  %v6845_v5 = vld [vmem:[#allocation19_spill] sm:$0xff] }
 0x12f   :  { %2784 = vmatprep.subr.bf16.mxu1 %v5296_v7  ;;  %v6846_v7 = vld [vmem:[#allocation20_spill] sm:$0xff] }
 0x130   :  { %2520 = vmatmul.mubr.bf16.gmra.mxu0 %v5803_v0  ;;  %v5951_v0 = vsub.s32 1, %v5936_v32 }
 0x131   :  { %2633 = vmatmul.mubr.bf16.gmra.mxu1 %v5805_v3  ;;  %2672 = vmatpush2.bf16.msra.mxu0 %v5291_v12  ;;  %v5955_v3 = vrot.slane %v5943_v45, %v5946_v29  ;;  %v6847_v12 = vld [vmem:[#allocation21_spill] sm:$0xff] }
 0x132   :  { %2785 = vmatpush2.bf16.msra.mxu1 %v5294_v10  ;;  %2673 = vmatprep.subr.bf16.mxu0 %v5299_v23  ;;  %6841 = vst [vmem:[#allocation37_spill] sm:$0xff] %v5951_v0  ;;  %v5959_v37 = vrot.slane %v5943_v45, %v5951_v0 }
 0x133   :  { %2786 = vmatprep.subr.bf16.mxu1 %v5302_v24  ;;  %2675 = vmatprep.mubr.bf16.mxu0 %v5807_v13  ;;  %v5318_v24 = vld [vmem:[#allocation8 + $0x20] ss:$8 sps:$4 sm:$0xff]  }
 0x134   :  { %2788 = vmatprep.mubr.bf16.mxu1 %v5809_v18 }
 0x135   :  { %2674 = vmatpush2.bf16.msra.mxu0 %v5297_v33  ;;  %v5356_v33 = vld [vmem:[#allocation8 + $0x164] ss:$8 sps:$4 sm:$0xff]  }
 0x136   :  { %2787 = vmatpush2.bf16.msra.mxu1 %v5300_v47  ;;  %3361 = vmatprep.subr.bf16.mxu0 %v5305_v46 }
 0x137   :  { %3474 = vmatprep.subr.bf16.mxu1 %v5353_v34 }
 0x138   :  { %v1999_v43 = vpop.f32.mrf.mxu0  ;;  %2676 = vmatmul.mubr.bf16.vlgmr.msra.gmra.mxu0 %v5815_v38 }
 0x139   :  { %v2112_v13 = vpop.f32.mrf.mxu1  ;;  %2789 = vmatmul.mubr.bf16.vlgmr.msra.gmra.mxu1 %v5817_v39  ;;  %v2000_v18 = vadd.f32 %v1999_v43, %v5955_v3  ;;  %2685 = vmatprep.mubr.bf16.mxu0 %v5819_v55 }
 0x13a   :  { %2798 = vmatprep.mubr.bf16.mxu1 %v5821_v56  ;;  %v2001_v44 = vpop.f32.mrf.mxu0  ;;  %3362 = vmatpush1.bf16.msra.mxu0 %v5303_v36  ;;  %v5309_v56 = vld [vmem:[#allocation8 + $0x50] ss:$8 sps:$4 sm:$0xff]   ;;  %v5323_v36 = vld [vmem:[#allocation8 + $0x14] ss:$8 sps:$4 sm:$0xff]  }
 0x13b   :  { %v2114_v42 = vpop.f32.mrf.mxu1  ;;  %v5966_v58 = vadd.f32 %v2112_v13, %v2000_v18  ;;  %v2002_v59 = vadd.f32 %v2001_v44, %v5959_v37  ;;  %3363 = vmatprep.subr.bf16.mxu0 %v5308_v19  ;;  %3475 = vmatpush1.bf16.msra.mxu1 %v5351_v50  ;;  %v5354_v19 = vld [vmem:[#allocation8 + $0x160] ss:$8 sps:$4 sm:$0xff]  }
 0x13c   :  { %v5969_v57 = vpop.f32.mrf.mxu0  ;;  %3476 = vmatprep.subr.bf16.mxu1 %v5356_v33  ;;  %v5360_v50 = vld [vmem:[#allocation8 + $0x140] ss:$8 sps:$4 sm:$0xff]  }
 0x13d   :  { %v5971_v38 = vpop.f32.mrf.mxu1  ;;  %v5973_v39 = vadd.f32 %v2114_v42, %v2002_v59  ;;  %v5359_v59 = vld [vmem:[#allocation8 + $0x154] ss:$8 sps:$4 sm:$0xff]  }
 0x13e   :  { %v5975_v1 = vpop.f32.mrf.mxu0  ;;  %3364 = vmatpush1.bf16.msra.mxu0 %v5306_v35  ;;  %v5321_v35 = vld [vmem:[#allocation8 + $0x10] ss:$8 sps:$4 sm:$0xff]  }
 0x13f   :  { %v5977_v55 = vpop.f32.mrf.mxu1  ;;  %3365 = vmatprep.subr.bf16.mxu0 %v5311_v9  ;;  %v5326_v9 = vld [vmem:[#allocation8 + $0x4] ss:$8 sps:$4 sm:$0xff]   ;;  %3477 = vmatpush1.bf16.msra.mxu1 %v5354_v19 }
 0x140   :  { %v2009_v51 = vpop.f32.mrf.mxu0  ;;  %2686 = vmatmul.mubr.bf16.gmra.mxu0 %v5827_v20  ;;  %3478 = vmatprep.subr.bf16.mxu1 %v5359_v59  ;;  %v6855_v59 = vld [vmem:[#allocation29_spill] sm:$0xff] }
 0x141   :  { %v2122_v62 = vpop.f32.mrf.mxu1  ;;  %2799 = vmatmul.mubr.bf16.gmra.mxu1 %v5829_v21  ;;  %v2010_v14 = vadd.f32 %v2009_v51, %v5955_v3  ;;  %2695 = vmatprep.mubr.bf16.mxu0 %v6842_v15 }
 0x142   :  { %2808 = vmatprep.mubr.bf16.mxu1 %v6843_v48  ;;  %v2011_v61 = vpop.f32.mrf.mxu0  ;;  %3366 = vmatpush1.bf16.msra.mxu0 %v5309_v56  ;;  %v5357_v56 = vld [vmem:[#allocation8 + $0x150] ss:$8 sps:$4 sm:$0xff]   ;;  %v6850_v48 = vld [vmem:[#allocation24_spill] sm:$0xff] }
 0x143   :  { %v2124_v25 = vpop.f32.mrf.mxu1  ;;  %v5984_v63 = vadd.f32 %v2122_v62, %v2010_v14  ;;  %v2012_v8 = vadd.f32 %v2011_v61, %v5959_v37  ;;  %3367 = vmatprep.subr.bf16.mxu0 %v5314_v2  ;;  %v6848_v62 = vld [vmem:[#allocation22_spill] sm:$0xff]  ;;  %v6849_v14 = vld [vmem:[#allocation23_spill] sm:$0xff]  ;;  %v6851_v61 = vld [vmem:[#allocation25_spill] sm:$0xff]  ;;  %3479 = vmatpush1.bf16.msra.mxu1 %v5357_v56 }
 0x144   :  { %v5987_v41 = vpop.f32.mrf.mxu0 }
 0x145   :  { %v5989_v20 = vpop.f32.mrf.mxu1  ;;  %v5991_v21 = vadd.f32 %v2124_v25, %v2012_v8  ;;  %v5324_v8 = vld [vmem:[#allocation8] ss:$8 sps:$4 sm:$0xff]   ;;  %v2014_v32 = vadd.f32 %v5987_v41, %v5955_v3 }
 0x146   :  { %v5993_v31 = vpop.f32.mrf.mxu0  ;;  %3368 = vmatpush1.bf16.msra.mxu0 %v5312_v26 }
 0x147   :  { %v5995_v53 = vpop.f32.mrf.mxu1  ;;  %3369 = vmatprep.subr.bf16.mxu0 %v5317_v40  ;;  %v5362_v40 = vld [vmem:[#allocation8 + $0x144] ss:$8 sps:$4 sm:$0xff]  }
 0x148   :  { %v2019_v27 = vpop.f32.mrf.mxu0  ;;  %2696 = vmatmul.mubr.bf16.gmra.mxu0 %v6844_v4  ;;  %3480 = vmatprep.subr.bf16.mxu1 %v5362_v40 }
 0x149   :  { %v2132_v16 = vpop.f32.mrf.mxu1  ;;  %2809 = vmatmul.mubr.bf16.gmra.mxu1 %v6845_v5  ;;  %v2020_v17 = vadd.f32 %v2019_v27, %v5955_v3  ;;  %2705 = vmatprep.mubr.bf16.mxu0 %v6846_v7  ;;  %v5327_v7 = vld [vmem:[#allocation8 + $0xf0] ss:$8 sps:$4 sm:$0xff]  }
 0x14a   :  { %2818 = vmatprep.mubr.bf16.mxu1 %v6847_v12  ;;  %v2021_v10 = vpop.f32.mrf.mxu0  ;;  %3370 = vmatpush1.bf16.msra.mxu0 %v5315_v54  ;;  %v5365_v12 = vld [vmem:[#allocation8 + $0x134] ss:$8 sps:$4 sm:$0xff]  }
 0x14b   :  { %v2134_v23 = vpop.f32.mrf.mxu1  ;;  %v6002_v47 = vadd.f32 %v2132_v16, %v2020_v17  ;;  %v2022_v46 = vadd.f32 %v2021_v10, %v5959_v37  ;;  %3371 = vmatprep.subr.bf16.mxu0 %v5320_v49  ;;  %v5329_v49 = vld [vmem:[#allocation8 + $0xf4] ss:$8 sps:$4 sm:$0xff]   ;;  %v5332_v10 = vld [vmem:[#allocation8 + $0xe4] ss:$8 sps:$4 sm:$0xff]   ;;  %3481 = vmatpush1.bf16.msra.mxu1 %v5360_v50 }
 0x14c   :  { %v6005_v43 = vpop.f32.mrf.mxu0  ;;  %3482 = vmatprep.subr.bf16.mxu1 %v5365_v12  ;;  %v5338_v50 = vld [vmem:[#allocation8 + $0xc4] ss:$8 sps:$4 sm:$0xff]  }
 0x14d   :  { %v6007_v13 = vpop.f32.mrf.mxu1  ;;  %v6009_v18 = vadd.f32 %v2134_v23, %v2022_v46  ;;  %v5363_v23 = vld [vmem:[#allocation8 + $0x130] ss:$8 sps:$4 sm:$0xff]  }
 0x14e   :  { %v6011_v44 = vpop.f32.mrf.mxu0  ;;  %3372 = vmatpush1.bf16.msra.mxu0 %v5318_v24  ;;  %v6852_v46 = vld [vmem:[#allocation26_spill] sm:$0xff] }
 0x14f   :  { %v6013_v42 = vpop.f32.mrf.mxu1  ;;  %3373 = vmatprep.subr.bf16.mxu0 %v5323_v36  ;;  %v6853_v36 = vld [vmem:[#allocation27_spill] sm:$0xff]  ;;  %3483 = vmatpush1.bf16.msra.mxu1 %v5363_v23  ;;  %v6856_v23 = vld [vmem:[#allocation30_spill] sm:$0xff] }
 0x150   :  { %v2029_v2 = vpop.f32.mrf.mxu0  ;;  %2706 = vmatmul.mubr.bf16.gmra.mxu0 %v6848_v62 }
 0x151   :  { %v2142_v51 = vpop.f32.mrf.mxu1  ;;  %2819 = vmatmul.mubr.bf16.gmra.mxu1 %v6849_v14  ;;  %v2030_v15 = vadd.f32 %v2029_v2, %v5955_v3  ;;  %2715 = vmatprep.mubr.bf16.mxu0 %v6850_v48  ;;  %v5330_v2 = vld [vmem:[#allocation8 + $0xe0] ss:$8 sps:$4 sm:$0xff]  }
 0x152   :  { %2828 = vmatprep.mubr.bf16.mxu1 %v6851_v61  ;;  %v2031_v25 = vpop.f32.mrf.mxu0  ;;  %3374 = vmatpush1.bf16.msra.mxu0 %v5321_v35  ;;  %v6854_v35 = vld [vmem:[#allocation28_spill] sm:$0xff] }
 0x153   :  { %v2144_v26 = vpop.f32.mrf.mxu1  ;;  %v6020_v54 = vadd.f32 %v2142_v51, %v2030_v15  ;;  %v2032_v34 = vadd.f32 %v2031_v25, %v5959_v37  ;;  %3375 = vmatprep.subr.bf16.mxu0 %v5326_v9  ;;  %v5368_v51 = vld [vmem:[#allocation8 + $0x124] ss:$8 sps:$4 sm:$0xff]   ;;  %v5335_v15 = vld [vmem:[#allocation8 + $0xd4] ss:$8 sps:$4 sm:$0xff]   ;;  %v5366_v48 = vld [vmem:[#allocation8 + $0x120] ss:$8 sps:$4 sm:$0xff]  }
 0x154   :  { %v6023_v27 = vpop.f32.mrf.mxu0  ;;  %3484 = vmatprep.subr.bf16.mxu1 %v5368_v51  ;;  %v5341_v51 = vld [vmem:[#allocation8 + $0xb4] ss:$8 sps:$4 sm:$0xff]  }
 0x155   :  { %v6025_v16 = vpop.f32.mrf.mxu1  ;;  %v6027_v4 = vadd.f32 %v2144_v26, %v2032_v34  ;;  %v5333_v34 = vld [vmem:[#allocation8 + $0xd0] ss:$8 sps:$4 sm:$0xff]   ;;  %3485 = vmatpush1.bf16.msra.mxu1 %v5366_v48 }
 0x156   :  { %v6029_v5 = vpop.f32.mrf.mxu0  ;;  %3376 = vmatpush1.bf16.msra.mxu0 %v5324_v8 }
 0x157   :  { %v6031_v17 = vpop.f32.mrf.mxu1  ;;  %3377 = vmatprep.subr.bf16.mxu0 %v5329_v49  ;;  %v5371_v49 = vld [vmem:[#allocation8 + $0x114] ss:$8 sps:$4 sm:$0xff]  }
 0x158   :  { %v2039_v24 = vpop.f32.mrf.mxu0  ;;  %2716 = vmatmul.mubr.bf16.gmra.mxu0 %v6852_v46  ;;  %v6858_v46 = vld [vmem:[#allocation32_spill] sm:$0xff]  ;;  %3486 = vmatprep.subr.bf16.mxu1 %v5371_v49  ;;  %v5339_v49 = vld [vmem:[#allocation8 + $0xb0] ss:$8 sps:$4 sm:$0xff]  }
 0x159   :  { %v2152_v33 = vpop.f32.mrf.mxu1  ;;  %2829 = vmatmul.mubr.bf16.gmra.mxu1 %v6853_v36  ;;  %v2040_v19 = vadd.f32 %v2039_v24, %v5955_v3  ;;  %2725 = vmatprep.mubr.bf16.mxu0 %v6854_v35  ;;  %v6857_v24 = vld [vmem:[#allocation31_spill] sm:$0xff]  ;;  %v6859_v36 = vld [vmem:[#allocation33_spill] sm:$0xff] }
 0x15a   :  { %2838 = vmatprep.mubr.bf16.mxu1 %v6855_v59  ;;  %v2041_v9 = vpop.f32.mrf.mxu0  ;;  %3378 = vmatpush2.bf16.msra.mxu0 %v5327_v7  ;;  %v5369_v7 = vld [vmem:[#allocation8 + $0x110] ss:$8 sps:$4 sm:$0xff]   ;;  %v5336_v59 = vld [vmem:[#allocation8 + $0xc0] ss:$8 sps:$4 sm:$0xff]  }
 0x15b   :  { %v2154_v56 = vpop.f32.mrf.mxu1  ;;  %v6038_v62 = vadd.f32 %v2152_v33, %v2040_v19  ;;  %v2042_v14 = vadd.f32 %v2041_v9, %v5959_v37  ;;  %3379 = vmatprep.subr.bf16.mxu0 %v5332_v10  ;;  %v5374_v9 = vld [vmem:[#allocation8 + $0x104] ss:$8 sps:$4 sm:$0xff]   ;;  %3487 = vmatpush1.bf16.msra.mxu1 %v5369_v7 }
 0x15c   :  { %v6041_v61 = vpop.f32.mrf.mxu0  ;;  %3488 = vmatprep.subr.bf16.mxu1 %v5374_v9 }
 0x15d   :  { %v6043_v25 = vpop.f32.mrf.mxu1  ;;  %v6045_v26 = vadd.f32 %v2154_v56, %v2042_v14  ;;  %v5372_v14 = vld [vmem:[#allocation8 + $0x100] ss:$8 sps:$4 sm:$0xff]  }
 0x15e   :  { %v6047_v8 = vpop.f32.mrf.mxu0  ;;  %3380 = vmatpush2.bf16.msra.mxu0 %v5330_v2 }
 0x15f   :  { %v6049_v40 = vpop.f32.mrf.mxu1  ;;  %3381 = vmatprep.subr.bf16.mxu0 %v5335_v15  ;;  %3489 = vmatpush1.bf16.msra.mxu1 %v5372_v14 }
 0x160   :  { %v2049_v12 = vpop.f32.mrf.mxu0  ;;  %2726 = vmatmul.mubr.bf16.gmra.mxu0 %v6856_v23 }
 0x161   :  { %v2162_v10 = vpop.f32.mrf.mxu1  ;;  %2839 = vmatmul.mubr.bf16.gmra.mxu1 %v6857_v24  ;;  %v2050_v33 = vadd.f32 %v2049_v12, %v5955_v3  ;;  %2735 = vmatprep.mubr.bf16.mxu0 %v6858_v46  ;;  %v5344_v24 = vld [vmem:[#allocation8 + $0xa4] ss:$8 sps:$4 sm:$0xff]  }
 0x162   :  { %2848 = vmatprep.mubr.bf16.mxu1 %v6859_v36  ;;  %v2051_v19 = vpop.f32.mrf.mxu0  ;;  %3382 = vmatpush2.bf16.msra.mxu0 %v5333_v34 }
 0x163   :  { %v2164_v35 = vpop.f32.mrf.mxu1  ;;  %v6056_v56 = vadd.f32 %v2162_v10, %v2050_v33  ;;  %v2052_v2 = vadd.f32 %v2051_v19, %v5959_v37  ;;  %3383 = vmatprep.subr.bf16.mxu0 %v5338_v50  ;;  %v5377_v10 = vld [vmem:[#allocation8 + $0x1f4] ss:$8 sps:$4 sm:$0xff]   ;;  %v5375_v50 = vld [vmem:[#allocation8 + $0x1f0] ss:$8 sps:$4 sm:$0xff]  }
 0x164   :  { %v6059_v15 = vpop.f32.mrf.mxu0  ;;  %3490 = vmatprep.subr.bf16.mxu1 %v5377_v10  ;;  %v5345_v10 = vld [vmem:[#allocation8 + $0x90] ss:$8 sps:$4 sm:$0xff]  }
 0x165   :  { %v6061_v48 = vpop.f32.mrf.mxu1  ;;  %v6063_v12 = vadd.f32 %v2164_v35, %v2052_v2  ;;  %v5342_v35 = vld [vmem:[#allocation8 + $0xa0] ss:$8 sps:$4 sm:$0xff]   ;;  %3491 = vmatpush2.bf16.msra.mxu1 %v5375_v50 }
 0x166   :  { %v6065_v23 = vpop.f32.mrf.mxu0  ;;  %3384 = vmatpush2.bf16.msra.mxu0 %v5336_v59  ;;  %v5380_v59 = vld [vmem:[#allocation8 + $0x1e4] ss:$8 sps:$4 sm:$0xff]  }
 0x167   :  { %v6067_v34 = vpop.f32.mrf.mxu1  ;;  %3385 = vmatprep.subr.bf16.mxu0 %v5341_v51  ;;  %3492 = vmatprep.subr.bf16.mxu1 %v5380_v59 }
 0x168   :  { %v2059_v7 = vpop.f32.mrf.mxu0  ;;  %2736 = vmatmul.mubr.bf16.gmra.mxu0 %v5887_v60  ;;  %v5347_v60 = vld [vmem:[#allocation8 + $0x94] ss:$8 sps:$4 sm:$0xff]  }
 0x169   :  { %v2172_v33 = vpop.f32.mrf.mxu1  ;;  %2849 = vmatmul.mubr.bf16.gmra.mxu1 %v5889_v52  ;;  %v2060_v46 = vadd.f32 %v2059_v7, %v5955_v3  ;;  %2745 = vmatprep.mubr.bf16.mxu0 %v5891_v6  ;;  %v5378_v52 = vld [vmem:[#allocation8 + $0x1e0] ss:$8 sps:$4 sm:$0xff]   ;;  %v5383_v7 = vld [vmem:[#allocation8 + $0x1d4] ss:$8 sps:$4 sm:$0xff]  }
 0x16a   :  { %2858 = vmatprep.mubr.bf16.mxu1 %v5893_v28  ;;  %v2061_v36 = vpop.f32.mrf.mxu0  ;;  %3386 = vmatpush2.bf16.msra.mxu0 %v5339_v49 }
 0x16b   :  { %v2174_v19 = vpop.f32.mrf.mxu1  ;;  %v6074_v9 = vadd.f32 %v2172_v33, %v2060_v46  ;;  %v2062_v2 = vadd.f32 %v2061_v36, %v5959_v37  ;;  %3387 = vmatprep.subr.bf16.mxu0 %v5344_v24  ;;  %v5350_v33 = vld [vmem:[#allocation8 + $0x84] ss:$8 sps:$4 sm:$0xff]   ;;  %3493 = vmatpush2.bf16.msra.mxu1 %v5378_v52  ;;  %v5381_v24 = vld [vmem:[#allocation8 + $0x1d0] ss:$8 sps:$4 sm:$0xff]   ;;  %v5384_v52 = vld [vmem:[#allocation8 + $0x1c0] ss:$8 sps:$4 sm:$0xff]  }
 0x16c   :  { %v6077_v51 = vpop.f32.mrf.mxu0  ;;  %3494 = vmatprep.subr.bf16.mxu1 %v5383_v7 }
 0x16d   :  { %v6079_v14 = vpop.f32.mrf.mxu1  ;;  %v6081_v6 = vadd.f32 %v2174_v19, %v2062_v2  ;;  %v5348_v2 = vld [vmem:[#allocation8 + $0x80] ss:$8 sps:$4 sm:$0xff]  }
 0x16e   :  { %v6083_v28 = vpop.f32.mrf.mxu0  ;;  %3388 = vmatpush2.bf16.msra.mxu0 %v5342_v35  ;;  %v5386_v35 = vld [vmem:[#allocation8 + $0x1c4] ss:$8 sps:$4 sm:$0xff]  }
 0x16f   :  { %v6085_v49 = vpop.f32.mrf.mxu1  ;;  %3389 = vmatprep.subr.bf16.mxu0 %v5347_v60  ;;  %3495 = vmatpush2.bf16.msra.mxu1 %v5381_v24 }
 0x170   :  { %v2069_v50 = vpop.f32.mrf.mxu0  ;;  %2746 = vmatmul.mubr.bf16.gmra.mxu0 %v5899_v30  ;;  %3496 = vmatprep.subr.bf16.mxu1 %v5386_v35 }
 0x171   :  { %v2182_v46 = vpop.f32.mrf.mxu1  ;;  %2859 = vmatmul.mubr.bf16.gmra.mxu1 %v5901_v22  ;;  %v2070_v36 = vadd.f32 %v2069_v50, %v5955_v3 }
 0x172   :  { %v2071_v19 = vpop.f32.mrf.mxu0  ;;  %3390 = vmatpush2.bf16.msra.mxu0 %v5345_v10  ;;  %v5389_v10 = vld [vmem:[#allocation8 + $0x1b4] ss:$8 sps:$4 sm:$0xff]  }
 0x173   :  { %v2184_v59 = vpop.f32.mrf.mxu1  ;;  %v6090_v11 = vadd.f32 %v2182_v46, %v2070_v36  ;;  %v2072_v60 = vadd.f32 %v2071_v19, %v5959_v37  ;;  %3391 = vmatprep.subr.bf16.mxu0 %v5350_v33  ;;  %v2004_v46 = vadd.f32 %v5969_v57, %v5955_v3  ;;  %3497 = vmatpush2.bf16.msra.mxu1 %v5384_v52  ;;  %v5387_v33 = vld [vmem:[#allocation8 + $0x1b0] ss:$8 sps:$4 sm:$0xff]  }
 0x174   :  { %v6093_v29 = vpop.f32.mrf.mxu0  ;;  %3498 = vmatprep.subr.bf16.mxu1 %v5389_v10  ;;  %v2006_v19 = vadd.f32 %v5975_v1, %v5959_v37  ;;  %v5395_v1 = vld [vmem:[#allocation8 + $0x194] ss:$8 sps:$4 sm:$0xff]  }
 0x175   :  { %6860 = vst [vmem:[#allocation16_spill] sm:$0xff] %v6090_v11  ;;  %6861 = vst [vmem:[#allocation17_spill] sm:$0xff] %v6093_v29  ;;  %v6095_v30 = vpop.f32.mrf.mxu1  ;;  %v6097_v22 = vadd.f32 %v2184_v59, %v2072_v60  ;;  %v5392_v60 = vld [vmem:[#allocation8 + $0x1a4] ss:$8 sps:$4 sm:$0xff]   ;;  %v2117_v0 = vadd.f32 %v5971_v38, %v2004_v46  ;;  %v2127_v29 = vadd.f32 %v5989_v20, %v2014_v32 }
 0x176   :  { %6862 = vst [vmem:[#allocation18_spill] sm:$0xff] %v6095_v30  ;;  %v6099_v7 = vpop.f32.mrf.mxu0  ;;  %3392 = vmatpush2.bf16.msra.mxu0 %v5348_v2  ;;  %v5390_v2 = vld [vmem:[#allocation8 + $0x1a0] ss:$8 sps:$4 sm:$0xff]   ;;  %v2119_v11 = vadd.f32 %v5977_v55, %v2006_v19 }
 0x177   :  { %6863 = vst [vmem:[#allocation19_spill] sm:$0xff] %v6097_v22  ;;  %6864 = vst [vmem:[#allocation20_spill] sm:$0xff] %v6099_v7  ;;  %v6101_v50 = vpop.f32.mrf.mxu1  ;;  %3499 = vmatpush2.bf16.msra.mxu1 %v5387_v33 }
 0x178   :  { %6865 = vst [vmem:[#allocation21_spill] sm:$0xff] %v6101_v50  ;;  %v2225_v24 = vpop.f32.mrf.mxu0  ;;  %3500 = vmatprep.subr.bf16.mxu1 %v5392_v60 }
 0x179   :  { %v2338_v36 = vpop.f32.mrf.mxu1  ;;  %v2226_v50 = vadd.f32 %v2225_v24, %v5966_v58  ;;  %v2016_v24 = vadd.f32 %v5993_v31, %v5959_v37 }
 0x17a   :  { %v2227_v35 = vpop.f32.mrf.mxu0 }
 0x17b   :  { %v2340_v59 = vpop.f32.mrf.mxu1  ;;  %v2228_v45 = vadd.f32 %v2227_v35, %v5973_v39  ;;  %3501 = vmatpush2.bf16.msra.mxu1 %v5390_v2  ;;  %v5393_v39 = vld [vmem:[#allocation8 + $0x190] ss:$8 sps:$4 sm:$0xff]   ;;  %v2339_v33 = vadd.f32 %v2338_v36, %v2226_v50  ;;  %v2129_v31 = vadd.f32 %v5995_v53, %v2016_v24  ;;  %v2026_v53 = vadd.f32 %v6011_v44, %v5959_v37 }
 0x17c   :  { %v2229_v57 = vpop.f32.mrf.mxu0  ;;  %3502 = vmatprep.subr.bf16.mxu1 %v5395_v1 }
 0x17d   :  { %v2342_v52 = vpop.f32.mrf.mxu1  ;;  %v2230_v10 = vadd.f32 %v2229_v57, %v2117_v0  ;;  %v2341_v7 = vadd.f32 %v2340_v59, %v2228_v45  ;;  %v5398_v57 = vld [vmem:[#allocation8 + $0x184] ss:$8 sps:$4 sm:$0xff]   ;;  %v2869_v50 = vmax.f32 %v2339_v33, 0.0 }
 0x17e   :  { %v2231_v22 = vpop.f32.mrf.mxu0 }
 0x17f   :  { %v2344_v30 = vpop.f32.mrf.mxu1  ;;  %v2343_v38 = vadd.f32 %v2342_v52, %v2230_v10  ;;  %v2232_v46 = vadd.f32 %v2231_v22, %v2119_v11  ;;  %v2870_v41 = vmax.f32 %v2341_v7, 0.0  ;;  %3503 = vmatpush2.bf16.msra.mxu1 %v5393_v39  ;;  %v5396_v22 = vld [vmem:[#allocation8 + $0x180] ss:$8 sps:$4 sm:$0xff]   ;;  %v2024_v10 = vadd.f32 %v6005_v43, %v5955_v3 }
 0x180   :  { %v2235_v35 = vpop.f32.mrf.mxu0  ;;  %3504 = vmatprep.subr.bf16.mxu1 %v5398_v57 }
 0x181   :  { %v2348_v58 = vpop.f32.mrf.mxu1  ;;  %v2345_v55 = vadd.f32 %v2344_v30, %v2232_v46  ;;  %v2873_v0 = vmax.f32 %v2343_v38, 0.0  ;;  %v2236_v36 = vadd.f32 %v2235_v35, %v5984_v63  ;;  %v2137_v43 = vadd.f32 %v6007_v13, %v2024_v10 }
 0x182   :  { %v2237_v19 = vpop.f32.mrf.mxu0 }
 0x183   :  { %v2350_v60 = vpop.f32.mrf.mxu1  ;;  %v2874_v45 = vmax.f32 %v2345_v55, 0.0  ;;  %v2238_v11 = vadd.f32 %v2237_v19, %v5991_v21  ;;  %v2933_v32 = vpack.c.bf16 %v2873_v0, %v2869_v50  ;;  %3505 = vmatpush2.bf16.msra.mxu1 %v5396_v22  ;;  %v2349_v46 = vadd.f32 %v2348_v58, %v2236_v36 }
 0x184   :  { %v2239_v59 = vpop.f32.mrf.mxu0 }
 0x185   :  { %v2352_v2 = vpop.f32.mrf.mxu1  ;;  %v2240_v30 = vadd.f32 %v2239_v59, %v2127_v29  ;;  %v2934_v52 = vpack.c.bf16 %v2874_v45, %v2870_v41  ;;  %v2351_v1 = vadd.f32 %v2350_v60, %v2238_v11  ;;  %v2877_v60 = vmax.f32 %v2349_v46, 0.0 }
 0x186   :  { %v2241_v20 = vpop.f32.mrf.mxu0  ;;  %v2139_v45 = vadd.f32 %v6013_v42, %v2026_v53  ;;  %v2034_v59 = vadd.f32 %v6023_v27, %v5955_v3 }
 0x187   :  { %v2354_v7 = vpop.f32.mrf.mxu1  ;;  %v2353_v21 = vadd.f32 %v2352_v2, %v2240_v30  ;;  %v2242_v38 = vadd.f32 %v2241_v20, %v2129_v31  ;;  %3393 = vmatprep.mubr.bf16.mxu0 %v2934_v52  ;;  %v2878_v55 = vmax.f32 %v2351_v1, 0.0 }
 0x188   :  { %v2245_v63 = vpop.f32.mrf.mxu0  ;;  %3394 = vmatmul.mubr.bf16.vlgmr.msra.gmra.mxu0 %v2933_v32 }
 0x189   :  { %v2358_v39 = vpop.f32.mrf.mxu1  ;;  %v2355_v29 = vadd.f32 %v2354_v7, %v2242_v38  ;;  %v2881_v33 = vmax.f32 %v2353_v21, 0.0  ;;  %v2246_v57 = vadd.f32 %v2245_v63, %v6002_v47  ;;  %v2036_v47 = vadd.f32 %v6029_v5, %v5959_v37 }
 0x18a   :  { %v2247_v35 = vpop.f32.mrf.mxu0  ;;  %v2147_v7 = vadd.f32 %v6025_v16, %v2034_v59 }
 0x18b   :  { %v2360_v24 = vpop.f32.mrf.mxu1  ;;  %v2882_v0 = vmax.f32 %v2355_v29, 0.0  ;;  %v2248_v19 = vadd.f32 %v2247_v35, %v6009_v18  ;;  %v2937_v44 = vpack.c.bf16 %v2881_v33, %v2877_v60  ;;  %v2359_v18 = vadd.f32 %v2358_v39, %v2246_v57 }
 0x18c   :  { %v2249_v58 = vpop.f32.mrf.mxu0  ;;  %v2149_v53 = vadd.f32 %v6031_v17, %v2036_v47 }
 0x18d   :  { %v2362_v41 = vpop.f32.mrf.mxu1  ;;  %v2250_v11 = vadd.f32 %v2249_v58, %v2137_v43  ;;  %v2938_v22 = vpack.c.bf16 %v2882_v0, %v2878_v55  ;;  %v2361_v13 = vadd.f32 %v2360_v24, %v2248_v19  ;;  %v2885_v38 = vmax.f32 %v2359_v18, 0.0  ;;  %v97_v18 = vld [vmem:[%s6781_s0] sm:$0xff] }
 0x18e   :  { %v2251_v50 = vpop.f32.mrf.mxu0  ;;  %v2044_v43 = vadd.f32 %v6041_v61, %v5955_v3 }
 0x18f   :  { %v2364_v36 = vpop.f32.mrf.mxu1  ;;  %v2363_v2 = vadd.f32 %v2362_v41, %v2250_v11  ;;  %v2252_v31 = vadd.f32 %v2251_v50, %v2139_v45  ;;  %3403 = vmatprep.mubr.bf16.mxu0 %v2938_v22  ;;  %v2886_v1 = vmax.f32 %v2361_v13, 0.0 }
 0x190   :  { %v2255_v30 = vpop.f32.mrf.mxu0  ;;  %3404 = vmatmul.mubr.bf16.gmra.mxu0 %v2937_v44  ;;  %v2157_v45 = vadd.f32 %v6043_v25, %v2044_v43  ;;  %v99_v43 = vld [vmem:[%s6781_s0 + $0x10] sm:$0xff] }
 0x191   :  { %v2368_v52 = vpop.f32.mrf.mxu1  ;;  %v2365_v42 = vadd.f32 %v2364_v36, %v2252_v31  ;;  %v2889_v10 = vmax.f32 %v2363_v2, 0.0  ;;  %v2256_v46 = vadd.f32 %v2255_v30, %v6020_v54  ;;  %v2046_v54 = vadd.f32 %v6047_v8, %v5959_v37 }
 0x192   :  { %v2257_v32 = vpop.f32.mrf.mxu0  ;;  %v5630_v8 = vmov 0  }
 0x193   :  { %v2370_v20 = vpop.f32.mrf.mxu1  ;;  %v2890_v21 = vmax.f32 %v2365_v42, 0.0  ;;  %v2258_v27 = vadd.f32 %v2257_v32, %v6027_v4  ;;  %v2941_v5 = vpack.c.bf16 %v2889_v10, %v2885_v38  ;;  %v2369_v4 = vadd.f32 %v2368_v52, %v2256_v46  ;;  %4917 = vset.pattern.permute.xlu0 %v5630_v8  ;;  %4918 = vset.pattern.permute.xlu1 %v5630_v8 }
 0x194   :  { %v2259_v63 = vpop.f32.mrf.mxu0  ;;  %v2159_v13 = vadd.f32 %v6049_v40, %v2046_v54  ;;  %116 = vperm.xlu0 %4917, %v97_v18   ;;  %122 = vperm.xlu1 %4918, %v99_v43   ;;  %v2066_v54 = vadd.f32 %v6083_v28, %v5959_v37 }
 0x195   :  { %v2372_v39 = vpop.f32.mrf.mxu1  ;;  %v2260_v29 = vadd.f32 %v2259_v63, %v2147_v7  ;;  %v2942_v33 = vpack.c.bf16 %v2890_v21, %v2886_v1  ;;  %v2371_v16 = vadd.f32 %v2370_v20, %v2258_v27  ;;  %v2893_v44 = vmax.f32 %v2369_v4, 0.0  ;;  %v98_v1 = vld [vmem:[%s6781_s0 + $0x8] sm:$0xff] }
 0x196   :  { %v2261_v35 = vpop.f32.mrf.mxu0  ;;  %v2056_v20 = vadd.f32 %v6065_v23, %v5959_v37 }
 0x197   :  { %v2374_v24 = vpop.f32.mrf.mxu1  ;;  %v2373_v55 = vadd.f32 %v2372_v39, %v2260_v29  ;;  %v2262_v0 = vadd.f32 %v2261_v35, %v2149_v53  ;;  %3413 = vmatprep.mubr.bf16.mxu0 %v2942_v33  ;;  %v2894_v11 = vmax.f32 %v2371_v16, 0.0 }
 0x198   :  { %v2265_v19 = vpop.f32.mrf.mxu0  ;;  %3414 = vmatmul.mubr.bf16.gmra.mxu0 %v2941_v5  ;;  %119 = vperm.xlu0 %4917, %v98_v1   ;;  %v2169_v5 = vadd.f32 %v6067_v34, %v2056_v20  ;;  %v102_v20 = vld [vmem:[%s6781_s0 + $0x28] sm:$0xff] }
 0x199   :  { %v2378_v60 = vpop.f32.mrf.mxu1  ;;  %v2375_v17 = vadd.f32 %v2374_v24, %v2262_v0  ;;  %v2897_v57 = vmax.f32 %v2373_v55, 0.0  ;;  %v2266_v50 = vadd.f32 %v2265_v19, %v6038_v62  ;;  %v2054_v62 = vadd.f32 %v6059_v15, %v5955_v3 }
 0x19a   :  { %v2267_v58 = vpop.f32.mrf.mxu0 }
 0x19b   :  { %v2380_v41 = vpop.f32.mrf.mxu1  ;;  %v2898_v22 = vmax.f32 %v2375_v17, 0.0  ;;  %v2268_v61 = vadd.f32 %v2267_v58, %v6045_v26  ;;  %v2945_v25 = vpack.c.bf16 %v2897_v57, %v2893_v44  ;;  %v2379_v40 = vadd.f32 %v2378_v60, %v2266_v50  ;;  %v100_v57 = vld [vmem:[%s6781_s0 + $0x18] sm:$0xff] }
 0x19c   :  { %v2269_v36 = vpop.f32.mrf.mxu0  ;;  %v2167_v15 = vadd.f32 %v6061_v48, %v2054_v62  ;;  %125 = vperm.xlu1 %4918, %v100_v57  }
 0x19d   :  { %v2382_v59 = vpop.f32.mrf.mxu1  ;;  %v2270_v2 = vadd.f32 %v2269_v36, %v2157_v45  ;;  %v2946_v31 = vpack.c.bf16 %v2898_v22, %v2894_v11  ;;  %v2381_v26 = vadd.f32 %v2380_v41, %v2268_v61  ;;  %v2901_v53 = vmax.f32 %v2379_v40, 0.0 }
 0x19e   :  { %v2271_v30 = vpop.f32.mrf.mxu0 }
 0x19f   :  { %v2384_v52 = vpop.f32.mrf.mxu1  ;;  %v2383_v47 = vadd.f32 %v2382_v59, %v2270_v2  ;;  %v2272_v42 = vadd.f32 %v2271_v30, %v2159_v13  ;;  %3423 = vmatprep.mubr.bf16.mxu0 %v2946_v31  ;;  %v2902_v46 = vmax.f32 %v2381_v26, 0.0  ;;  %v2179_v59 = vadd.f32 %v6085_v49, %v2066_v54  ;;  %v101_v31 = vld [vmem:[%s6781_s0 + $0x20] sm:$0xff] }
 0x1a0   :  { %v2275_v10 = vpop.f32.mrf.mxu0  ;;  %3424 = vmatmul.mubr.bf16.gmra.mxu0 %v2945_v25  ;;  %128 = vperm.xlu0 %4917, %v101_v31   ;;  %v6866_v25 = vld [vmem:[#allocation17_spill] sm:$0xff] }
 0x1a1   :  { %v2388_v32 = vpop.f32.mrf.mxu1  ;;  %v2385_v7 = vadd.f32 %v2384_v52, %v2272_v42  ;;  %v2905_v21 = vmax.f32 %v2383_v47, 0.0  ;;  %v2276_v29 = vadd.f32 %v2275_v10, %v6056_v56  ;;  %v6867_v47 = vld [vmem:[#allocation20_spill] sm:$0xff]  ;;  %v6868_v10 = vld [vmem:[#allocation34_spill] sm:$0xff]  ;;  %131 = vperm.xlu1 %4918, %v102_v20  }
 0x1a2   :  { %v2277_v27 = vpop.f32.mrf.mxu0  ;;  %v2076_v42 = vadd.f32 %v6867_v47, %v5959_v37 }
 0x1a3   :  { %v2390_v38 = vpop.f32.mrf.mxu1  ;;  %v2906_v63 = vmax.f32 %v2385_v7, 0.0  ;;  %v2278_v39 = vadd.f32 %v2277_v27, %v6063_v12  ;;  %v2949_v16 = vpack.c.bf16 %v2905_v21, %v2901_v53  ;;  %v2064_v12 = vadd.f32 %v6077_v51, %v5955_v3  ;;  %v6869_v27 = vld [vmem:[#allocation18_spill] sm:$0xff]  ;;  %v6871_v53 = vld [vmem:[#allocation16_spill] sm:$0xff] }
 0x1a4   :  { %v2279_v33 = vpop.f32.mrf.mxu0  ;;  %v2389_v19 = vadd.f32 %v2388_v32, %v2276_v29  ;;  %v675_v32 = vsub.s32 2, %v6868_v10  ;;  %v679_v21 = vsub.s32 3, %v6868_v10 }
 0x1a5   :  { %v2392_v23 = vpop.f32.mrf.mxu1  ;;  %v2280_v35 = vadd.f32 %v2279_v33, %v2167_v15  ;;  %v2950_v24 = vpack.c.bf16 %v2906_v63, %v2902_v46  ;;  %v2391_v0 = vadd.f32 %v2390_v38, %v2278_v39  ;;  %v2177_v51 = vadd.f32 %v6079_v14, %v2064_v12  ;;  %v6870_v63 = vld [vmem:[#allocation19_spill] sm:$0xff] }
 0x1a6   :  { %v2281_v55 = vpop.f32.mrf.mxu0  ;;  %v2909_v44 = vmax.f32 %v2389_v19, 0.0 }
 0x1a7   :  { %v2394_v48 = vpop.f32.mrf.mxu1  ;;  %v2393_v4 = vadd.f32 %v2392_v23, %v2280_v35  ;;  %v2282_v56 = vadd.f32 %v2281_v55, %v2169_v5  ;;  %3433 = vmatprep.mubr.bf16.mxu0 %v2950_v24  ;;  %v2910_v11 = vmax.f32 %v2391_v0, 0.0  ;;  %v6872_v5 = vld [vmem:[#allocation21_spill] sm:$0xff] }
 0x1a8   :  { %v2285_v60 = vpop.f32.mrf.mxu0  ;;  %3434 = vmatmul.mubr.bf16.gmra.mxu0 %v2949_v16  ;;  %v2189_v35 = vadd.f32 %v6872_v5, %v2076_v42  ;;  %v6873_v16 = vld [vmem:[#allocation35_spill] sm:$0xff] }
 0x1a9   :  { %v2398_v34 = vpop.f32.mrf.mxu1  ;;  %v2395_v17 = vadd.f32 %v2394_v48, %v2282_v56  ;;  %v2913_v58 = vmax.f32 %v2393_v4, 0.0  ;;  %v2286_v50 = vadd.f32 %v2285_v60, %v6074_v9  ;;  %v6188_v55 = vrot.slane %v6873_v16, %v675_v32  ;;  %v103_v48 = vld [vmem:[%s6781_s0 + $0x30] sm:$0xff] }
 0x1aa   :  { %v2287_v41 = vpop.f32.mrf.mxu0  ;;  %134 = vperm.xlu0 %4917, %v103_v48  }
 0x1ab   :  { %v2400_v45 = vpop.f32.mrf.mxu1  ;;  %v2914_v22 = vmax.f32 %v2395_v17, 0.0  ;;  %v2288_v61 = vadd.f32 %v2287_v41, %v6081_v6  ;;  %v2953_v8 = vpack.c.bf16 %v2913_v58, %v2909_v44  ;;  %v2074_v6 = vadd.f32 %v6866_v25, %v5955_v3 }
 0x1ac   :  { %v2289_v36 = vpop.f32.mrf.mxu0  ;;  %v2399_v62 = vadd.f32 %v2398_v34, %v2286_v50  ;;  %v5511_v34 = vld [vmem:[%s6785_s4] sm:$0xf] }
 0x1ad   :  { %v2402_v28 = vpop.f32.mrf.mxu1  ;;  %v2290_v13 = vadd.f32 %v2289_v36, %v2177_v51  ;;  %v2954_v2 = vpack.c.bf16 %v2914_v22, %v2910_v11  ;;  %v2401_v30 = vadd.f32 %v2400_v45, %v2288_v61  ;;  %v2187_v38 = vadd.f32 %v6869_v27, %v2074_v6  ;;  %v104_v51 = vld [vmem:[%s6781_s0 + $0x38] sm:$0xff] }
 0x1ae   :  { %v2291_v18 = vpop.f32.mrf.mxu0  ;;  %v2917_v37 = vmax.f32 %v2399_v62, 0.0  ;;  %v6196_v54 = vrot.slane %v5511_v34, %v679_v21  ;;  %137 = vperm.xlu1 %4918, %v104_v51   ;;  %v108_v21 = vld [vmem:[%s6781_s0 + $0x58] sm:$0xff] }
 0x1af   :  { %v2404_v14 = vpop.f32.mrf.mxu1  ;;  %v2403_v52 = vadd.f32 %v2402_v28, %v2290_v13  ;;  %v2292_v9 = vadd.f32 %v2291_v18, %v2179_v59  ;;  %3443 = vmatprep.mubr.bf16.mxu0 %v2954_v2  ;;  %v2918_v15 = vmax.f32 %v2401_v30, 0.0 }
 0x1b0   :  { %v2295_v26 = vpop.f32.mrf.mxu0  ;;  %3444 = vmatmul.mubr.bf16.gmra.mxu0 %v2953_v8  ;;  %v105_v8 = vld [vmem:[%s6781_s0 + $0x40] sm:$0xff] }
 0x1b1   :  { %v2408_v49 = vpop.f32.mrf.mxu1  ;;  %v2405_v40 = vadd.f32 %v2404_v14, %v2292_v9  ;;  %v2921_v7 = vmax.f32 %v2403_v52, 0.0  ;;  %v2296_v29 = vadd.f32 %v2295_v26, %v6871_v53  ;;  %140 = vperm.xlu0 %4917, %v105_v8   ;;  %v106_v52 = vld [vmem:[%s6781_s0 + $0x48] sm:$0xff]  ;;  %v107_v9 = vld [vmem:[%s6781_s0 + $0x50] sm:$0xff] }
 0x1b2   :  { %v2297_v3 = vpop.f32.mrf.mxu0  ;;  %143 = vperm.xlu1 %4918, %v106_v52  }
 0x1b3   :  { %v2410_v1 = vpop.f32.mrf.mxu1  ;;  %v2922_v46 = vmax.f32 %v2405_v40, 0.0  ;;  %v2298_v39 = vadd.f32 %v2297_v3, %v6870_v63  ;;  %v2957_v12 = vpack.c.bf16 %v2921_v7, %v2917_v37  ;;  %v2409_v17 = vadd.f32 %v2408_v49, %v2296_v29  ;;  %v109_v37 = vld [vmem:[%s6781_s0 + $0x60] sm:$0xff] }
 0x1b4   :  { %v2299_v33 = vpop.f32.mrf.mxu0 }
 0x1b5   :  { %v2412_v23 = vpop.f32.mrf.mxu1  ;;  %v2300_v24 = vadd.f32 %v2299_v33, %v2187_v38  ;;  %v2958_v43 = vpack.c.bf16 %v2922_v46, %v2918_v15  ;;  %v2411_v56 = vadd.f32 %v2410_v1, %v2298_v39  ;;  %v2925_v59 = vmax.f32 %v2409_v17, 0.0  ;;  %146 = vperm.xlu0 %4917, %v107_v9  }
 0x1b6   :  { %v2301_v0 = vpop.f32.mrf.mxu0  ;;  %149 = vperm.xlu1 %4918, %v108_v21  }
 0x1b7   :  { %v2414_v4 = vpop.f32.mrf.mxu1  ;;  %v2413_v19 = vadd.f32 %v2412_v23, %v2300_v24  ;;  %v2302_v60 = vadd.f32 %v2301_v0, %v2189_v35  ;;  %3453 = vmatprep.mubr.bf16.mxu0 %v2958_v43  ;;  %v2926_v44 = vmax.f32 %v2411_v56, 0.0  ;;  %v110_v35 = vld [vmem:[%s6781_s0 + $0x68] sm:$0xff] }
 0x1b8   :  { %v2451_v57 = vpop.f32.mrf.mxu0  ;;  %3454 = vmatmul.mubr.bf16.gmra.mxu0 %v2957_v12 }
 0x1b9   :  { %v2564_v58 = vpop.f32.mrf.mxu1  ;;  %v2415_v41 = vadd.f32 %v2414_v4, %v2302_v60  ;;  %v2452_v45 = vadd.f32 %v2451_v57, %v6188_v55  ;;  %v2929_v11 = vmax.f32 %v2413_v19, 0.0  ;;  %152 = vperm.xlu0 %4917, %v109_v37   ;;  %v111_v4 = vld [vmem:[%s6781_s0 + $0x70] sm:$0xff] }
 0x1ba   :  { %v2453_v22 = vpop.f32.mrf.mxu0  ;;  %155 = vperm.xlu1 %4918, %v110_v35  }
 0x1bb   :  { %v6202_v61 = vpop.f32.mrf.mxu1  ;;  %v2930_v50 = vmax.f32 %v2415_v41, 0.0  ;;  %v6204_v36 = vadd.f32 %v2564_v58, %v2452_v45  ;;  %v6207_v28 = vadd.f32 %v2453_v22, %v6196_v54  ;;  %v2961_v18 = vpack.c.bf16 %v2929_v11, %v2925_v59 }
 0x1bc   :  { %v6209_v13 = vpop.f32.mrf.mxu0 }
 0x1bd   :  { %v6211_v2 = vpop.f32.mrf.mxu1  ;;  %v2962_v31 = vpack.c.bf16 %v2930_v50, %v2926_v44  ;;  %158 = vperm.xlu0 %4917, %v111_v4   ;;  %v112_v44 = vld [vmem:[%s6781_s0 + $0x78] sm:$0xff] }
 0x1be   :  { %v6216_v14 = vpop.f32.mrf.mxu0  ;;  %161 = vperm.xlu1 %4918, %v112_v44  }
 0x1bf   :  { %v6218_v25 = vpop.f32.mrf.mxu1  ;;  %3463 = vmatprep.mubr.bf16.mxu0 %v2962_v31 }
 0x1c0   :  { %v2461_v6 = vpop.f32.mrf.mxu0  ;;  %3464 = vmatmul.mubr.bf16.gmra.mxu0 %v2961_v18 }
 0x1c1   :  { %v2574_v30 = vpop.f32.mrf.mxu1  ;;  %v2462_v62 = vadd.f32 %v2461_v6, %v6188_v55 }
 0x1c2   :  { %v2463_v26 = vpop.f32.mrf.mxu0 }
 0x1c3   :  { %v6227_v49 = vpop.f32.mrf.mxu1  ;;  %v6229_v47 = vadd.f32 %v2574_v30, %v2462_v62  ;;  %v6232_v42 = vadd.f32 %v2463_v26, %v6196_v54 }
 0x1c4   :  { %v6234_v40 = vpop.f32.mrf.mxu0 }
 0x1c5   :  { %v6236_v10 = vpop.f32.mrf.mxu1 }
 0x1c6   :  { %v6238_v32 = vpop.f32.mrf.mxu0 }
 0x1c7   :  { %v6240_v20 = vpop.f32.mrf.mxu1 }
 0x1c8   :  { %v2471_v7 = vpop.f32.mrf.mxu0 }
 0x1c9   :  { %v2584_v3 = vpop.f32.mrf.mxu1  ;;  %v2472_v1 = vadd.f32 %v2471_v7, %v6188_v55 }
 0x1ca   :  { %v2473_v27 = vpop.f32.mrf.mxu0 }
 0x1cb   :  { %v6246_v38 = vpop.f32.mrf.mxu1  ;;  %v6248_v15 = vadd.f32 %v2584_v3, %v2472_v1  ;;  %v6251_v46 = vadd.f32 %v2473_v27, %v6196_v54 }
 0x1cc   :  { %v6253_v63 = vpop.f32.mrf.mxu0 }
 0x1cd   :  { %v6255_v39 = vpop.f32.mrf.mxu1 }
 0x1ce   :  { %v6260_v53 = vpop.f32.mrf.mxu0 }
 0x1cf   :  { %v6262_v29 = vpop.f32.mrf.mxu1 }
 0x1d0   :  { %v2481_v33 = vpop.f32.mrf.mxu0 }
 0x1d1   :  { %v2594_v23 = vpop.f32.mrf.mxu1  ;;  %v2482_v5 = vadd.f32 %v2481_v33, %v6188_v55 }
 0x1d2   :  { %v2483_v24 = vpop.f32.mrf.mxu0 }
 0x1d3   :  { %v6268_v43 = vpop.f32.mrf.mxu1  ;;  %v6270_v16 = vadd.f32 %v2594_v23, %v2482_v5  ;;  %v6273_v48 = vadd.f32 %v2483_v24, %v6196_v54 }
 0x1d4   :  { %v6275_v12 = vpop.f32.mrf.mxu0 }
 0x1d5   :  { %v6277_v0 = vpop.f32.mrf.mxu1 }
 0x1d6   :  { %v6282_v56 = vpop.f32.mrf.mxu0 }
 0x1d7   :  { %v6284_v19 = vpop.f32.mrf.mxu1 }
 0x1d8   :  { %v2491_v60 = vpop.f32.mrf.mxu0 }
 0x1d9   :  { %v2604_v34 = vpop.f32.mrf.mxu1  ;;  %v2492_v17 = vadd.f32 %v2491_v60, %v6188_v55 }
 0x1da   :  { %v2493_v57 = vpop.f32.mrf.mxu0 }
 0x1db   :  { %v2606_v58 = vpop.f32.mrf.mxu1  ;;  %v6287_v41 = vadd.f32 %v2604_v34, %v2492_v17  ;;  %v2494_v45 = vadd.f32 %v2493_v57, %v6196_v54 }
 0x1dc   :  { %v6290_v51 = vpop.f32.mrf.mxu0 }
 0x1dd   :  { %v6292_v11 = vpop.f32.mrf.mxu1  ;;  %v6294_v22 = vadd.f32 %v2606_v58, %v2494_v45 }
 0x1de   :  { %v6299_v50 = vpop.f32.mrf.mxu0 }
 0x1df   :  { %v6301_v59 = vpop.f32.mrf.mxu1 }
 0x1e0   :  { %v2501_v31 = vpop.f32.mrf.mxu0 }
 0x1e1   :  { %v2614_v8 = vpop.f32.mrf.mxu1  ;;  %v2502_v18 = vadd.f32 %v2501_v31, %v6188_v55 }
 0x1e2   :  { %v2503_v6 = vpop.f32.mrf.mxu0 }
 0x1e3   :  { %v2616_v30 = vpop.f32.mrf.mxu1  ;;  %v6304_v52 = vadd.f32 %v2614_v8, %v2502_v18  ;;  %v2504_v9 = vadd.f32 %v2503_v6, %v6196_v54 }
 0x1e4   :  { %v6307_v62 = vpop.f32.mrf.mxu0 }
 0x1e5   :  { %v6309_v26 = vpop.f32.mrf.mxu1  ;;  %v6311_v7 = vadd.f32 %v2616_v30, %v2504_v9 }
 0x1e6   :  { %v6313_v3 = vpop.f32.mrf.mxu0 }
 0x1e7   :  { %v6315_v1 = vpop.f32.mrf.mxu1 }
 0x1e8   :  { %v2511_v21 = vpop.f32.mrf.mxu0 }
 0x1e9   :  { %v2624_v27 = vpop.f32.mrf.mxu1  ;;  %v2512_v37 = vadd.f32 %v2511_v21, %v6188_v55 }
 0x1ea   :  { %v2513_v33 = vpop.f32.mrf.mxu0 }
 0x1eb   :  { %v2626_v23 = vpop.f32.mrf.mxu1  ;;  %v6318_v5 = vadd.f32 %v2624_v27, %v2512_v37  ;;  %v2514_v35 = vadd.f32 %v2513_v33, %v6196_v54  ;;  %v2456_v37 = vadd.f32 %v6209_v13, %v6188_v55 }
 0x1ec   :  { %v6321_v24 = vpop.f32.mrf.mxu0 }
 0x1ed   :  { %v6323_v4 = vpop.f32.mrf.mxu1  ;;  %v6325_v60 = vadd.f32 %v2626_v23, %v2514_v35  ;;  %v2567_v35 = vadd.f32 %v6202_v61, %v6207_v28 }
 0x1ee   :  { %v6327_v34 = vpop.f32.mrf.mxu0 }
 0x1ef   :  { %v6329_v17 = vpop.f32.mrf.mxu1 }
 0x1f0   :  { %6874 = vst [vmem:[#allocation22_spill] sm:$0xff] %v6329_v17  ;;  %v2521_v57 = vpop.f32.mrf.mxu0 }
 0x1f1   :  { %v2634_v58 = vpop.f32.mrf.mxu1  ;;  %v2522_v45 = vadd.f32 %v2521_v57, %v6188_v55  ;;  %v2458_v57 = vadd.f32 %v6216_v14, %v6196_v54 }
 0x1f2   :  { %v2523_v44 = vpop.f32.mrf.mxu0 }
 0x1f3   :  { %v2636_v31 = vpop.f32.mrf.mxu1  ;;  %v6332_v8 = vadd.f32 %v2634_v58, %v2522_v45  ;;  %v2524_v18 = vadd.f32 %v2523_v44, %v6196_v54 }
 0x1f4   :  { %v6335_v6 = vpop.f32.mrf.mxu0 }
 0x1f5   :  { %6875 = vst [vmem:[#allocation23_spill] sm:$0xff] %v6332_v8  ;;  %6876 = vst [vmem:[#allocation24_spill] sm:$0xff] %v6335_v6  ;;  %v6337_v30 = vpop.f32.mrf.mxu1  ;;  %v6339_v9 = vadd.f32 %v2636_v31, %v2524_v18  ;;  %v2569_v31 = vadd.f32 %v6211_v2, %v2456_v37  ;;  %v2468_v2 = vadd.f32 %v6238_v32, %v6196_v54 }
 0x1f6   :  { %6877 = vst [vmem:[#allocation25_spill] sm:$0xff] %v6337_v30  ;;  %v6341_v21 = vpop.f32.mrf.mxu0  ;;  %v2571_v30 = vadd.f32 %v6218_v25, %v2458_v57 }
 0x1f7   :  { %6878 = vst [vmem:[#allocation26_spill] sm:$0xff] %v6339_v9  ;;  %6879 = vst [vmem:[#allocation27_spill] sm:$0xff] %v6341_v21  ;;  %v6343_v27 = vpop.f32.mrf.mxu1  ;;  %v2466_v21 = vadd.f32 %v6234_v40, %v6188_v55 }
 0x1f8   :  { %6880 = vst [vmem:[#allocation28_spill] sm:$0xff] %v6343_v27  ;;  %v2677_v33 = vpop.f32.mrf.mxu0 }
 0x1f9   :  { %v2790_v23 = vpop.f32.mrf.mxu1  ;;  %v2678_v58 = vadd.f32 %v2677_v33, %v6204_v36  ;;  %v2577_v36 = vadd.f32 %v6227_v49, %v6232_v42  ;;  %v2579_v40 = vadd.f32 %v6236_v10, %v2466_v21  ;;  %v2581_v42 = vadd.f32 %v6240_v20, %v2468_v2 }
 0x1fa   :  { %v2679_v45 = vpop.f32.mrf.mxu0  ;;  %v2587_v20 = vadd.f32 %v6246_v38, %v6251_v46  ;;  %v212_v38 = vld [vmem:[%s6783_s2 + $0x8] sm:$0xff]  ;;  %v211_v46 = vld [vmem:[%s6783_s2] sm:$0xff] }
 0x1fb   :  { %v2792_v44 = vpop.f32.mrf.mxu1  ;;  %v2680_v18 = vadd.f32 %v2679_v45, %v2567_v35  ;;  %v2791_v13 = vadd.f32 %v2790_v23, %v2678_v58 }
 0x1fc   :  { %v2681_v9 = vpop.f32.mrf.mxu0 }
 0x1fd   :  { %v2794_v27 = vpop.f32.mrf.mxu1  ;;  %v2682_v8 = vadd.f32 %v2681_v9, %v2569_v31  ;;  %v2793_v6 = vadd.f32 %v2792_v44, %v2680_v18  ;;  %v2871_v35 = vmax.f32 %v2791_v13, 0.0 }
 0x1fe   :  { %v2683_v61 = vpop.f32.mrf.mxu0 }
 0x1ff   :  { %v2796_v28 = vpop.f32.mrf.mxu1  ;;  %v2795_v14 = vadd.f32 %v2794_v27, %v2682_v8  ;;  %v2684_v17 = vadd.f32 %v2683_v61, %v2571_v30  ;;  %v2872_v45 = vmax.f32 %v2793_v6, 0.0  ;;  %v5399_v6 = vld [vmem:[#allocation9 + $0x70] ss:$8 sps:$4 sm:$0xff]  }
 0x200   :  { %v2687_v37 = vpop.f32.mrf.mxu0 }
 0x201   :  { %v2800_v33 = vpop.f32.mrf.mxu1  ;;  %v2875_v25 = vmax.f32 %v2795_v14, 0.0  ;;  %v2797_v23 = vadd.f32 %v2796_v28, %v2684_v17  ;;  %v2688_v9 = vadd.f32 %v2687_v37, %v6229_v47  ;;  %v2476_v17 = vadd.f32 %v6253_v63, %v6188_v55  ;;  %v5401_v28 = vld [vmem:[#allocation9 + $0x74] ss:$8 sps:$4 sm:$0xff]  }
 0x202   :  { %v2689_v57 = vpop.f32.mrf.mxu0  ;;  %v214_v14 = vld [vmem:[%s6783_s2 + $0x18] sm:$0xff]  ;;  %v213_v37 = vld [vmem:[%s6783_s2 + $0x10] sm:$0xff]  ;;  %3827 = vmatprep.subr.bf16.mxu0 %v5401_v28  ;;  %v2597_v28 = vadd.f32 %v6268_v43, %v6273_v48 }
 0x203   :  { %v2802_v58 = vpop.f32.mrf.mxu1  ;;  %v2935_v8 = vpack.c.bf16 %v2875_v25, %v2871_v35  ;;  %v2876_v30 = vmax.f32 %v2797_v23, 0.0  ;;  %v2690_v27 = vadd.f32 %v2689_v57, %v2577_v36  ;;  %v2801_v31 = vadd.f32 %v2800_v33, %v2688_v9  ;;  %4017 = vmatprep.subr.mxu1 %v214_v14  ;;  %v5404_v33 = vld [vmem:[#allocation9 + $0x64] ss:$8 sps:$4 sm:$0xff]   ;;  %3828 = vmatpush1.bf16.msra.mxu0 %v5399_v6 }
 0x204   :  { %v2691_v44 = vpop.f32.mrf.mxu0  ;;  %v2478_v36 = vadd.f32 %v6260_v53, %v6196_v54  ;;  %v2589_v53 = vadd.f32 %v6255_v39, %v2476_v17  ;;  %3829 = vmatprep.subr.bf16.mxu0 %v5404_v33  ;;  %v2486_v39 = vadd.f32 %v6275_v12, %v6188_v55  ;;  %v5410_v6 = vld [vmem:[#allocation9 + $0x44] ss:$8 sps:$4 sm:$0xff]  }
 0x205   :  { %v2804_v49 = vpop.f32.mrf.mxu1  ;;  %v2936_v32 = vpack.c.bf16 %v2876_v30, %v2872_v45  ;;  %v2692_v18 = vadd.f32 %v2691_v44, %v2579_v40  ;;  %v2803_v61 = vadd.f32 %v2802_v58, %v2690_v27  ;;  %v2879_v35 = vmax.f32 %v2801_v31, 0.0  ;;  %v5402_v58 = vld [vmem:[#allocation9 + $0x60] ss:$8 sps:$4 sm:$0xff]   ;;  %v5407_v27 = vld [vmem:[#allocation9 + $0x54] ss:$8 sps:$4 sm:$0xff]  }
 0x206   :  { %v2693_v13 = vpop.f32.mrf.mxu0 }
 0x207   :  { %v2806_v47 = vpop.f32.mrf.mxu1  ;;  %v2805_v10 = vadd.f32 %v2804_v49, %v2692_v18  ;;  %v2694_v21 = vadd.f32 %v2693_v13, %v2581_v42  ;;  %3506 = vmatprep.mubr.bf16.mxu1 %v2936_v32  ;;  %v2880_v45 = vmax.f32 %v2803_v61, 0.0  ;;  %v2591_v42 = vadd.f32 %v6262_v29, %v2478_v36  ;;  %3830 = vmatpush1.bf16.msra.mxu0 %v5402_v58 }
 0x208   :  { %v2697_v2 = vpop.f32.mrf.mxu0  ;;  %3507 = vmatmul.mubr.bf16.vlgmr.msra.gmra.mxu1 %v2935_v8  ;;  %3831 = vmatprep.subr.bf16.mxu0 %v5407_v27  ;;  %v2488_v29 = vadd.f32 %v6282_v56, %v6196_v54  ;;  %v5413_v56 = vld [vmem:[#allocation9 + $0x34] ss:$8 sps:$4 sm:$0xff]  }
 0x209   :  { %v2810_v63 = vpop.f32.mrf.mxu1  ;;  %v2883_v25 = vmax.f32 %v2805_v10, 0.0  ;;  %v2807_v23 = vadd.f32 %v2806_v47, %v2694_v21  ;;  %v2698_v9 = vadd.f32 %v2697_v2, %v6248_v15  ;;  %4018 = vmatpush1.msra.mxu1 %v213_v37  ;;  %v5405_v47 = vld [vmem:[#allocation9 + $0x50] ss:$8 sps:$4 sm:$0xff]   ;;  %v2599_v37 = vadd.f32 %v6277_v0, %v2486_v39 }
 0x20a   :  { %v2699_v40 = vpop.f32.mrf.mxu0  ;;  %4019 = vmatprep.subr.mxu1 %v212_v38 }
 0x20b   :  { %v2812_v57 = vpop.f32.mrf.mxu1  ;;  %v2939_v8 = vpack.c.bf16 %v2883_v25, %v2879_v35  ;;  %v2884_v15 = vmax.f32 %v2807_v23, 0.0  ;;  %v2700_v30 = vadd.f32 %v2699_v40, %v2587_v20  ;;  %4020 = vmatpush1.msra.mxu1 %v211_v46  ;;  %v2811_v31 = vadd.f32 %v2810_v63, %v2698_v9  ;;  %3832 = vmatpush1.bf16.msra.mxu0 %v5405_v47  ;;  %v5408_v25 = vld [vmem:[#allocation9 + $0x40] ss:$8 sps:$4 sm:$0xff]  }
 0x20c   :  { %v2701_v44 = vpop.f32.mrf.mxu0  ;;  %3833 = vmatprep.subr.bf16.mxu0 %v5410_v6  ;;  %v5414_v47 = vld [vmem:[#allocation9 + $0x20] ss:$8 sps:$4 sm:$0xff]  }
 0x20d   :  { %v2814_v49 = vpop.f32.mrf.mxu1  ;;  %v2940_v32 = vpack.c.bf16 %v2884_v15, %v2880_v45  ;;  %v2702_v18 = vadd.f32 %v2701_v44, %v2589_v53  ;;  %v2813_v61 = vadd.f32 %v2812_v57, %v2700_v30  ;;  %v2887_v12 = vmax.f32 %v2811_v31, 0.0  ;;  %v5416_v44 = vld [vmem:[#allocation9 + $0x24] ss:$8 sps:$4 sm:$0xff]  }
 0x20e   :  { %v2703_v17 = vpop.f32.mrf.mxu0  ;;  %v2601_v53 = vadd.f32 %v6284_v19, %v2488_v29 }
 0x20f   :  { %v2816_v13 = vpop.f32.mrf.mxu1  ;;  %v2815_v10 = vadd.f32 %v2814_v49, %v2702_v18  ;;  %v2704_v21 = vadd.f32 %v2703_v17, %v2591_v42  ;;  %3516 = vmatprep.mubr.bf16.mxu1 %v2940_v32  ;;  %v2888_v23 = vmax.f32 %v2813_v61, 0.0  ;;  %3834 = vmatpush1.bf16.msra.mxu0 %v5408_v25  ;;  %v2498_v49 = vadd.f32 %v6299_v50, %v6196_v54  ;;  %v5419_v50 = vld [vmem:[#allocation9 + $0x14] ss:$8 sps:$4 sm:$0xff]  }
 0x210   :  { %v2707_v14 = vpop.f32.mrf.mxu0  ;;  %3517 = vmatmul.mubr.bf16.gmra.mxu1 %v2939_v8  ;;  %v5411_v8 = vld [vmem:[#allocation9 + $0x30] ss:$8 sps:$4 sm:$0xff]   ;;  %3835 = vmatprep.subr.bf16.mxu0 %v5413_v56  ;;  %v2508_v25 = vadd.f32 %v6313_v3, %v6196_v54  ;;  %v5425_v3 = vld [vmem:[#allocation9 + $0xf4] ss:$8 sps:$4 sm:$0xff]  }
 0x211   :  { %v2820_v20 = vpop.f32.mrf.mxu1  ;;  %v2891_v36 = vmax.f32 %v2815_v10, 0.0  ;;  %v2817_v2 = vadd.f32 %v2816_v13, %v2704_v21  ;;  %v2708_v63 = vadd.f32 %v2707_v14, %v6270_v16  ;;  %v2496_v16 = vadd.f32 %v6290_v51, %v6188_v55 }
 0x212   :  { %v2709_v33 = vpop.f32.mrf.mxu0  ;;  %v2611_v14 = vadd.f32 %v6301_v59, %v2498_v49  ;;  %v5423_v49 = vld [vmem:[#allocation9 + $0xf0] ss:$8 sps:$4 sm:$0xff]  }
 0x213   :  { %v2822_v35 = vpop.f32.mrf.mxu1  ;;  %v2943_v9 = vpack.c.bf16 %v2891_v36, %v2887_v12  ;;  %v2892_v43 = vmax.f32 %v2817_v2, 0.0  ;;  %v2710_v48 = vadd.f32 %v2709_v33, %v2597_v28  ;;  %v2821_v57 = vadd.f32 %v2820_v20, %v2708_v63  ;;  %3836 = vmatpush1.bf16.msra.mxu0 %v5411_v8  ;;  %v5417_v63 = vld [vmem:[#allocation9 + $0x10] ss:$8 sps:$4 sm:$0xff]  }
 0x214   :  { %v2711_v38 = vpop.f32.mrf.mxu0  ;;  %v2609_v39 = vadd.f32 %v6292_v11, %v2496_v16  ;;  %3837 = vmatprep.subr.bf16.mxu0 %v5416_v44  ;;  %v2506_v11 = vadd.f32 %v6307_v62, %v6188_v55  ;;  %v2621_v8 = vadd.f32 %v6315_v1, %v2508_v25  ;;  %v6883_v25 = vld [vmem:[#allocation27_spill] sm:$0xff] }
 0x215   :  { %v2824_v46 = vpop.f32.mrf.mxu1  ;;  %v2944_v40 = vpack.c.bf16 %v2892_v43, %v2888_v23  ;;  %v2712_v58 = vadd.f32 %v2711_v38, %v2599_v37  ;;  %v2823_v15 = vadd.f32 %v2822_v35, %v2710_v48  ;;  %v2895_v32 = vmax.f32 %v2821_v57, 0.0 }
 0x216   :  { %v2713_v0 = vpop.f32.mrf.mxu0  ;;  %v2619_v56 = vadd.f32 %v6309_v26, %v2506_v11  ;;  %v2516_v26 = vadd.f32 %v6321_v24, %v6188_v55 }
 0x217   :  { %v2826_v45 = vpop.f32.mrf.mxu1  ;;  %v2825_v30 = vadd.f32 %v2824_v46, %v2712_v58  ;;  %v2714_v27 = vadd.f32 %v2713_v0, %v2601_v53  ;;  %3526 = vmatprep.mubr.bf16.mxu1 %v2944_v40  ;;  %v2896_v61 = vmax.f32 %v2823_v15, 0.0  ;;  %3838 = vmatpush1.bf16.msra.mxu0 %v5414_v47  ;;  %v5420_v53 = vld [vmem:[#allocation9] ss:$8 sps:$4 sm:$0xff]  }
 0x218   :  { %v2717_v19 = vpop.f32.mrf.mxu0  ;;  %3527 = vmatmul.mubr.bf16.gmra.mxu1 %v2943_v9  ;;  %3839 = vmatprep.subr.bf16.mxu0 %v5419_v50 }
 0x219   :  { %v2830_v42 = vpop.f32.mrf.mxu1  ;;  %v2899_v31 = vmax.f32 %v2825_v30, 0.0  ;;  %v2827_v18 = vadd.f32 %v2826_v45, %v2714_v27  ;;  %v2718_v51 = vadd.f32 %v2717_v19, %v6287_v41 }
 0x21a   :  { %v2719_v17 = vpop.f32.mrf.mxu0 }
 0x21b   :  { %v2832_v13 = vpop.f32.mrf.mxu1  ;;  %v2947_v10 = vpack.c.bf16 %v2899_v31, %v2895_v32  ;;  %v2900_v21 = vmax.f32 %v2827_v18, 0.0  ;;  %v2720_v6 = vadd.f32 %v2719_v17, %v6294_v22  ;;  %v2831_v12 = vadd.f32 %v2830_v42, %v2718_v51  ;;  %v5422_v22 = vld [vmem:[#allocation9 + $0x4] ss:$8 sps:$4 sm:$0xff]   ;;  %3840 = vmatpush1.bf16.msra.mxu0 %v5417_v63 }
 0x21c   :  { %v2721_v28 = vpop.f32.mrf.mxu0  ;;  %3841 = vmatprep.subr.bf16.mxu0 %v5422_v22  ;;  %v2518_v31 = vadd.f32 %v6327_v34, %v6196_v54  ;;  %v5431_v34 = vld [vmem:[#allocation9 + $0xd4] ss:$8 sps:$4 sm:$0xff]  }
 0x21d   :  { %v2834_v29 = vpop.f32.mrf.mxu1  ;;  %v2948_v20 = vpack.c.bf16 %v2900_v21, %v2896_v61  ;;  %v2722_v41 = vadd.f32 %v2721_v28, %v2609_v39  ;;  %v2833_v37 = vadd.f32 %v2832_v13, %v2720_v6  ;;  %v2903_v9 = vmax.f32 %v2831_v12, 0.0 }
 0x21e   :  { %v2723_v36 = vpop.f32.mrf.mxu0  ;;  %v2629_v13 = vadd.f32 %v6323_v4, %v2516_v26  ;;  %v6882_v4 = vld [vmem:[#allocation24_spill] sm:$0xff] }
 0x21f   :  { %v2836_v2 = vpop.f32.mrf.mxu1  ;;  %v2835_v33 = vadd.f32 %v2834_v29, %v2722_v41  ;;  %v2724_v35 = vadd.f32 %v2723_v36, %v2611_v14  ;;  %3536 = vmatprep.mubr.bf16.mxu1 %v2948_v20  ;;  %v2904_v40 = vmax.f32 %v2833_v37, 0.0  ;;  %3842 = vmatpush1.bf16.msra.mxu0 %v5420_v53  ;;  %v6881_v20 = vld [vmem:[#allocation22_spill] sm:$0xff]  ;;  %v2526_v36 = vadd.f32 %v6882_v4, %v6188_v55  ;;  %v6884_v55 = vld [vmem:[#allocation23_spill] sm:$0xff]  ;;  %v5446_v4 = vld [vmem:[#allocation9 + $0x84] ss:$8 sps:$4 sm:$0xff]  }
 0x220   :  { %v2727_v59 = vpop.f32.mrf.mxu0  ;;  %3537 = vmatmul.mubr.bf16.gmra.mxu1 %v2947_v10  ;;  %3843 = vmatprep.subr.bf16.mxu0 %v5425_v3  ;;  %v5426_v10 = vld [vmem:[#allocation9 + $0xe0] ss:$8 sps:$4 sm:$0xff]   ;;  %v2631_v12 = vadd.f32 %v6881_v20, %v2518_v31  ;;  %v5429_v37 = vld [vmem:[#allocation9 + $0xd0] ss:$8 sps:$4 sm:$0xff]  }
 0x221   :  { %v2840_v23 = vpop.f32.mrf.mxu1  ;;  %v2907_v43 = vmax.f32 %v2835_v33, 0.0  ;;  %v2837_v48 = vadd.f32 %v2836_v2, %v2724_v35  ;;  %v2728_v62 = vadd.f32 %v2727_v59, %v6304_v52  ;;  %v2528_v59 = vadd.f32 %v6883_v25, %v6196_v54  ;;  %v5437_v54 = vld [vmem:[#allocation9 + $0xb4] ss:$8 sps:$4 sm:$0xff]  }
 0x222   :  { %v2729_v38 = vpop.f32.mrf.mxu0 }
 0x223   :  { %v2842_v46 = vpop.f32.mrf.mxu1  ;;  %v2951_v57 = vpack.c.bf16 %v2907_v43, %v2903_v9  ;;  %v2908_v58 = vmax.f32 %v2837_v48, 0.0  ;;  %v2730_v16 = vadd.f32 %v2729_v38, %v6311_v7  ;;  %v2841_v30 = vadd.f32 %v2840_v23, %v2728_v62  ;;  %v5428_v7 = vld [vmem:[#allocation9 + $0xe4] ss:$8 sps:$4 sm:$0xff]   ;;  %3844 = vmatpush2.bf16.msra.mxu0 %v5423_v49 }
 0x224   :  { %v2731_v0 = vpop.f32.mrf.mxu0  ;;  %3845 = vmatprep.subr.bf16.mxu0 %v5428_v7  ;;  %v6885_v38 = vld [vmem:[#allocation25_spill] sm:$0xff] }
 0x225   :  { %v2844_v45 = vpop.f32.mrf.mxu1  ;;  %v2952_v15 = vpack.c.bf16 %v2908_v58, %v2904_v40  ;;  %v2732_v52 = vadd.f32 %v2731_v0, %v2619_v56  ;;  %v2843_v19 = vadd.f32 %v2842_v46, %v2730_v16  ;;  %v2911_v51 = vmax.f32 %v2841_v30, 0.0  ;;  %v6886_v0 = vld [vmem:[#allocation26_spill] sm:$0xff]  ;;  %v6887_v30 = vld [vmem:[#allocation28_spill] sm:$0xff] }
 0x226   :  { %v2733_v27 = vpop.f32.mrf.mxu0  ;;  %v2639_v46 = vadd.f32 %v6885_v38, %v2526_v36 }
 0x227   :  { %v2846_v44 = vpop.f32.mrf.mxu1  ;;  %v2845_v42 = vadd.f32 %v2844_v45, %v2732_v52  ;;  %v2734_v32 = vadd.f32 %v2733_v27, %v2621_v8  ;;  %3546 = vmatprep.mubr.bf16.mxu1 %v2952_v15  ;;  %v2912_v21 = vmax.f32 %v2843_v19, 0.0  ;;  %3846 = vmatpush2.bf16.msra.mxu0 %v5426_v10  ;;  %v2641_v52 = vadd.f32 %v6887_v30, %v2528_v59  ;;  %v5435_v19 = vld [vmem:[#allocation9 + $0xb0] ss:$8 sps:$4 sm:$0xff]  }
 0x228   :  { %v2737_v1 = vpop.f32.mrf.mxu0  ;;  %3547 = vmatmul.mubr.bf16.gmra.mxu1 %v2951_v57  ;;  %3847 = vmatprep.subr.bf16.mxu0 %v5431_v34  ;;  %v5432_v57 = vld [vmem:[#allocation9 + $0xc0] ss:$8 sps:$4 sm:$0xff]   ;;  %v5440_v34 = vld [vmem:[#allocation9 + $0xa4] ss:$8 sps:$4 sm:$0xff]  }
 0x229   :  { %v2850_v18 = vpop.f32.mrf.mxu1  ;;  %v2915_v39 = vmax.f32 %v2845_v42, 0.0  ;;  %v2847_v17 = vadd.f32 %v2846_v44, %v2734_v32  ;;  %v2738_v24 = vadd.f32 %v2737_v1, %v6318_v5 }
 0x22a   :  { %v2739_v47 = vpop.f32.mrf.mxu0 }
 0x22b   :  { %v2852_v61 = vpop.f32.mrf.mxu1  ;;  %v2955_v6 = vpack.c.bf16 %v2915_v39, %v2911_v51  ;;  %v2916_v50 = vmax.f32 %v2847_v17, 0.0  ;;  %v2740_v28 = vadd.f32 %v2739_v47, %v6325_v60  ;;  %v2851_v11 = vadd.f32 %v2850_v18, %v2738_v24  ;;  %v5434_v60 = vld [vmem:[#allocation9 + $0xc4] ss:$8 sps:$4 sm:$0xff]   ;;  %3848 = vmatpush2.bf16.msra.mxu0 %v5429_v37  ;;  %v117_v47 = vpop.permute.xlu0 %116 }
 0x22c   :  { %v2741_v29 = vpop.f32.mrf.mxu0  ;;  %3849 = vmatprep.subr.bf16.mxu0 %v5434_v60 }
 0x22d   :  { %v2854_v14 = vpop.f32.mrf.mxu1  ;;  %v2956_v41 = vpack.c.bf16 %v2916_v50, %v2912_v21  ;;  %v2742_v5 = vadd.f32 %v2741_v29, %v2629_v13  ;;  %v2853_v33 = vadd.f32 %v2852_v61, %v2740_v28  ;;  %v2919_v43 = vmax.f32 %v2851_v11, 0.0  ;;  %v123_v28 = vpop.permute.xlu1 %122  ;;  %v5441_v11 = vld [vmem:[#allocation9 + $0x90] ss:$8 sps:$4 sm:$0xff]  }
 0x22e   :  { %v2743_v2 = vpop.f32.mrf.mxu0  ;;  %v6888_v61 = vlaneseq  ;;  %v5631_v21 = vmov 0.0  }
 0x22f   :  { %v2856_v63 = vpop.f32.mrf.mxu1  ;;  %v2855_v35 = vadd.f32 %v2854_v14, %v2742_v5  ;;  %v2744_v22 = vadd.f32 %v2743_v2, %v2631_v12  ;;  %3556 = vmatprep.mubr.bf16.mxu1 %v2956_v41  ;;  %v2920_v58 = vmax.f32 %v2853_v33, 0.0  ;;  %3850 = vmatpush2.bf16.msra.mxu0 %v5432_v57  ;;  %v5438_v14 = vld [vmem:[#allocation9 + $0xa0] ss:$8 sps:$4 sm:$0xff]   ;;  %v5443_v12 = vld [vmem:[#allocation9 + $0x94] ss:$8 sps:$4 sm:$0xff]  }
 0x230   :  { %v2747_v23 = vpop.f32.mrf.mxu0  ;;  %3557 = vmatmul.mubr.bf16.gmra.mxu1 %v2955_v6  ;;  %3851 = vmatprep.subr.bf16.mxu0 %v5437_v54  ;;  %v6426_v10 = vand.u32 127, %v6888_v61  ;;  %v120_v6 = vpop.permute.xlu0 %119  ;;  %v5444_v2 = vld [vmem:[#allocation9 + $0x80] ss:$8 sps:$4 sm:$0xff]  }
 0x231   :  { %v2860_v9 = vpop.f32.mrf.mxu1  ;;  %v2923_v48 = vmax.f32 %v2855_v35, 0.0  ;;  %v2857_v62 = vadd.f32 %v2856_v63, %v2744_v22  ;;  %v2748_v56 = vadd.f32 %v2747_v23, %v6884_v55  ;;  %v126_v20 = vpop.permute.xlu1 %125 }
 0x232   :  { %v2749_v53 = vpop.f32.mrf.mxu0  ;;  %vm163_vm0 = vcmp.eq.s32.totalorder %v117_v47, %v6426_v10  ;;  %vm164_vm2 = vcmp.eq.s32.totalorder %v120_v6, %v6426_v10  ;;  %vm165_vm3 = vcmp.eq.s32.totalorder %v123_v28, %v6426_v10  ;;  %vm166_vm4 = vcmp.eq.s32.totalorder %v126_v20, %v6426_v10 }
 0x233   :  { %v2862_v40 = vpop.f32.mrf.mxu1  ;;  %v2959_v16 = vpack.c.bf16 %v2923_v48, %v2919_v43  ;;  %v2924_v3 = vmax.f32 %v2857_v62, 0.0  ;;  %v2750_v45 = vadd.f32 %v2749_v53, %v6886_v0  ;;  %v2861_v27 = vadd.f32 %v2860_v9, %v2748_v56  ;;  %3852 = vmatpush2.bf16.msra.mxu0 %v5435_v19 }
 0x234   :  { %v2751_v8 = vpop.f32.mrf.mxu0  ;;  %v4504_v50 = vsel %vm163_vm0, 1.0, %v5631_v21  ;;  %v4505_v29 = vsel %vm164_vm2, 1.0, %v5631_v21  ;;  %3853 = vmatprep.subr.bf16.mxu0 %v5440_v34  ;;  %v4506_v41 = vsel %vm165_vm3, 1.0, %v5631_v21  ;;  %v129_v5 = vpop.permute.xlu0 %128  ;;  %v4507_v36 = vsel %vm166_vm4, 1.0, %v5631_v21 }
 0x235   :  { %v2864_v15 = vpop.f32.mrf.mxu1  ;;  %v2960_v26 = vpack.c.bf16 %v2924_v3, %v2920_v58  ;;  %v2752_v44 = vadd.f32 %v2751_v8, %v2639_v46  ;;  %v2863_v42 = vadd.f32 %v2862_v40, %v2750_v45  ;;  %v2927_v1 = vmax.f32 %v2861_v27, 0.0  ;;  %v132_v63 = vpop.permute.xlu1 %131 }
 0x236   :  { %v2753_v49 = vpop.f32.mrf.mxu0  ;;  %vm167_vm5 = vcmp.eq.s32.totalorder %v129_v5, %v6426_v10  ;;  %vm168_vm6 = vcmp.eq.s32.totalorder %v132_v63, %v6426_v10 }
 0x237   :  { %v2865_v32 = vadd.f32 %v2864_v15, %v2752_v44  ;;  %v2754_v7 = vadd.f32 %v2753_v49, %v2641_v52  ;;  %3566 = vmatprep.mubr.bf16.mxu1 %v2960_v26  ;;  %v2866_v31 = vpop.f32.mrf.mxu1  ;;  %v2928_v39 = vmax.f32 %v2863_v42, 0.0  ;;  %3854 = vmatpush2.bf16.msra.mxu0 %v5438_v14  ;;  %v4508_v37 = vsel %vm167_vm5, 1.0, %v5631_v21 }
 0x238   :  { %3567 = vmatmul.mubr.bf16.gmra.mxu1 %v2959_v16  ;;  %3855 = vmatprep.subr.bf16.mxu0 %v5443_v12  ;;  %v135_v33 = vpop.permute.xlu0 %134  ;;  %v4509_v35 = vsel %vm168_vm6, 1.0, %v5631_v21 }
 0x239   :  { %v2931_v18 = vmax.f32 %v2865_v32, 0.0  ;;  %v2867_v51 = vadd.f32 %v2866_v31, %v2754_v7  ;;  %vm169_vm7 = vcmp.eq.s32.totalorder %v135_v33, %v6426_v10  ;;  %v138_v22 = vpop.permute.xlu1 %137 }
 0x23a   :  { %v4510_v60 = vsel %vm169_vm7, 1.0, %v5631_v21  ;;  %vm170_vm8 = vcmp.eq.s32.totalorder %v138_v22, %v6426_v10 }
 0x23b   :  { %v2963_v17 = vpack.c.bf16 %v2931_v18, %v2927_v1  ;;  %v2932_v24 = vmax.f32 %v2867_v51, 0.0  ;;  %3856 = vmatpush2.bf16.msra.mxu0 %v5441_v11  ;;  %v4511_v59 = vsel %vm170_vm8, 1.0, %v5631_v21  ;;  %v3029_v1 = vld [vmem:[%s6787_s6] sm:$0x3]  ;;  %v6889_v51 = vld [vmem:[#allocation37_spill] sm:$0xff] }
 0x23c   :  { %3857 = vmatprep.subr.bf16.mxu0 %v5446_v4  ;;  %v141_v25 = vpop.permute.xlu0 %140 }
 0x23d   :  { %v2964_v13 = vpack.c.bf16 %v2932_v24, %v2928_v39  ;;  %vm171_vm9 = vcmp.eq.s32.totalorder %v141_v25, %v6426_v10  ;;  %v144_v23 = vpop.permute.xlu1 %143  ;;  %v6506_v39 = vrot.slane %v3029_v1, %v6889_v51 }
 0x23e   :  { %v4512_v9 = vsel %vm171_vm9, 1.0, %v5631_v21  ;;  %vm172_vm10 = vcmp.eq.s32.totalorder %v144_v23, %v6426_v10 }
 0x23f   :  { %3576 = vmatprep.mubr.bf16.mxu1 %v2964_v13  ;;  %3858 = vmatpush2.bf16.msra.mxu0 %v5444_v2  ;;  %v4513_v48 = vsel %vm172_vm10, 1.0, %v5631_v21 }
 0x240   :  { %3577 = vmatmul.mubr.bf16.gmra.mxu1 %v2963_v17  ;;  %v147_v43 = vpop.permute.xlu0 %146  ;;  %v6890_v17 = vld [vmem:[#allocation36_spill] sm:$0xff] }
 0x241   :  { %4053 = vmatprep.mubr.f32.mxu1 %v5631_v21  ;;  %vm173_vm11 = vcmp.eq.s32.totalorder %v147_v43, %v6426_v10  ;;  %v150_v62 = vpop.permute.xlu1 %149  ;;  %v6509_v24 = vrot.slane %v3029_v1, %v6890_v17 }
 0x242   :  { %v4514_v55 = vsel %vm173_vm11, 1.0, %v5631_v21  ;;  %vm174_vm12 = vcmp.eq.s32.totalorder %v150_v62, %v6426_v10 }
 0x243   :  { %v4515_v38 = vsel %vm174_vm12, 1.0, %v5631_v21 }
 0x244   :  { %v153_v56 = vpop.permute.xlu0 %152 }
 0x245   :  { %vm175_vm13 = vcmp.eq.s32.totalorder %v153_v56, %v6426_v10  ;;  %v156_v46 = vpop.permute.xlu1 %155 }
 0x246   :  { %v4516_v53 = vsel %vm175_vm13, 1.0, %v5631_v21  ;;  %vm176_vm14 = vcmp.eq.s32.totalorder %v156_v46, %v6426_v10 }
 0x247   :  { %v4517_v57 = vsel %vm176_vm14, 1.0, %v5631_v21 }
 0x248   :  { %4872 = vmatmul.mubr.msk.f32.vlgmr.msra.gmra.mxu1 %vm3940_vm1, %v4504_v50  ;;  %v159_v40 = vpop.permute.xlu0 %158  ;;  %v3395_v0 = vpop.f32.mrf.mxu0 }
 0x249   :  { %4059 = vmatprep.mubr.f32.mxu1 %v5631_v21  ;;  %vm177_vm15 = vcmp.eq.s32.totalorder %v159_v40, %v6426_v10  ;;  %v162_v58 = vpop.permute.xlu1 %161  ;;  %v3396_v6 = vadd.f32 %v3395_v0, %v6509_v24 }
 0x24a   :  { %v4518_v16 = vsel %vm177_vm15, 1.0, %v5631_v21  ;;  %vm178_vm0 = vcmp.eq.s32.totalorder %v162_v58, %v6426_v10  ;;  %v3397_v45 = vpop.f32.mrf.mxu0 }
 0x24b   :  { %v4519_v3 = vsel %vm178_vm0, 1.0, %v5631_v21  ;;  %v3398_v10 = vadd.f32 %v3397_v45, %v6506_v39 }
 0x24c   :  { %4873 = vmatmul.mubr.msk.f32.gmra.mxu1 %vm3940_vm1, %v4505_v29  ;;  %v3399_v54 = vpop.f32.mrf.mxu0 }
 0x24d   :  { %4065 = vmatprep.mubr.f32.mxu1 %v5631_v21 }
 0x24e   :  { %v3401_v8 = vpop.f32.mrf.mxu0 }
 0x24f   :  { %v3402_v28 = vadd.f32 %v3401_v8, %v6506_v39 }
 0x250   :  { %4874 = vmatmul.mubr.msk.f32.gmra.mxu1 %vm3940_vm1, %v4506_v41  ;;  %v3405_v15 = vpop.f32.mrf.mxu0 }
 0x251   :  { %4071 = vmatprep.mubr.f32.mxu1 %v5631_v21 }
 0x252   :  { %v3407_v30 = vpop.f32.mrf.mxu0 }
 0x253   :  { %v3408_v33 = vadd.f32 %v3407_v30, %v6506_v39 }
 0x254   :  { %4875 = vmatmul.mubr.msk.f32.gmra.mxu1 %vm3940_vm1, %v4507_v36  ;;  %v3409_v52 = vpop.f32.mrf.mxu0 }
 0x255   :  { %4077 = vmatprep.mubr.f32.mxu1 %v5631_v21 }
 0x256   :  { %v3411_v26 = vpop.f32.mrf.mxu0 }
 0x257   :  { %v3412_v23 = vadd.f32 %v3411_v26, %v6506_v39 }
 0x258   :  { %4876 = vmatmul.mubr.msk.f32.gmra.mxu1 %vm3940_vm1, %v4508_v37  ;;  %v3415_v27 = vpop.f32.mrf.mxu0 }
 0x259   :  { %4083 = vmatprep.mubr.f32.mxu1 %v5631_v21 }
 0x25a   :  { %v3417_v44 = vpop.f32.mrf.mxu0 }
 0x25c   :  { %4877 = vmatmul.mubr.msk.f32.gmra.mxu1 %vm3940_vm1, %v4509_v35  ;;  %v3419_v49 = vpop.f32.mrf.mxu0  ;;  %v3410_v35 = vadd.f32 %v3409_v52, %v6509_v24 }
 0x25d   :  { %4089 = vmatprep.mubr.f32.mxu1 %v5631_v21  ;;  %v3420_v0 = vadd.f32 %v3419_v49, %v6509_v24 }
 0x25e   :  { %v3421_v19 = vpop.f32.mrf.mxu0 }
 0x25f   :  { %v3422_v30 = vadd.f32 %v3421_v19, %v6506_v39 }
 0x260   :  { %4878 = vmatmul.mubr.msk.f32.gmra.mxu1 %vm3940_vm1, %v4510_v60  ;;  %v6492_v42 = vpop.f32.mrf.mxu0  ;;  %v3406_v60 = vadd.f32 %v3405_v15, %v6509_v24 }
 0x261   :  { %4095 = vmatprep.mubr.f32.mxu1 %v5631_v21 }
 0x262   :  { %v6494_v32 = vpop.f32.mrf.mxu0 }
 0x264   :  { %4879 = vmatmul.mubr.msk.f32.gmra.mxu1 %vm3940_vm1, %v4511_v59  ;;  %v6496_v7 = vpop.f32.mrf.mxu0 }
 0x265   :  { %4101 = vmatprep.mubr.f32.mxu1 %v5631_v21  ;;  %v3430_v19 = vadd.f32 %v6496_v7, %v6509_v24 }
 0x266   :  { %v6498_v31 = vpop.f32.mrf.mxu0 }
 0x268   :  { %4880 = vmatmul.mubr.msk.f32.gmra.mxu1 %vm3940_vm1, %v4512_v9  ;;  %v6503_v18 = vpop.f32.mrf.mxu0 }
 0x269   :  { %4107 = vmatprep.mubr.f32.mxu1 %v5631_v21 }
 0x26a   :  { %v6511_v47 = vpop.f32.mrf.mxu0 }
 0x26c   :  { %4881 = vmatmul.mubr.msk.f32.gmra.mxu1 %vm3940_vm1, %v4513_v48  ;;  %v6517_v14 = vpop.f32.mrf.mxu0 }
 0x26d   :  { %4113 = vmatprep.mubr.f32.mxu1 %v5631_v21 }
 0x26e   :  { %v6519_v2 = vpop.f32.mrf.mxu0 }
 0x270   :  { %4882 = vmatmul.mubr.msk.f32.gmra.mxu1 %vm3940_vm1, %v4514_v55  ;;  %v6525_v48 = vpop.f32.mrf.mxu0 }
 0x271   :  { %4119 = vmatprep.mubr.f32.mxu1 %v5631_v21 }
 0x274   :  { %4883 = vmatmul.mubr.msk.f32.gmra.mxu1 %vm3940_vm1, %v4515_v38 }
 0x275   :  { %4125 = vmatprep.mubr.f32.mxu1 %v5631_v21 }
 0x278   :  { %4884 = vmatmul.mubr.msk.f32.gmra.mxu1 %vm3940_vm1, %v4516_v53 }
 0x279   :  { %4131 = vmatprep.mubr.f32.mxu1 %v5631_v21 }
 0x27c   :  { %4885 = vmatmul.mubr.msk.f32.gmra.mxu1 %vm3940_vm1, %v4517_v57  ;;  %v6527_v57 = vpop.f32.mrf.mxu0 }
 0x27d   :  { %4137 = vmatprep.mubr.f32.mxu1 %v5631_v21 }
 0x27e   :  { %v3449_v1 = vpop.f32.mrf.mxu0 }
 0x280   :  { %4886 = vmatmul.mubr.msk.f32.gmra.mxu1 %vm3940_vm1, %v4518_v16  ;;  %v3451_v49 = vpop.f32.mrf.mxu0 }
 0x281   :  { %4143 = vmatprep.mubr.f32.mxu1 %v5631_v21  ;;  %v3400_v21 = vadd.f32 %v3399_v54, %v6509_v24  ;;  %v3416_v54 = vadd.f32 %v3415_v27, %v6509_v24  ;;  %v3428_v27 = vadd.f32 %v6494_v32, %v6506_v39 }
 0x284   :  { %4887 = vmatmul.mubr.msk.f32.gmra.mxu1 %vm3940_vm1, %v4519_v3  ;;  %v3418_v3 = vadd.f32 %v3417_v44, %v6506_v39 }
 0x2c8   :  { %v3508_v13 = vpop.f32.mrf.mxu1 }
 0x2c9   :  { %v3509_v20 = vadd.f32 %v3508_v13, %v3396_v6 }
 0x2ca   :  { %v3510_v61 = vpop.f32.mrf.mxu1 }
 0x2cb   :  { %v3511_v34 = vadd.f32 %v3510_v61, %v3398_v10  ;;  %v3587_v63 = vmax.f32 %v3509_v20, 0.0  ;;  %v3426_v20 = vadd.f32 %v6492_v42, %v6509_v24 }
 0x2cc   :  { %v3512_v50 = vpop.f32.mrf.mxu1 }
 0x2cd   :  { %v3513_v29 = vadd.f32 %v3512_v50, %v3400_v21  ;;  %v3588_v4 = vmax.f32 %v3511_v34, 0.0 }
 0x2ce   :  { %v3514_v12 = vpop.f32.mrf.mxu1 }
 0x2cf   :  { %v3515_v41 = vadd.f32 %v3514_v12, %v3402_v28  ;;  %v3589_v11 = vmax.f32 %v3513_v29, 0.0 }
 0x2d0   :  { %v3518_v5 = vpop.f32.mrf.mxu1 }
 0x2d1   :  { %v3590_v36 = vmax.f32 %v3515_v41, 0.0  ;;  %v3619_v25 = vpack.c.bf16 %v3589_v11, %v3587_v63  ;;  %v3519_v62 = vadd.f32 %v3518_v5, %v3406_v60  ;;  %v3432_v11 = vadd.f32 %v6498_v31, %v6506_v39 }
 0x2d2   :  { %v3520_v37 = vpop.f32.mrf.mxu1  ;;  %v3440_v31 = vadd.f32 %v6517_v14, %v6509_v24 }
 0x2d3   :  { %v3620_v22 = vpack.c.bf16 %v3590_v36, %v3588_v4  ;;  %v3521_v9 = vadd.f32 %v3520_v37, %v3408_v33  ;;  %v3591_v58 = vmax.f32 %v3519_v62, 0.0  ;;  %v3455_v36 = vpop.f32.mrf.mxu0 }
 0x2d4   :  { %v3522_v59 = vpop.f32.mrf.mxu1 }
 0x2d5   :  { %v3523_v43 = vadd.f32 %v3522_v59, %v3410_v35  ;;  %3859 = vmatprep.mubr.bf16.mxu0 %v3620_v22  ;;  %v3592_v53 = vmax.f32 %v3521_v9, 0.0  ;;  %v3457_v60 = vpop.f32.mrf.mxu0  ;;  %v3438_v59 = vadd.f32 %v6511_v47, %v6506_v39  ;;  %v3436_v9 = vadd.f32 %v6503_v18, %v6509_v24 }
 0x2d6   :  { %v3524_v55 = vpop.f32.mrf.mxu1  ;;  %3860 = vmatmul.mubr.bf16.vlgmr.msra.gmra.mxu0 %v3619_v25 }
 0x2d7   :  { %v3525_v56 = vadd.f32 %v3524_v55, %v3412_v23  ;;  %v3593_v38 = vmax.f32 %v3523_v43, 0.0  ;;  %v3442_v55 = vadd.f32 %v6519_v2, %v6506_v39  ;;  %v3450_v2 = vadd.f32 %v3449_v1, %v6509_v24 }
 0x2d8   :  { %v3528_v46 = vpop.f32.mrf.mxu1 }
 0x2d9   :  { %v3594_v40 = vmax.f32 %v3525_v56, 0.0  ;;  %v3621_v8 = vpack.c.bf16 %v3593_v38, %v3591_v58  ;;  %v3529_v13 = vadd.f32 %v3528_v46, %v3416_v54  ;;  %v3459_v46 = vpop.f32.mrf.mxu0  ;;  %v3448_v54 = vadd.f32 %v6527_v57, %v6506_v39 }
 0x2da   :  { %v3530_v16 = vpop.f32.mrf.mxu1 }
 0x2db   :  { %v3622_v45 = vpack.c.bf16 %v3594_v40, %v3592_v53  ;;  %v3531_v52 = vadd.f32 %v3530_v16, %v3418_v3  ;;  %v3595_v28 = vmax.f32 %v3529_v13, 0.0 }
 0x2dc   :  { %v3532_v15 = vpop.f32.mrf.mxu1 }
 0x2dd   :  { %v3533_v26 = vadd.f32 %v3532_v15, %v3420_v0  ;;  %3869 = vmatprep.mubr.bf16.mxu0 %v3622_v45  ;;  %v3596_v44 = vmax.f32 %v3531_v52, 0.0  ;;  %v3461_v0 = vpop.f32.mrf.mxu0  ;;  %v3446_v15 = vadd.f32 %v6525_v48, %v6509_v24  ;;  %v3458_v48 = vadd.f32 %v3457_v60, %v6506_v39 }
 0x2de   :  { %v3534_v61 = vpop.f32.mrf.mxu1  ;;  %3870 = vmatmul.mubr.bf16.gmra.mxu0 %v3621_v8 }
 0x2df   :  { %v3535_v10 = vadd.f32 %v3534_v61, %v3422_v30  ;;  %v3597_v21 = vmax.f32 %v3533_v26, 0.0  ;;  %v3452_v26 = vadd.f32 %v3451_v49, %v6506_v39 }
 0x2e0   :  { %v3538_v6 = vpop.f32.mrf.mxu1 }
 0x2e1   :  { %v3598_v50 = vmax.f32 %v3535_v10, 0.0  ;;  %v3623_v12 = vpack.c.bf16 %v3597_v21, %v3595_v28  ;;  %v3539_v63 = vadd.f32 %v3538_v6, %v3426_v20  ;;  %v3465_v10 = vpop.f32.mrf.mxu0  ;;  %v3456_v20 = vadd.f32 %v3455_v36, %v6509_v24 }
 0x2e2   :  { %v3540_v34 = vpop.f32.mrf.mxu1 }
 0x2e3   :  { %v3624_v29 = vpack.c.bf16 %v3598_v50, %v3596_v44  ;;  %v3541_v5 = vadd.f32 %v3540_v34, %v3428_v27  ;;  %v3599_v25 = vmax.f32 %v3539_v63, 0.0  ;;  %v3467_v34 = vpop.f32.mrf.mxu0 }
 0x2e4   :  { %v3542_v41 = vpop.f32.mrf.mxu1  ;;  %v3468_v36 = vadd.f32 %v3467_v34, %v6506_v39  ;;  %v4258_v34 = vld [vmem:[%s6790_s9] sm:$0x3] }
 0x2e5   :  { %v3543_v4 = vadd.f32 %v3542_v41, %v3430_v19  ;;  %3879 = vmatprep.mubr.bf16.mxu0 %v3624_v29  ;;  %v3600_v7 = vmax.f32 %v3541_v5, 0.0  ;;  %v3460_v29 = vadd.f32 %v3459_v46, %v6509_v24  ;;  %v3469_v63 = vpop.f32.mrf.mxu0 }
 0x2e6   :  { %v3544_v37 = vpop.f32.mrf.mxu1  ;;  %3880 = vmatmul.mubr.bf16.gmra.mxu0 %v3623_v12 }
 0x2e7   :  { %v3545_v32 = vadd.f32 %v3544_v37, %v3432_v11  ;;  %v3601_v33 = vmax.f32 %v3543_v4, 0.0  ;;  %v3462_v11 = vadd.f32 %v3461_v0, %v6506_v39 }
 0x2e8   :  { %v3548_v35 = vpop.f32.mrf.mxu1 }
 0x2e9   :  { %v3602_v22 = vmax.f32 %v3545_v32, 0.0  ;;  %v3625_v43 = vpack.c.bf16 %v3601_v33, %v3599_v25  ;;  %v3549_v53 = vadd.f32 %v3548_v35, %v3436_v9  ;;  %v3471_v25 = vpop.f32.mrf.mxu0  ;;  %v3466_v9 = vadd.f32 %v3465_v10, %v6509_v24 }
 0x2ea   :  { %v3550_v42 = vpop.f32.mrf.mxu1 }
 0x2eb   :  { %v3626_v23 = vpack.c.bf16 %v3602_v22, %v3600_v7  ;;  %v3551_v56 = vadd.f32 %v3550_v42, %v3438_v59  ;;  %v3603_v45 = vmax.f32 %v3549_v53, 0.0 }
 0x2ec   :  { %v3552_v62 = vpop.f32.mrf.mxu1 }
 0x2ed   :  { %v3553_v38 = vadd.f32 %v3552_v62, %v3440_v31  ;;  %3889 = vmatprep.mubr.bf16.mxu0 %v3626_v23  ;;  %v3604_v14 = vmax.f32 %v3551_v56, 0.0  ;;  %v3470_v31 = vadd.f32 %v3469_v63, %v6509_v24 }
 0x2ee   :  { %v3554_v40 = vpop.f32.mrf.mxu1  ;;  %3890 = vmatmul.mubr.bf16.gmra.mxu0 %v3625_v43 }
 0x2ef   :  { %v3555_v47 = vadd.f32 %v3554_v40, %v3442_v55  ;;  %v3605_v58 = vmax.f32 %v3553_v38, 0.0  ;;  %v3472_v55 = vadd.f32 %v3471_v25, %v6506_v39 }
 0x2f0   :  { %v3558_v16 = vpop.f32.mrf.mxu1 }
 0x2f1   :  { %v3606_v3 = vmax.f32 %v3555_v47, 0.0  ;;  %v3627_v30 = vpack.c.bf16 %v3605_v58, %v3603_v45  ;;  %v3559_v21 = vadd.f32 %v3558_v16, %v3446_v15 }
 0x2f2   :  { %v3560_v18 = vpop.f32.mrf.mxu1 }
 0x2f3   :  { %v3628_v8 = vpack.c.bf16 %v3606_v3, %v3604_v14  ;;  %v3561_v13 = vadd.f32 %v3560_v18, %v3448_v54  ;;  %v3607_v27 = vmax.f32 %v3559_v21, 0.0 }
 0x2f4   :  { %v3562_v52 = vpop.f32.mrf.mxu1 }
 0x2f5   :  { %v3563_v61 = vadd.f32 %v3562_v52, %v3450_v2  ;;  %3899 = vmatprep.mubr.bf16.mxu0 %v3628_v8  ;;  %v3608_v28 = vmax.f32 %v3561_v13, 0.0 }
 0x2f6   :  { %v3564_v6 = vpop.f32.mrf.mxu1  ;;  %3900 = vmatmul.mubr.bf16.gmra.mxu0 %v3627_v30 }
 0x2f7   :  { %v3565_v44 = vadd.f32 %v3564_v6, %v3452_v26  ;;  %v3609_v50 = vmax.f32 %v3563_v61, 0.0  ;;  %v4150_v6 = vld [vmem:[%s6789_s8] sm:$0x3]  ;;  %s5632_s8 = smov [#allocation11]  }
 0x2f8   :  { %v3568_v57 = vpop.f32.mrf.mxu1  ;;  %s4486_s9 = sshll.u32 %s5632_s8, 4  ;;  %s4487_s9 = int_to_ptr.vmem [resolvable:$true] %s4486_s9 }
 0x2f9   :  { %v3610_v1 = vmax.f32 %v3565_v44, 0.0  ;;  %v3629_v12 = vpack.c.bf16 %v3609_v50, %v3607_v27  ;;  %v3569_v37 = vadd.f32 %v3568_v57, %v3456_v20  ;;  %v6581_v44 = vrot.slane %v4150_v6, %v6890_v17  ;;  %s5592_s14 = scalar_lea.vmem %s4487_s9, 4096  ;;  %p5597_p7 = scmp.lt.s32.totalorder %s4487_s9, %s4487_s9 }
 0x2fa   :  { %v3570_v19 = vpop.f32.mrf.mxu1  ;;  %v6595_v20 = vrot.slane %v4258_v34, %v6890_v17  ;;  %p5593_p6 = scmp.ne.s32.totalorder %s4487_s9, %s5592_s14  ;;  %p5598_p8 = scmp.lt.s32.totalorder %s5592_s14, %s5592_s14 }
 0x2fb   :  { %v3630_v49 = vpack.c.bf16 %v3610_v1, %v3608_v28  ;;  %v3571_v5 = vadd.f32 %v3570_v19, %v3458_v48  ;;  %v3611_v42 = vmax.f32 %v3569_v37, 0.0  ;;  %v6586_v1 = vrot.slane %v4150_v6, %v6889_v51 }
 0x2fc   :  { %v3572_v41 = vpop.f32.mrf.mxu1  ;;  %p5599_p9 = por %p5598_p8, %p5597_p7 }
 0x2fd   :  { %v3573_v4 = vadd.f32 %v3572_v41, %v3460_v29  ;;  %3909 = vmatprep.mubr.bf16.mxu0 %v3630_v49  ;;  %v3612_v22 = vmax.f32 %v3571_v5, 0.0  ;;  %v6599_v5 = vrot.slane %v4258_v34, %v6889_v51 }
 0x2fe   :  { %v3574_v32 = vpop.f32.mrf.mxu1  ;;  %3910 = vmatmul.mubr.bf16.gmra.mxu0 %v3629_v12  ;;  %p5600_p10 = pnand %p5599_p9, %p5593_p6 }
 0x2ff   :  { %v3575_v33 = vadd.f32 %v3574_v32, %v3462_v11  ;;  %v3613_v35 = vmax.f32 %v3573_v4, 0.0 }
 0x300   :  { %v3578_v7 = vpop.f32.mrf.mxu1 }
 0x301   :  { %v3614_v60 = vmax.f32 %v3575_v33, 0.0  ;;  %v3631_v43 = vpack.c.bf16 %v3613_v35, %v3611_v42  ;;  %v3579_v46 = vadd.f32 %v3578_v7, %v3466_v9 }
 0x302   :  { %v3580_v59 = vpop.f32.mrf.mxu1 }
 0x303   :  { %v3632_v23 = vpack.c.bf16 %v3614_v60, %v3612_v22  ;;  %v3581_v56 = vadd.f32 %v3580_v59, %v3468_v36  ;;  %v3615_v14 = vmax.f32 %v3579_v46, 0.0 }
 0x304   :  { %v3582_v62 = vpop.f32.mrf.mxu1 }
 0x305   :  { %v3583_v38 = vadd.f32 %v3582_v62, %v3470_v31  ;;  %3919 = vmatprep.mubr.bf16.mxu0 %v3632_v23  ;;  %v3616_v58 = vmax.f32 %v3581_v56, 0.0 }
 0x306   :  { %v3584_v53 = vpop.f32.mrf.mxu1  ;;  %3920 = vmatmul.mubr.bf16.gmra.mxu0 %v3631_v43 }
 0x307   :  { %v3585_v40 = vadd.f32 %v3584_v53, %v3472_v55  ;;  %v3617_v47 = vmax.f32 %v3583_v38, 0.0 }
 0x308   :  { %v4055_v24 = vpop.f32.mrf.mxu1 }
 0x309   :  { %v3618_v16 = vmax.f32 %v3585_v40, 0.0  ;;  %v3633_v0 = vpack.c.bf16 %v3617_v47, %v3615_v14 }
 0x30a   :  { %v4057_v45 = vpop.f32.mrf.mxu1 }
 0x30b   :  { %v3634_v3 = vpack.c.bf16 %v3618_v16, %v3616_v58 }
 0x30c   :  { %v4061_v18 = vpop.f32.mrf.mxu1 }
 0x30d   :  { %3929 = vmatprep.mubr.bf16.mxu0 %v3634_v3 }
 0x30e   :  { %3930 = vmatmul.mubr.bf16.gmra.mxu0 %v3633_v0  ;;  %v4063_v54 = vpop.f32.mrf.mxu1 }
 0x310   :  { %v4067_v39 = vpop.f32.mrf.mxu1 }
 0x312   :  { %v4069_v2 = vpop.f32.mrf.mxu1 }
 0x314   :  { %v4073_v8 = vpop.f32.mrf.mxu1 }
 0x316   :  { %v4075_v15 = vpop.f32.mrf.mxu1 }
 0x318   :  { %v6563_v30 = vpop.f32.mrf.mxu1 }
 0x31a   :  { %v6565_v52 = vpop.f32.mrf.mxu1 }
 0x31c   :  { %v6567_v26 = vpop.f32.mrf.mxu1 }
 0x31e   :  { %v6569_v13 = vpop.f32.mrf.mxu1 }
 0x320   :  { %v6571_v61 = vpop.f32.mrf.mxu1 }
 0x322   :  { %v6573_v10 = vpop.f32.mrf.mxu1 }
 0x324   :  { %v6575_v21 = vpop.f32.mrf.mxu1 }
 0x326   :  { %v6583_v50 = vpop.f32.mrf.mxu1 }
 0x328   :  { %v6592_v29 = vpop.f32.mrf.mxu1 }
 0x32a   :  { %v6602_v33 = vpop.f32.mrf.mxu1 }
 0x32c   :  { %v6608_v23 = vpop.f32.mrf.mxu1 }
 0x32e   :  { %v6614_v16 = vpop.f32.mrf.mxu1 }
 0x330   :  { %v6622_v6 = vpop.f32.mrf.mxu1 }
 0x396   :  { %v3861_v57 = vpop.f32.mrf.mxu0 }
 0x397   :  { %v4056_v28 = vadd.f32 %v4055_v24, %v3861_v57 }
 0x398   :  { %v3863_v27 = vpop.f32.mrf.mxu0 }
 0x399   :  { %v4162_v19 = vadd.f32 %v6581_v44, %v4056_v28  ;;  %v4058_v48 = vadd.f32 %v4057_v45, %v3863_v27 }
 0x39a   :  { %v3865_v49 = vpop.f32.mrf.mxu0 }
 0x39b   :  { %v4194_v12 = vmax.f32 %v4162_v19, 0.0  ;;  %v4163_v41 = vadd.f32 %v6586_v1, %v4058_v48  ;;  %v4062_v11 = vadd.f32 %v4061_v18, %v3865_v49 }
 0x39c   :  { %v3867_v4 = vpop.f32.mrf.mxu0 }
 0x39d   :  { %4226 = vst [vmem:[#allocation11] sm:$0xff] %v4194_v12  ;;  %v4195_v63 = vmax.f32 %v4163_v41, 0.0  ;;  %v4164_v37 = vadd.f32 %v6581_v44, %v4062_v11  ;;  %v4064_v32 = vadd.f32 %v4063_v54, %v3867_v4  ;;  %v4270_v7 = vmul.f32 %v6595_v20, %v4194_v12  ;;  %v6630_v11 = vpop.f32.mrf.mxu1 }
 0x39e   :  { %v3871_v35 = vpop.f32.mrf.mxu0 }
 0x39f   :  { %4227 = vst [vmem:[#allocation11 + $0x8] sm:$0xff] %v4195_v63  ;;  %v4196_v17 = vmax.f32 %v4164_v37, 0.0  ;;  %v4165_v22 = vadd.f32 %v6586_v1, %v4064_v32  ;;  %v4068_v60 = vadd.f32 %v4067_v39, %v3871_v35  ;;  %v4271_v25 = vmul.f32 %v6599_v5, %v4195_v63 }
 0x3a0   :  { %v3873_v51 = vpop.f32.mrf.mxu0 }
 0x3a1   :  { %4228 = vst [vmem:[#allocation11 + $0x10] sm:$0xff] %v4196_v17  ;;  %v4197_v42 = vmax.f32 %v4165_v22, 0.0  ;;  %v4166_v59 = vadd.f32 %v6581_v44, %v4068_v60  ;;  %v4070_v36 = vadd.f32 %v4069_v2, %v3873_v51  ;;  %v4302_v31 = vadd.f32 %v4271_v25, %v4270_v7  ;;  %v6638_v25 = vpop.f32.mrf.mxu1 }
 0x3a2   :  { %v3875_v9 = vpop.f32.mrf.mxu0  ;;  %v4272_v43 = vmul.f32 %v6595_v20, %v4196_v17 }
 0x3a3   :  { %4229 = vst [vmem:[#allocation11 + $0x18] sm:$0xff] %v4197_v42  ;;  %v4198_v62 = vmax.f32 %v4166_v59, 0.0  ;;  %v4167_v55 = vadd.f32 %v6586_v1, %v4070_v36  ;;  %v4074_v56 = vadd.f32 %v4073_v8, %v3875_v9  ;;  %4303 = vadd.xlane.f32.xlu0 %v4302_v31  ;;  %v4273_v38 = vmul.f32 %v6599_v5, %v4197_v42 }
 0x3a4   :  { %v3877_v46 = vpop.f32.mrf.mxu0 }
 0x3a5   :  { %4230 = vst [vmem:[#allocation11 + $0x20] sm:$0xff] %v4198_v62  ;;  %v4199_v53 = vmax.f32 %v4167_v55, 0.0  ;;  %v4168_v40 = vadd.f32 %v6581_v44, %v4074_v56  ;;  %v4076_v47 = vadd.f32 %v4075_v15, %v3877_v46  ;;  %v4305_v58 = vadd.f32 %v4273_v38, %v4272_v43  ;;  %v4123_v56 = vpop.f32.mrf.mxu1 }
 0x3a6   :  { %v3881_v14 = vpop.f32.mrf.mxu0  ;;  %v4274_v3 = vmul.f32 %v6595_v20, %v4198_v62 }
 0x3a7   :  { %4231 = vst [vmem:[#allocation11 + $0x28] sm:$0xff] %v4199_v53  ;;  %v4200_v0 = vmax.f32 %v4168_v40, 0.0  ;;  %v4169_v24 = vadd.f32 %v6586_v1, %v4076_v47  ;;  %v4080_v45 = vadd.f32 %v6563_v30, %v3881_v14  ;;  %4306 = vadd.xlane.f32.xlu1 %v4305_v58  ;;  %v4275_v18 = vmul.f32 %v6599_v5, %v4199_v53 }
 0x3a8   :  { %v3883_v54 = vpop.f32.mrf.mxu0 }
 0x3a9   :  { %4232 = vst [vmem:[#allocation11 + $0x30] sm:$0xff] %v4200_v0  ;;  %v4201_v39 = vmax.f32 %v4169_v24, 0.0  ;;  %v4170_v2 = vadd.f32 %v6581_v44, %v4080_v45  ;;  %v4082_v8 = vadd.f32 %v6565_v52, %v3883_v54  ;;  %v4308_v15 = vadd.f32 %v4275_v18, %v4274_v3  ;;  %v4127_v24 = vpop.f32.mrf.mxu1 }
 0x3aa   :  { %v3885_v57 = vpop.f32.mrf.mxu0  ;;  %v4276_v28 = vmul.f32 %v6595_v20, %v4200_v0 }
 0x3ab   :  { %4233 = vst [vmem:[#allocation11 + $0x38] sm:$0xff] %v4201_v39  ;;  %v4202_v34 = vmax.f32 %v4170_v2, 0.0  ;;  %v4171_v30 = vadd.f32 %v6586_v1, %v4082_v8  ;;  %v4086_v27 = vadd.f32 %v6567_v26, %v3885_v57  ;;  %4309 = vadd.xlane.f32.xlu0 %v4308_v15  ;;  %v4277_v19 = vmul.f32 %v6599_v5, %v4201_v39 }
 0x3ac   :  { %v3887_v48 = vpop.f32.mrf.mxu0 }
 0x3ad   :  { %4234 = vst [vmem:[#allocation11 + $0x40] sm:$0xff] %v4202_v34  ;;  %v4203_v49 = vmax.f32 %v4171_v30, 0.0  ;;  %v4172_v52 = vadd.f32 %v6581_v44, %v4086_v27  ;;  %v4088_v12 = vadd.f32 %v6569_v13, %v3887_v48  ;;  %v4311_v41 = vadd.f32 %v4277_v19, %v4276_v28 }
 0x3ae   :  { %v3891_v4 = vpop.f32.mrf.mxu0  ;;  %v4278_v63 = vmul.f32 %v6595_v20, %v4202_v34  ;;  %v4129_v34 = vpop.f32.mrf.mxu1 }
 0x3af   :  { %4235 = vst [vmem:[#allocation11 + $0x48] sm:$0xff] %v4203_v49  ;;  %v4204_v37 = vmax.f32 %v4172_v52, 0.0  ;;  %v4173_v26 = vadd.f32 %v6586_v1, %v4088_v12  ;;  %v4092_v32 = vadd.f32 %v6571_v61, %v3891_v4  ;;  %4312 = vadd.xlane.f32.xlu0 %v4311_v41  ;;  %v4279_v35 = vmul.f32 %v6599_v5, %v4203_v49 }
 0x3b0   :  { %v3893_v7 = vpop.f32.mrf.mxu0 }
 0x3b1   :  { %4236 = vst [vmem:[#allocation11 + $0x50] sm:$0xff] %v4204_v37  ;;  %v4205_v17 = vmax.f32 %v4173_v26, 0.0  ;;  %v4174_v13 = vadd.f32 %v6581_v44, %v4092_v32  ;;  %v4094_v22 = vadd.f32 %v6573_v10, %v3893_v7  ;;  %v4314_v60 = vadd.f32 %v4279_v35, %v4278_v63  ;;  %v4133_v63 = vpop.f32.mrf.mxu1 }
 0x3b2   :  { %v3895_v51 = vpop.f32.mrf.mxu0  ;;  %v4280_v42 = vmul.f32 %v6595_v20, %v4204_v37 }
 0x3b3   :  { %4237 = vst [vmem:[#allocation11 + $0x58] sm:$0xff] %v4205_v17  ;;  %v4206_v59 = vmax.f32 %v4174_v13, 0.0  ;;  %v4175_v61 = vadd.f32 %v6586_v1, %v4094_v22  ;;  %v4098_v36 = vadd.f32 %v6575_v21, %v3895_v51  ;;  %4315 = vadd.xlane.f32.xlu1 %v4314_v60  ;;  %v4281_v31 = vmul.f32 %v6599_v5, %v4205_v17  ;;  %v4135_v51 = vpop.f32.mrf.mxu1 }
 0x3b4   :  { %v3897_v9 = vpop.f32.mrf.mxu0 }
 0x3b5   :  { %4238 = vst [vmem:[#allocation11 + $0x60] sm:$0xff] %v4206_v59  ;;  %v4207_v43 = vmax.f32 %v4175_v61, 0.0  ;;  %v4176_v10 = vadd.f32 %v6581_v44, %v4098_v36  ;;  %v4100_v62 = vadd.f32 %v6583_v50, %v3897_v9  ;;  %v4317_v55 = vadd.f32 %v4281_v31, %v4280_v42 }
 0x3b6   :  { %v3901_v38 = vpop.f32.mrf.mxu0  ;;  %v4282_v46 = vmul.f32 %v6595_v20, %v4206_v59 }
 0x3b7   :  { %4239 = vst [vmem:[#allocation11 + $0x68] sm:$0xff] %v4207_v43  ;;  %v4208_v53 = vmax.f32 %v4176_v10, 0.0  ;;  %v4177_v40 = vadd.f32 %v6586_v1, %v4100_v62  ;;  %v4104_v21 = vadd.f32 %v6592_v29, %v3901_v38  ;;  %4318 = vadd.xlane.f32.xlu0 %v4317_v55  ;;  %v4283_v47 = vmul.f32 %v6599_v5, %v4207_v43 }
 0x3b8   :  { %v3903_v58 = vpop.f32.mrf.mxu0 }
 0x3b9   :  { %4240 = vst [vmem:[#allocation11 + $0x70] sm:$0xff] %v4208_v53  ;;  %v4209_v14 = vmax.f32 %v4177_v40, 0.0  ;;  %v4178_v3 = vadd.f32 %v6581_v44, %v4104_v21  ;;  %v4106_v50 = vadd.f32 %v6602_v33, %v3903_v58  ;;  %v4320_v0 = vadd.f32 %v4283_v47, %v4282_v46 }
 0x3ba   :  { %v3905_v45 = vpop.f32.mrf.mxu0  ;;  %v4284_v18 = vmul.f32 %v6595_v20, %v4208_v53 }
 0x3bb   :  { %4241 = vst [vmem:[#allocation11 + $0x78] sm:$0xff] %v4209_v14  ;;  %v4210_v54 = vmax.f32 %v4178_v3, 0.0  ;;  %v4179_v39 = vadd.f32 %v6586_v1, %v4106_v50  ;;  %v4110_v29 = vadd.f32 %v6608_v23, %v3905_v45  ;;  %4321 = vadd.xlane.f32.xlu1 %v4320_v0  ;;  %v4285_v2 = vmul.f32 %v6599_v5, %v4209_v14 }
 0x3bc   :  { %v3907_v8 = vpop.f32.mrf.mxu0 }
 0x3bd   :  { %4242 = vst [vmem:[#allocation11 + $0x80] sm:$0xff] %v4210_v54  ;;  %v4211_v15 = vmax.f32 %v4179_v39, 0.0  ;;  %v4180_v57 = vadd.f32 %v6581_v44, %v4110_v29  ;;  %v4112_v33 = vadd.f32 %v6614_v16, %v3907_v8  ;;  %v4323_v28 = vadd.f32 %v4285_v2, %v4284_v18 }
 0x3be   :  { %v3911_v30 = vpop.f32.mrf.mxu0  ;;  %v4286_v27 = vmul.f32 %v6595_v20, %v4210_v54 }
 0x3bf   :  { %4243 = vst [vmem:[#allocation11 + $0x88] sm:$0xff] %v4211_v15  ;;  %v4212_v19 = vmax.f32 %v4180_v57, 0.0  ;;  %v4181_v48 = vadd.f32 %v6586_v1, %v4112_v33  ;;  %v4116_v23 = vadd.f32 %v6622_v6, %v3911_v30  ;;  %4324 = vadd.xlane.f32.xlu0 %v4323_v28  ;;  %v4287_v49 = vmul.f32 %v6599_v5, %v4211_v15 }
 0x3c0   :  { %v3913_v52 = vpop.f32.mrf.mxu0 }
 0x3c1   :  { %4244 = vst [vmem:[#allocation11 + $0x90] sm:$0xff] %v4212_v19  ;;  %v4213_v12 = vmax.f32 %v4181_v48, 0.0  ;;  %v4182_v41 = vadd.f32 %v6581_v44, %v4116_v23  ;;  %v4118_v16 = vadd.f32 %v6630_v11, %v3913_v52  ;;  %v4326_v4 = vadd.f32 %v4287_v49, %v4286_v27 }
 0x3c2   :  { %v3915_v37 = vpop.f32.mrf.mxu0  ;;  %v4288_v26 = vmul.f32 %v6595_v20, %v4212_v19 }
 0x3c3   :  { %4245 = vst [vmem:[#allocation11 + $0x98] sm:$0xff] %v4213_v12  ;;  %v4214_v32 = vmax.f32 %v4182_v41, 0.0  ;;  %v4183_v35 = vadd.f32 %v6586_v1, %v4118_v16  ;;  %v4122_v6 = vadd.f32 %v6638_v25, %v3915_v37  ;;  %4327 = vadd.xlane.f32.xlu1 %v4326_v4  ;;  %v4289_v7 = vmul.f32 %v6599_v5, %v4213_v12 }
 0x3c4   :  { %v3917_v17 = vpop.f32.mrf.mxu0 }
 0x3c5   :  { %4246 = vst [vmem:[#allocation11 + $0xa0] sm:$0xff] %v4214_v32  ;;  %v4215_v13 = vmax.f32 %v4183_v35, 0.0  ;;  %v4184_v22 = vadd.f32 %v6581_v44, %v4122_v6  ;;  %v4124_v11 = vadd.f32 %v4123_v56, %v3917_v17  ;;  %v4329_v60 = vadd.f32 %v4289_v7, %v4288_v26  ;;  %v4139_v56 = vpop.f32.mrf.mxu1 }
 0x3c6   :  { %v3921_v42 = vpop.f32.mrf.mxu0  ;;  %v4290_v59 = vmul.f32 %v6595_v20, %v4214_v32 }
 0x3c7   :  { %4247 = vst [vmem:[#allocation11 + $0xa8] sm:$0xff] %v4215_v13  ;;  %v4216_v61 = vmax.f32 %v4184_v22, 0.0  ;;  %v4185_v36 = vadd.f32 %v6586_v1, %v4124_v11  ;;  %v4128_v31 = vadd.f32 %v4127_v24, %v3921_v42  ;;  %4330 = vadd.xlane.f32.xlu0 %v4329_v60  ;;  %v4291_v25 = vmul.f32 %v6599_v5, %v4215_v13  ;;  %v4141_v24 = vpop.f32.mrf.mxu1 }
 0x3c8   :  { %v3923_v9 = vpop.f32.mrf.mxu0 }
 0x3c9   :  { %4248 = vst [vmem:[#allocation11 + $0xb0] sm:$0xff] %v4216_v61  ;;  %v4217_v43 = vmax.f32 %v4185_v36, 0.0  ;;  %v4186_v10 = vadd.f32 %v6581_v44, %v4128_v31  ;;  %v4130_v62 = vadd.f32 %v4129_v34, %v3923_v9  ;;  %v4332_v55 = vadd.f32 %v4291_v25, %v4290_v59  ;;  %v4145_v8 = vpop.f32.mrf.mxu1 }
 0x3ca   :  { %v3925_v38 = vpop.f32.mrf.mxu0  ;;  %v4292_v46 = vmul.f32 %v6595_v20, %v4216_v61 }
 0x3cb   :  { %4249 = vst [vmem:[#allocation11 + $0xb8] sm:$0xff] %v4217_v43  ;;  %v4218_v53 = vmax.f32 %v4186_v10, 0.0  ;;  %v4187_v40 = vadd.f32 %v6586_v1, %v4130_v62  ;;  %v4134_v21 = vadd.f32 %v4133_v63, %v3925_v38  ;;  %4333 = vadd.xlane.f32.xlu1 %v4332_v55  ;;  %v4293_v47 = vmul.f32 %v6599_v5, %v4217_v43  ;;  %v4147_v52 = vpop.f32.mrf.mxu1 }
 0x3cc   :  { %v3927_v58 = vpop.f32.mrf.mxu0 }
 0x3cd   :  { %4250 = vst [vmem:[#allocation11 + $0xc0] sm:$0xff] %v4218_v53  ;;  %v4219_v14 = vmax.f32 %v4187_v40, 0.0  ;;  %v4188_v3 = vadd.f32 %v6581_v44, %v4134_v21  ;;  %v4136_v50 = vadd.f32 %v4135_v51, %v3927_v58  ;;  %v4335_v0 = vadd.f32 %v4293_v47, %v4292_v46 }
 0x3ce   :  { %v3931_v45 = vpop.f32.mrf.mxu0  ;;  %v4294_v18 = vmul.f32 %v6595_v20, %v4218_v53 }
 0x3cf   :  { %4251 = vst [vmem:[#allocation11 + $0xc8] sm:$0xff] %v4219_v14  ;;  %v4220_v54 = vmax.f32 %v4188_v3, 0.0  ;;  %v4189_v39 = vadd.f32 %v6586_v1, %v4136_v50  ;;  %v4140_v29 = vadd.f32 %v4139_v56, %v3931_v45  ;;  %4336 = vadd.xlane.f32.xlu0 %v4335_v0  ;;  %v4295_v2 = vmul.f32 %v6599_v5, %v4219_v14 }
 0x3d0   :  { %v3933_v15 = vpop.f32.mrf.mxu0 }
 0x3d1   :  { %4252 = vst [vmem:[#allocation11 + $0xd0] sm:$0xff] %v4220_v54  ;;  %v4221_v57 = vmax.f32 %v4189_v39, 0.0  ;;  %v4190_v33 = vadd.f32 %v6581_v44, %v4140_v29  ;;  %v4142_v28 = vadd.f32 %v4141_v24, %v3933_v15  ;;  %v4338_v34 = vadd.f32 %v4295_v2, %v4294_v18 }
 0x3d2   :  { %v3935_v30 = vpop.f32.mrf.mxu0  ;;  %v4296_v27 = vmul.f32 %v6595_v20, %v4220_v54 }
 0x3d3   :  { %4253 = vst [vmem:[#allocation11 + $0xd8] sm:$0xff] %v4221_v57  ;;  %v4222_v19 = vmax.f32 %v4190_v33, 0.0  ;;  %v4191_v48 = vadd.f32 %v6586_v1, %v4142_v28  ;;  %v4146_v23 = vadd.f32 %v4145_v8, %v3935_v30  ;;  %4339 = vadd.xlane.f32.xlu1 %v4338_v34  ;;  %v4297_v49 = vmul.f32 %v6599_v5, %v4221_v57 }
 0x3d4   :  { %v3937_v12 = vpop.f32.mrf.mxu0 }
 0x3d5   :  { %4254 = vst [vmem:[#allocation11 + $0xe0] sm:$0xff] %v4222_v19  ;;  %v4223_v41 = vmax.f32 %v4191_v48, 0.0  ;;  %v4192_v16 = vadd.f32 %v6581_v44, %v4146_v23  ;;  %v4148_v4 = vadd.f32 %v4147_v52, %v3937_v12  ;;  %v4341_v63 = vadd.f32 %v4297_v49, %v4296_v27 }
 0x3d6   :  { %v4298_v32 = vmul.f32 %v6595_v20, %v4222_v19 }
 0x3d7   :  { %4255 = vst [vmem:[#allocation11 + $0xe8] sm:$0xff] %v4223_v41  ;;  %v4224_v37 = vmax.f32 %v4192_v16, 0.0  ;;  %v4193_v26 = vadd.f32 %v6586_v1, %v4148_v4  ;;  %4342 = vadd.xlane.f32.xlu0 %v4341_v63  ;;  %v4299_v35 = vmul.f32 %v6599_v5, %v4223_v41 }
 0x3d9   :  { %4256 = vst [vmem:[#allocation11 + $0xf0] sm:$0xff] %v4224_v37  ;;  %v4225_v6 = vmax.f32 %v4193_v26, 0.0  ;;  %v4344_v7 = vadd.f32 %v4299_v35, %v4298_v32  ;;  %v4300_v17 = vmul.f32 %v6595_v20, %v4224_v37 }
 0x3db   :  { %4257 = vst [vmem:[#allocation11 + $0xf8] sm:$0xff] %v4225_v6  ;;  %4345 = vadd.xlane.f32.xlu1 %v4344_v7  ;;  %v4301_v44 = vmul.f32 %v6599_v5, %v4225_v6 }
 0x3dd   :  { %v4347_v13 = vadd.f32 %v4301_v44, %v4300_v17 }
 0x3df   :  { %4348 = vadd.xlane.f32.xlu0 %v4347_v13 }
 0x3e0   :  { %5603 = shalt.err (!%p5600_p10)
}
 0x3e1   :  { %4492 = dma.vmem_to_hbm [thread:$0]  %s4487_s9, 4096, %s6792_s11, [#allocation5], %s5621_s24, %s5621_s24, %s5622_s25   ;;  %vm4464_vm1 = vcmask 7168  }
 0x3e2   :  { %v6699_v1 = vstv %s6791_s10 }
 0x42c   :  { %v4304_v20 = vpop.xlane.xlu0 %4303 }
 0x42d   :  { %v4352_v5 = vadd.f32 %v6699_v1, %v4304_v20 }
 0x42f   :  { %v4888_v22 = vmul.f32 -1.442695, %v4352_v5 }
 0x430   :  { %v4307_v11 = vpop.xlane.xlu1 %4306 }
 0x431   :  { %5447 = vpow2.f32 %v4888_v22  ;;  %v4353_v60 = vadd.f32 %v6699_v1, %v4307_v11 }
 0x433   :  { %v4889_v51 = vmul.f32 -1.442695, %v4353_v60 }
 0x434   :  { %v4310_v42 = vpop.xlane.xlu0 %4309 }
 0x435   :  { %5449 = vpow2.f32 %v4889_v51  ;;  %v4354_v59 = vadd.f32 %v6699_v1, %v4310_v42 }
 0x437   :  { %v4890_v61 = vmul.f32 -1.442695, %v4354_v59 }
 0x438   :  { %v4313_v36 = vpop.xlane.xlu0 %4312 }
 0x439   :  { %5451 = vpow2.f32 %v4890_v61  ;;  %v4355_v31 = vadd.f32 %v6699_v1, %v4313_v36 }
 0x43b   :  { %v4891_v25 = vmul.f32 -1.442695, %v4355_v31 }
 0x43c   :  { %v4316_v9 = vpop.xlane.xlu1 %4315 }
 0x43d   :  { %5453 = vpow2.f32 %v4891_v25  ;;  %v4356_v43 = vadd.f32 %v6699_v1, %v4316_v9 }
 0x43e   :  { %v5448_v10 = vpop.eup %5447 }
 0x43f   :  { %v4416_v62 = vadd.f32 1.0, %v5448_v10  ;;  %v4892_v55 = vmul.f32 -1.442695, %v4356_v43 }
 0x440   :  { %v4319_v56 = vpop.xlane.xlu0 %4318 }
 0x441   :  { %5455 = vrcp.f32 %v4416_v62  ;;  %v4357_v38 = vadd.f32 %v6699_v1, %v4319_v56 }
 0x442   :  { %v5450_v46 = vpop.eup %5449  ;;  %5457 = vpow2.f32 %v4892_v55 }
 0x443   :  { %v4417_v53 = vadd.f32 1.0, %v5450_v46  ;;  %v4893_v40 = vmul.f32 -1.442695, %v4357_v38 }
 0x444   :  { %v4322_v21 = vpop.xlane.xlu1 %4321 }
 0x445   :  { %5459 = vrcp.f32 %v4417_v53  ;;  %v4358_v47 = vadd.f32 %v6699_v1, %v4322_v21 }
 0x446   :  { %v5452_v58 = vpop.eup %5451  ;;  %5461 = vpow2.f32 %v4893_v40 }
 0x447   :  { %v4418_v14 = vadd.f32 1.0, %v5452_v58  ;;  %v4894_v3 = vmul.f32 -1.442695, %v4358_v47 }
 0x448   :  { %v4325_v50 = vpop.xlane.xlu0 %4324 }
 0x449   :  { %5463 = vrcp.f32 %v4418_v14  ;;  %v4359_v0 = vadd.f32 %v6699_v1, %v4325_v50 }
 0x44a   :  { %v5454_v24 = vpop.eup %5453  ;;  %5465 = vpow2.f32 %v4894_v3 }
 0x44b   :  { %v4419_v45 = vadd.f32 1.0, %v5454_v24  ;;  %v4895_v18 = vmul.f32 -1.442695, %v4359_v0 }
 0x44c   :  { %v4328_v54 = vpop.xlane.xlu1 %4327 }
 0x44d   :  { %5467 = vrcp.f32 %v4419_v45  ;;  %v4360_v39 = vadd.f32 %v6699_v1, %v4328_v54 }
 0x44e   :  { %v5456_v29 = vpop.eup %5455  ;;  %5469 = vpow2.f32 %v4895_v18 }
 0x44f   :  { %v5458_v2 = vpop.eup %5457  ;;  %4465 = vst.msk [vmem:[%s6793_s12] sm:$0xff] %vm4464_vm1, %v5456_v29  ;;  %v4896_v8 = vmul.f32 -1.442695, %v4360_v39 }
 0x450   :  { %v4420_v15 = vadd.f32 1.0, %v5458_v2  ;;  %v4331_v57 = vpop.xlane.xlu0 %4330 }
 0x451   :  { %5471 = vpow2.f32 %v4896_v8  ;;  %v4361_v33 = vadd.f32 %v6699_v1, %v4331_v57 }
 0x452   :  { %v5460_v28 = vpop.eup %5459  ;;  %5473 = vrcp.f32 %v4420_v15 }
 0x453   :  { %v5462_v34 = vpop.eup %5461  ;;  %4466 = vst.msk [vmem:[%s6793_s12 + $0x8] sm:$0xff] %vm4464_vm1, %v5460_v28  ;;  %v4897_v30 = vmul.f32 -1.442695, %v4361_v33 }
 0x454   :  { %v4421_v27 = vadd.f32 1.0, %v5462_v34  ;;  %v4334_v19 = vpop.xlane.xlu1 %4333 }
 0x455   :  { %5475 = vpow2.f32 %v4897_v30  ;;  %v4362_v48 = vadd.f32 %v6699_v1, %v4334_v19 }
 0x456   :  { %v5464_v23 = vpop.eup %5463  ;;  %5477 = vrcp.f32 %v4421_v27 }
 0x457   :  { %v5466_v49 = vpop.eup %5465  ;;  %4467 = vst.msk [vmem:[%s6793_s12 + $0x10] sm:$0xff] %vm4464_vm1, %v5464_v23  ;;  %v4898_v52 = vmul.f32 -1.442695, %v4362_v48 }
 0x458   :  { %v4422_v12 = vadd.f32 1.0, %v5466_v49  ;;  %v4337_v41 = vpop.xlane.xlu0 %4336 }
 0x459   :  { %5479 = vpow2.f32 %v4898_v52  ;;  %v4363_v16 = vadd.f32 %v6699_v1, %v4337_v41 }
 0x45a   :  { %v5468_v4 = vpop.eup %5467  ;;  %5481 = vrcp.f32 %v4422_v12 }
 0x45b   :  { %v5470_v63 = vpop.eup %5469  ;;  %4468 = vst.msk [vmem:[%s6793_s12 + $0x18] sm:$0xff] %vm4464_vm1, %v5468_v4  ;;  %v4899_v37 = vmul.f32 -1.442695, %v4363_v16 }
 0x45c   :  { %v4423_v26 = vadd.f32 1.0, %v5470_v63  ;;  %v4340_v32 = vpop.xlane.xlu1 %4339 }
 0x45d   :  { %5483 = vpow2.f32 %v4899_v37  ;;  %v4364_v35 = vadd.f32 %v6699_v1, %v4340_v32 }
 0x45e   :  { %v5472_v6 = vpop.eup %5471  ;;  %5485 = vrcp.f32 %v4423_v26 }
 0x45f   :  { %v5474_v7 = vpop.eup %5473  ;;  %v4424_v17 = vadd.f32 1.0, %v5472_v6  ;;  %v4900_v44 = vmul.f32 -1.442695, %v4364_v35 }
 0x460   :  { %4469 = vst.msk [vmem:[%s6793_s12 + $0x20] sm:$0xff] %vm4464_vm1, %v5474_v7  ;;  %v4343_v13 = vpop.xlane.xlu0 %4342 }
 0x461   :  { %5487 = vrcp.f32 %v4424_v17  ;;  %v4365_v20 = vadd.f32 %v6699_v1, %v4343_v13 }
 0x462   :  { %v5476_v5 = vpop.eup %5475  ;;  %5489 = vpow2.f32 %v4900_v44 }
 0x463   :  { %v5478_v22 = vpop.eup %5477  ;;  %v4425_v11 = vadd.f32 1.0, %v5476_v5  ;;  %v4901_v60 = vmul.f32 -1.442695, %v4365_v20 }
 0x464   :  { %4470 = vst.msk [vmem:[%s6793_s12 + $0x28] sm:$0xff] %vm4464_vm1, %v5478_v22  ;;  %v4346_v51 = vpop.xlane.xlu1 %4345 }
 0x465   :  { %5491 = vrcp.f32 %v4425_v11  ;;  %v4366_v42 = vadd.f32 %v6699_v1, %v4346_v51 }
 0x466   :  { %v5480_v59 = vpop.eup %5479  ;;  %5493 = vpow2.f32 %v4901_v60 }
 0x467   :  { %v5482_v61 = vpop.eup %5481  ;;  %v4426_v36 = vadd.f32 1.0, %v5480_v59  ;;  %v4902_v31 = vmul.f32 -1.442695, %v4366_v42 }
 0x468   :  { %4471 = vst.msk [vmem:[%s6793_s12 + $0x30] sm:$0xff] %vm4464_vm1, %v5482_v61  ;;  %v4349_v25 = vpop.xlane.xlu0 %4348 }
 0x469   :  { %5495 = vrcp.f32 %v4426_v36  ;;  %v4367_v9 = vadd.f32 %v6699_v1, %v4349_v25 }
 0x46a   :  { %v5484_v43 = vpop.eup %5483  ;;  %5497 = vpow2.f32 %v4902_v31 }
 0x46b   :  { %v5486_v10 = vpop.eup %5485  ;;  %v4427_v62 = vadd.f32 1.0, %v5484_v43  ;;  %v4903_v55 = vmul.f32 -1.442695, %v4367_v9 }
 0x46c   :  { %4472 = vst.msk [vmem:[%s6793_s12 + $0x38] sm:$0xff] %vm4464_vm1, %v5486_v10 }
 0x46d   :  { %5499 = vrcp.f32 %v4427_v62 }
 0x46e   :  { %v5488_v56 = vpop.eup %5487  ;;  %5501 = vpow2.f32 %v4903_v55 }
 0x46f   :  { %v5490_v38 = vpop.eup %5489  ;;  %4473 = vst.msk [vmem:[%s6793_s12 + $0x40] sm:$0xff] %vm4464_vm1, %v5488_v56 }
 0x470   :  { %v4428_v1 = vadd.f32 1.0, %v5490_v38 }
 0x472   :  { %v5492_v46 = vpop.eup %5491  ;;  %5503 = vrcp.f32 %v4428_v1 }
 0x473   :  { %v5494_v53 = vpop.eup %5493  ;;  %4474 = vst.msk [vmem:[%s6793_s12 + $0x48] sm:$0xff] %vm4464_vm1, %v5492_v46 }
 0x474   :  { %v4429_v40 = vadd.f32 1.0, %v5494_v53 }
 0x476   :  { %v5496_v21 = vpop.eup %5495  ;;  %5505 = vrcp.f32 %v4429_v40 }
 0x477   :  { %v5498_v47 = vpop.eup %5497  ;;  %4475 = vst.msk [vmem:[%s6793_s12 + $0x50] sm:$0xff] %vm4464_vm1, %v5496_v21 }
 0x478   :  { %v4430_v58 = vadd.f32 1.0, %v5498_v47 }
 0x47a   :  { %v5500_v14 = vpop.eup %5499  ;;  %5507 = vrcp.f32 %v4430_v58 }
 0x47b   :  { %v5502_v3 = vpop.eup %5501  ;;  %4476 = vst.msk [vmem:[%s6793_s12 + $0x58] sm:$0xff] %vm4464_vm1, %v5500_v14 }
 0x47c   :  { %v4431_v50 = vadd.f32 1.0, %v5502_v3 }
 0x47e   :  { %5509 = vrcp.f32 %v4431_v50 }
 0x47f   :  { %v5504_v0 = vpop.eup %5503 }
 0x480   :  { %4477 = vst.msk [vmem:[%s6793_s12 + $0x60] sm:$0xff] %vm4464_vm1, %v5504_v0 }
 0x483   :  { %v5506_v24 = vpop.eup %5505 }
 0x484   :  { %4478 = vst.msk [vmem:[%s6793_s12 + $0x68] sm:$0xff] %vm4464_vm1, %v5506_v24 }
 0x487   :  { %v5508_v45 = vpop.eup %5507 }
 0x488   :  { %4479 = vst.msk [vmem:[%s6793_s12 + $0x70] sm:$0xff] %vm4464_vm1, %v5508_v45 }
 0x48b   :  { %v5510_v18 = vpop.eup %5509 }
 0x48c   :  { %4480 = vst.msk [vmem:[%s6793_s12 + $0x78] sm:$0xff] %vm4464_vm1, %v5510_v18 }
 0x48d   :  { %5618 = dma.done.wait [#allocation5], 4096  }
 0x48e   :  { %5619 = vsyncadd [#allocation5], 4294963200 }
 0x48f   :  { %4500 = vsyncpa [#allocation4], 1 }
 0x490   :  { %4501 = vsyncpa [#allocation7], 1 }
 0x491   :  { %4502 = vsyncpa [#allocation10], 1 }
 0x492   :  { %4503 = vsyncpa [#allocation5], 1 }

</bundles_post_ra>
